<compile_context>
chip_gen: v7x
topology: tpu7x:2x2x1
jax: 0.10.0
libtpu: 0.0.40
codegen_flags: <defaults>
</compile_context>

<pallas_src>
import functools

import jax
import jax.numpy as jnp
from jax import lax
from jax.experimental import pallas as pl
from jax.experimental.pallas import tpu as pltpu

CPAD = 128      # padded hidden-channel width (lane dim)
HALF = CPAD // 2
COUT_PAD = 8    # padded output-channel width (4 real channels)
HALO = 4        # one halo row per side per conv layer (4 layers of k=3, pad=1)


def _unet_kernel(x_ref, w1_ref, b1_ref, w2a_ref, w2b_ref, b2_ref,
                 w30_ref, w31_ref, w32_ref, b3_ref,
                 w4a_ref, w4b_ref, b4_ref, o_ref, *, seq_len, l_tile):
    R = l_tile + 2 * HALO
    t = pl.program_id(1)

    # Rows whose global position lies outside [0, seq_len) must be zero after
    # every layer: they are exactly the zero padding the next layer sees.
    gpos = t * l_tile + lax.broadcasted_iota(jnp.int32, (R, 1), 0) - HALO
    valid = jnp.logical_and(gpos >= 0, gpos < seq_len)            # (R, 1)

    # Lane-half mask used by the two-tap packing of layers 2 and 4.
    low_half = lax.broadcasted_iota(jnp.int32, (1, CPAD), 1) < HALF

    def rolls(h):
        # h[l-1] and h[l+1]; wrap-around garbage only lands in discarded halo.
        return pltpu.roll(h, 1, axis=0), pltpu.roll(h, R - 1, axis=0)

    # ---- layer 1: Conv1d(1 -> 64) + ReLU on the VPU (cin == 1) -------------
    # Channels are replicated across both lane halves (done in weight prep) so
    # later layers can pack two 64-channel taps per 128-lane MXU block.
    x = x_ref[0, 0]                                               # (R, 1) f32
    xp, xn = rolls(x)                                             # roll input
    w1 = w1_ref[...]                                              # (3, CPAD)
    h = xp * w1[0:1, :] + x * w1[1:2, :] + xn * w1[2:3, :] + b1_ref[...]
    h = jnp.where(valid, jnp.maximum(h, 0.0), 0.0)

    # ---- layer 2: Conv1d(64 -> 128) + ReLU, packed two-tap MXU --------------
    hp, hn = rolls(h)
    blk_a = jnp.where(low_half, hp, h).astype(jnp.bfloat16)   # [prev | cur]
    blk_b = hn.astype(jnp.bfloat16)                            # [next | (0-wt)]
    y = jnp.dot(blk_a, w2a_ref[...], preferred_element_type=jnp.float32)
    y = y + jnp.dot(blk_b, w2b_ref[...], preferred_element_type=jnp.float32)
    y = y + b2_ref[...]
    h = jnp.where(valid, jnp.maximum(y, 0.0), 0.0)             # 128 real chans

    # ---- layer 3: Conv1d(128 -> 64) + ReLU, three K=128 dots ----------------
    # Output columns are duplicated across lane halves (weight prep) so layer 4
    # can reuse the two-tap packing.
    hp, hn = rolls(h)
    y = jnp.dot(hp.astype(jnp.bfloat16), w30_ref[...],
                preferred_element_type=jnp.float32)
    y = y + jnp.dot(h.astype(jnp.bfloat16), w31_ref[...],
                    preferred_element_type=jnp.float32)
    y = y + jnp.dot(hn.astype(jnp.bfloat16), w32_ref[...],
                    preferred_element_type=jnp.float32)
    y = y + b3_ref[...]
    h = jnp.where(valid, jnp.maximum(y, 0.0), 0.0)             # duplicated

    # ---- layer 4: Conv1d(64 -> 4), packed two-tap MXU, no activation --------
    hp, hn = rolls(h)
    blk_a = jnp.where(low_half, hp, h).astype(jnp.bfloat16)
    blk_b = hn.astype(jnp.bfloat16)
    y = jnp.dot(blk_a, w4a_ref[...], preferred_element_type=jnp.float32)
    y = y + jnp.dot(blk_b, w4b_ref[...], preferred_element_type=jnp.float32)
    y = y + b4_ref[...]                                           # (R, 8)

    # Store all R rows; halo rows / pad channels are dropped in XLA (avoids a
    # non-8-aligned sublane slice on the store path).
    o_ref[0, 0] = y


def _prep_weights(params):
    """Pad / transpose / pack PyTorch-layout Conv1d params for the kernel."""
    (w1, b1), (w2, b2), (w3, b3), (w4, b4) = params

    # layer 1: (64, 1, 3) -> (3, CPAD) f32, channels replicated in both halves.
    c1 = w1.shape[0]
    w1t = jnp.transpose(w1[:, 0, :], (1, 0))                      # (3, 64)
    w1p = jnp.zeros((3, CPAD), jnp.float32)
    w1p = w1p.at[:, :c1].set(w1t).at[:, HALF:HALF + c1].set(w1t)

    def dup_bias(b):
        n = b.shape[0]
        out = jnp.zeros((1, CPAD), jnp.float32)
        return out.at[0, :n].set(b).at[0, HALF:HALF + n].set(b)

    def pad_bias(b, width):
        return jnp.zeros((1, width), jnp.float32).at[0, :b.shape[0]].set(b)

    def pack_two_taps(w, cout_pad):
        # w: (cout, cin, 3) with cin <= HALF.  Block A rows = [tap0 | tap1]
        # (pairs with LHS lanes [h[l-1] chans | h[l] chans]); block B rows =
        # [tap2 | zeros] (pairs with [h[l+1] chans | duplicate-junk]).
        cout, cin, _ = w.shape
        wt = jnp.transpose(w, (1, 0, 2))                           # (cin,cout,3)
        a = jnp.zeros((CPAD, cout_pad), jnp.float32)
        a = a.at[:cin, :cout].set(wt[:, :, 0])
        a = a.at[HALF:HALF + cin, :cout].set(wt[:, :, 1])
        b = jnp.zeros((CPAD, cout_pad), jnp.float32)
        b = b.at[:cin, :cout].set(wt[:, :, 2])
        return a.astype(jnp.bfloat16), b.astype(jnp.bfloat16)

    def per_tap_dup_out(w):
        # w: (cout, CPAD, 3) with cout <= HALF -> three (CPAD, CPAD) matrices,
        # output columns duplicated in both lane halves.
        cout, cin, _ = w.shape
        wt = jnp.transpose(w, (1, 0, 2))                           # (cin,cout,3)
        mats = []
        for k in range(3):
            m = jnp.zeros((CPAD, CPAD), jnp.float32)
            m = m.at[:cin, :cout].set(wt[:, :, k])
            m = m.at[:cin, HALF:HALF + cout].set(wt[:, :, k])
            mats.append(m.astype(jnp.bfloat16))
        return mats

    w2a, w2b = pack_two_taps(w2, CPAD)
    w30, w31, w32 = per_tap_dup_out(w3)
    w4a, w4b = pack_two_taps(w4, COUT_PAD)

    return (w1p, dup_bias(b1),
            w2a, w2b, pad_bias(b2, CPAD),
            w30, w31, w32, dup_bias(b3),
            w4a, w4b, pad_bias(b4, COUT_PAD))


def unet_separator(x, params, *, l_tile=1016):
    """x: (N, 1, L) float32 -> (N, 4, L) float32 (UNetSeparator.forward).

    l_tile should satisfy l_tile % 8 == 0; l_tile + 8 a multiple of 256
    (e.g. 248, 504, 1016, 2040) keeps every MXU pass full on v5e/v6e/v7x.
    """
    N, cin, L = x.shape
    assert cin == 1
    assert l_tile % 8 == 0 and l_tile >= 2 * HALO

    T = -(-L // l_tile)                 # number of sequence tiles
    L_eff = T * l_tile
    R = l_tile + 2 * HALO

    # Overlapping (l_tile + 8)-row windows of the zero-extended 1-ch input.
    x_ext = jnp.zeros((N, L_eff + 2 * HALO), jnp.float32)
    x_ext = x_ext.at[:, HALO:HALO + L].set(x[:, 0, :])
    main = x_ext[:, :L_eff].reshape(N, T, l_tile)
    tail = jnp.pad(x_ext[:, l_tile:], ((0, 0), (0, l_tile - 2 * HALO)))
    tail = tail.reshape(N, T, l_tile)[:, :, :2 * HALO]
    x_win = jnp.concatenate([main, tail], axis=2)[..., None]     # (N, T, R, 1)

    wts = _prep_weights(params)

    def const_spec(shape):
        return pl.BlockSpec(shape, lambda n, t: (0,) * len(shape))

    kernel = functools.partial(_unet_kernel, seq_len=L, l_tile=l_tile)

    out_w = pl.pallas_call(
        kernel,
        out_shape=jax.ShapeDtypeStruct((N, T, R, COUT_PAD), jnp.float32),
        grid_spec=pltpu.PrefetchScalarGridSpec(
            num_scalar_prefetch=0,
            grid=(N, T),
            in_specs=[
                pl.BlockSpec((1, 1, R, 1), lambda n, t: (n, t, 0, 0)),
                const_spec((3, CPAD)),             # w1 (dup halves)
                const_spec((1, CPAD)),             # b1 (dup)
                const_spec((CPAD, CPAD)),          # w2 block A [tap0|tap1]
                const_spec((CPAD, CPAD)),          # w2 block B [tap2|0]
                const_spec((1, CPAD)),             # b2
                const_spec((CPAD, CPAD)),          # w3 tap0 (dup out cols)
                const_spec((CPAD, CPAD)),          # w3 tap1
                const_spec((CPAD, CPAD)),          # w3 tap2
                const_spec((1, CPAD)),             # b3 (dup)
                const_spec((CPAD, COUT_PAD)),      # w4 block A
                const_spec((CPAD, COUT_PAD)),      # w4 block B
                const_spec((1, COUT_PAD)),         # b4
            ],
            out_specs=pl.BlockSpec((1, 1, R, COUT_PAD),
                                   lambda n, t: (n, t, 0, 0)),
        ),
        compiler_params=pltpu.CompilerParams(
            dimension_semantics=("parallel", "parallel")),
    )(x_win, *wts)

    # Drop halo rows + pad channels, stitch tiles, crop padding.
    kept = out_w[:, :, HALO:HALO + l_tile, :4]                    # (N,T,lt,4)
    out = jnp.transpose(kept, (0, 3, 1, 2)).reshape(N, 4, L_eff)
    return out[:, :, :L]


def _reference(x, params):
    """Pure-JAX f32 reference (same semantics as the PyTorch Conv1d stack)."""
    h = x
    dn = ("NCH", "OIH", "NCH")
    for i, (w, b) in enumerate(params):
        h = lax.conv_general_dilated(h, w, window_strides=(1,),
                                     padding=[(1, 1)], dimension_numbers=dn)
        h = h + b[None, :, None]
        if i < 3:
            h = jnp.maximum(h, 0.0)
    return h


def _init_params(key):
    """Deterministic synthetic params; shapes from the module's __init__."""
    shapes = [((64, 1, 3), (64,)),      # encoder conv1
              ((128, 64, 3), (128,)),   # encoder conv2
              ((64, 128, 3), (64,)),    # decoder conv1
              ((4, 64, 3), (4,))]       # decoder conv2
    params = []
    for ws, bs in shapes:
        key, kw, kb = jax.random.split(key, 3)
        params.append((0.1 * jax.random.normal(kw, ws, jnp.float32),
                       0.01 * jax.random.normal(kb, bs, jnp.float32)))
    return params


if __name__ == "__main__":
    key = jax.random.PRNGKey(0)
    params = _init_params(key)
    key, kx = jax.random.split(key)

    N, L = 2, 600
    x = jax.random.normal(kx, (N, 1, L), jnp.float32)

    # Small MXU-aligned tile (R = 256) so the test exercises multiple tiles,
    # cross-tile halos and the ragged final tile.  Production default is 1016.
    out = jax.block_until_ready(unet_separator(x, params, l_tile=248))
    ref = _reference(x, params)

    assert out.shape == (N, 4, L), out.shape
    err = float(jnp.max(jnp.abs(out - ref)))
    assert err < 2e-2, err               # bf16 MXU inputs, f32 accumulation
    print("KERNEL_OK")
</pallas_src>

<mosaic_0001>
module attributes {stable_mosaic.version = 11 : i64} {
  func.func @_unet_kernel(%arg0: i32, %arg1: i32, %arg2: memref<1x1x256x1xf32, #tpu.memory_space<vmem>>, %arg3: memref<3x128xf32, #tpu.memory_space<vmem>>, %arg4: memref<1x128xf32, #tpu.memory_space<vmem>>, %arg5: memref<128x128xbf16, #tpu.memory_space<vmem>>, %arg6: memref<128x128xbf16, #tpu.memory_space<vmem>>, %arg7: memref<1x128xf32, #tpu.memory_space<vmem>>, %arg8: memref<128x128xbf16, #tpu.memory_space<vmem>>, %arg9: memref<128x128xbf16, #tpu.memory_space<vmem>>, %arg10: memref<128x128xbf16, #tpu.memory_space<vmem>>, %arg11: memref<1x128xf32, #tpu.memory_space<vmem>>, %arg12: memref<128x8xbf16, #tpu.memory_space<vmem>>, %arg13: memref<128x8xbf16, #tpu.memory_space<vmem>>, %arg14: memref<1x8xf32, #tpu.memory_space<vmem>>, %arg15: memref<1x1x256x8xf32, #tpu.memory_space<vmem>>) attributes {dimension_semantics = [#tpu.dimension_semantics<parallel>, #tpu.dimension_semantics<parallel>], iteration_bounds = array<i64: 2, 3>, scalar_prefetch = 0 : i64, scratch_operands = 0 : i64, tpu.core_type = #tpu.core_type<tc>, window_params = [{transform_indices = @transform_0, window_bounds = array<i64: 1, 1, 256, 1>}, {pipeline_mode = #tpu.pipeline_mode<synchronous>, transform_indices = @transform_1, window_bounds = array<i64: 3, 128>}, {pipeline_mode = #tpu.pipeline_mode<synchronous>, transform_indices = @transform_2, window_bounds = array<i64: 1, 128>}, {pipeline_mode = #tpu.pipeline_mode<synchronous>, transform_indices = @transform_3, window_bounds = array<i64: 128, 128>}, {pipeline_mode = #tpu.pipeline_mode<synchronous>, transform_indices = @transform_4, window_bounds = array<i64: 128, 128>}, {pipeline_mode = #tpu.pipeline_mode<synchronous>, transform_indices = @transform_5, window_bounds = array<i64: 1, 128>}, {pipeline_mode = #tpu.pipeline_mode<synchronous>, transform_indices = @transform_6, window_bounds = array<i64: 128, 128>}, {pipeline_mode = #tpu.pipeline_mode<synchronous>, transform_indices = @transform_7, window_bounds = array<i64: 128, 128>}, {pipeline_mode = #tpu.pipeline_mode<synchronous>, transform_indices = @transform_8, window_bounds = array<i64: 128, 128>}, {pipeline_mode = #tpu.pipeline_mode<synchronous>, transform_indices = @transform_9, window_bounds = array<i64: 1, 128>}, {pipeline_mode = #tpu.pipeline_mode<synchronous>, transform_indices = @transform_10, window_bounds = array<i64: 128, 8>}, {pipeline_mode = #tpu.pipeline_mode<synchronous>, transform_indices = @transform_11, window_bounds = array<i64: 128, 8>}, {pipeline_mode = #tpu.pipeline_mode<synchronous>, transform_indices = @transform_12, window_bounds = array<i64: 1, 8>}, {transform_indices = @transform_13, window_bounds = array<i64: 1, 1, 256, 8>}]} {
    %c248_i32 = arith.constant 248 : i32
    %0 = arith.muli %arg1, %c248_i32 : i32
    %1 = tpu.iota {dimensions = array<i32: 0>} : vector<256x1xi32>
    %2 = vector.broadcast %0 : i32 to vector<256x1xi32>
    %3 = arith.addi %2, %1 : vector<256x1xi32>
    %c4_i32 = arith.constant 4 : i32
    %4 = vector.broadcast %c4_i32 : i32 to vector<256x1xi32>
    %5 = arith.subi %3, %4 : vector<256x1xi32>
    %c0_i32 = arith.constant 0 : i32
    %6 = vector.broadcast %c0_i32 : i32 to vector<256x1xi32>
    %7 = arith.cmpi sge, %5, %6 : vector<256x1xi32>
    %c600_i32 = arith.constant 600 : i32
    %8 = vector.broadcast %c600_i32 : i32 to vector<256x1xi32>
    %9 = arith.cmpi slt, %5, %8 : vector<256x1xi32>
    %10 = arith.andi %7, %9 : vector<256x1xi1>
    %11 = tpu.iota {dimensions = array<i32: 1>} : vector<1x128xi32>
    %c64_i32 = arith.constant 64 : i32
    %12 = vector.broadcast %c64_i32 : i32 to vector<1x128xi32>
    %13 = arith.cmpi slt, %11, %12 : vector<1x128xi32>
    %c0 = arith.constant 0 : index
    %c0_0 = arith.constant 0 : index
    %c0_1 = arith.constant 0 : index
    %c0_2 = arith.constant 0 : index
    %14 = vector.load %arg2[%c0, %c0_0, %c0_1, %c0_2] : memref<1x1x256x1xf32, #tpu.memory_space<vmem>>, vector<1x1x256x1xf32>
    %15 = vector.shape_cast %14 : vector<1x1x256x1xf32> to vector<256x1xf32>
    %c1_i32 = arith.constant 1 : i32
    %16 = tpu.dynamic_rotate %15 by %c1_i32 dim 0 : vector<256x1xf32>, i32 -> vector<256x1xf32>
    %c255_i32 = arith.constant 255 : i32
    %17 = tpu.dynamic_rotate %15 by %c255_i32 dim 0 : vector<256x1xf32>, i32 -> vector<256x1xf32>
    %c0_3 = arith.constant 0 : index
    %c0_4 = arith.constant 0 : index
    %18 = vector.load %arg3[%c0_3, %c0_4] : memref<3x128xf32, #tpu.memory_space<vmem>>, vector<3x128xf32>
    %19 = vector.extract_strided_slice %18 {offsets = [0, 0], sizes = [1, 128], strides = [1, 1]} : vector<3x128xf32> to vector<1x128xf32>
    %20 = vector.broadcast %16 : vector<256x1xf32> to vector<256x128xf32>
    %21 = vector.broadcast %19 : vector<1x128xf32> to vector<256x128xf32>
    %22 = arith.mulf %20, %21 : vector<256x128xf32>
    %23 = vector.extract_strided_slice %18 {offsets = [1, 0], sizes = [1, 128], strides = [1, 1]} : vector<3x128xf32> to vector<1x128xf32>
    %24 = vector.broadcast %15 : vector<256x1xf32> to vector<256x128xf32>
    %25 = vector.broadcast %23 : vector<1x128xf32> to vector<256x128xf32>
    %26 = arith.mulf %24, %25 : vector<256x128xf32>
    %27 = arith.addf %22, %26 : vector<256x128xf32>
    %28 = vector.extract_strided_slice %18 {offsets = [2, 0], sizes = [1, 128], strides = [1, 1]} : vector<3x128xf32> to vector<1x128xf32>
    %29 = vector.broadcast %17 : vector<256x1xf32> to vector<256x128xf32>
    %30 = vector.broadcast %28 : vector<1x128xf32> to vector<256x128xf32>
    %31 = arith.mulf %29, %30 : vector<256x128xf32>
    %32 = arith.addf %27, %31 : vector<256x128xf32>
    %c0_5 = arith.constant 0 : index
    %c0_6 = arith.constant 0 : index
    %33 = vector.load %arg4[%c0_5, %c0_6] : memref<1x128xf32, #tpu.memory_space<vmem>>, vector<1x128xf32>
    %34 = vector.broadcast %33 : vector<1x128xf32> to vector<256x128xf32>
    %35 = arith.addf %32, %34 : vector<256x128xf32>
    %cst = arith.constant 0.000000e+00 : f32
    %36 = vector.broadcast %cst : f32 to vector<256x128xf32>
    %37 = arith.maximumf %35, %36 : vector<256x128xf32>
    %cst_7 = arith.constant 0.000000e+00 : f32
    %38 = vector.shape_cast %10 : vector<256x1xi1> to vector<256x1xi1>
    %39 = vector.broadcast %38 : vector<256x1xi1> to vector<256x128xi1>
    %40 = vector.broadcast %cst_7 : f32 to vector<256x128xf32>
    %41 = arith.select %39, %37, %40 : vector<256x128xi1>, vector<256x128xf32>
    %c1_i32_8 = arith.constant 1 : i32
    %42 = tpu.dynamic_rotate %41 by %c1_i32_8 dim 0 : vector<256x128xf32>, i32 -> vector<256x128xf32>
    %c255_i32_9 = arith.constant 255 : i32
    %43 = tpu.dynamic_rotate %41 by %c255_i32_9 dim 0 : vector<256x128xf32>, i32 -> vector<256x128xf32>
    %44 = vector.shape_cast %13 : vector<1x128xi1> to vector<1x128xi1>
    %45 = vector.broadcast %44 : vector<1x128xi1> to vector<256x128xi1>
    %46 = arith.select %45, %42, %41 : vector<256x128xi1>, vector<256x128xf32>
    %47 = arith.truncf %46 : vector<256x128xf32> to vector<256x128xbf16>
    %48 = arith.truncf %43 : vector<256x128xf32> to vector<256x128xbf16>
    %c0_10 = arith.constant 0 : index
    %c0_11 = arith.constant 0 : index
    %49 = vector.load %arg5[%c0_10, %c0_11] : memref<128x128xbf16, #tpu.memory_space<vmem>>, vector<128x128xbf16>
    %cst_12 = arith.constant dense<0.000000e+00> : vector<256x128xf32>
    %50 = tpu.matmul %47, %49, %cst_12 {dimension_numbers = #tpu.dot_dimension_numbers<[1], [0], [0], [1], [0, 0, 1, 1], [], []>} : vector<256x128xbf16>, vector<128x128xbf16>, vector<256x128xf32> -> vector<256x128xf32>
    %c0_13 = arith.constant 0 : index
    %c0_14 = arith.constant 0 : index
    %51 = vector.load %arg6[%c0_13, %c0_14] : memref<128x128xbf16, #tpu.memory_space<vmem>>, vector<128x128xbf16>
    %cst_15 = arith.constant dense<0.000000e+00> : vector<256x128xf32>
    %52 = tpu.matmul %48, %51, %cst_15 {dimension_numbers = #tpu.dot_dimension_numbers<[1], [0], [0], [1], [0, 0, 1, 1], [], []>} : vector<256x128xbf16>, vector<128x128xbf16>, vector<256x128xf32> -> vector<256x128xf32>
    %53 = arith.addf %50, %52 : vector<256x128xf32>
    %c0_16 = arith.constant 0 : index
    %c0_17 = arith.constant 0 : index
    %54 = vector.load %arg7[%c0_16, %c0_17] : memref<1x128xf32, #tpu.memory_space<vmem>>, vector<1x128xf32>
    %55 = vector.broadcast %54 : vector<1x128xf32> to vector<256x128xf32>
    %56 = arith.addf %53, %55 : vector<256x128xf32>
    %cst_18 = arith.constant 0.000000e+00 : f32
    %57 = vector.broadcast %cst_18 : f32 to vector<256x128xf32>
    %58 = arith.maximumf %56, %57 : vector<256x128xf32>
    %cst_19 = arith.constant 0.000000e+00 : f32
    %59 = vector.shape_cast %10 : vector<256x1xi1> to vector<256x1xi1>
    %60 = vector.broadcast %59 : vector<256x1xi1> to vector<256x128xi1>
    %61 = vector.broadcast %cst_19 : f32 to vector<256x128xf32>
    %62 = arith.select %60, %58, %61 : vector<256x128xi1>, vector<256x128xf32>
    %c1_i32_20 = arith.constant 1 : i32
    %63 = tpu.dynamic_rotate %62 by %c1_i32_20 dim 0 : vector<256x128xf32>, i32 -> vector<256x128xf32>
    %c255_i32_21 = arith.constant 255 : i32
    %64 = tpu.dynamic_rotate %62 by %c255_i32_21 dim 0 : vector<256x128xf32>, i32 -> vector<256x128xf32>
    %65 = arith.truncf %63 : vector<256x128xf32> to vector<256x128xbf16>
    %c0_22 = arith.constant 0 : index
    %c0_23 = arith.constant 0 : index
    %66 = vector.load %arg8[%c0_22, %c0_23] : memref<128x128xbf16, #tpu.memory_space<vmem>>, vector<128x128xbf16>
    %cst_24 = arith.constant dense<0.000000e+00> : vector<256x128xf32>
    %67 = tpu.matmul %65, %66, %cst_24 {dimension_numbers = #tpu.dot_dimension_numbers<[1], [0], [0], [1], [0, 0, 1, 1], [], []>} : vector<256x128xbf16>, vector<128x128xbf16>, vector<256x128xf32> -> vector<256x128xf32>
    %68 = arith.truncf %62 : vector<256x128xf32> to vector<256x128xbf16>
    %c0_25 = arith.constant 0 : index
    %c0_26 = arith.constant 0 : index
    %69 = vector.load %arg9[%c0_25, %c0_26] : memref<128x128xbf16, #tpu.memory_space<vmem>>, vector<128x128xbf16>
    %cst_27 = arith.constant dense<0.000000e+00> : vector<256x128xf32>
    %70 = tpu.matmul %68, %69, %cst_27 {dimension_numbers = #tpu.dot_dimension_numbers<[1], [0], [0], [1], [0, 0, 1, 1], [], []>} : vector<256x128xbf16>, vector<128x128xbf16>, vector<256x128xf32> -> vector<256x128xf32>
    %71 = arith.addf %67, %70 : vector<256x128xf32>
    %72 = arith.truncf %64 : vector<256x128xf32> to vector<256x128xbf16>
    %c0_28 = arith.constant 0 : index
    %c0_29 = arith.constant 0 : index
    %73 = vector.load %arg10[%c0_28, %c0_29] : memref<128x128xbf16, #tpu.memory_space<vmem>>, vector<128x128xbf16>
    %cst_30 = arith.constant dense<0.000000e+00> : vector<256x128xf32>
    %74 = tpu.matmul %72, %73, %cst_30 {dimension_numbers = #tpu.dot_dimension_numbers<[1], [0], [0], [1], [0, 0, 1, 1], [], []>} : vector<256x128xbf16>, vector<128x128xbf16>, vector<256x128xf32> -> vector<256x128xf32>
    %75 = arith.addf %71, %74 : vector<256x128xf32>
    %c0_31 = arith.constant 0 : index
    %c0_32 = arith.constant 0 : index
    %76 = vector.load %arg11[%c0_31, %c0_32] : memref<1x128xf32, #tpu.memory_space<vmem>>, vector<1x128xf32>
    %77 = vector.broadcast %76 : vector<1x128xf32> to vector<256x128xf32>
    %78 = arith.addf %75, %77 : vector<256x128xf32>
    %cst_33 = arith.constant 0.000000e+00 : f32
    %79 = vector.broadcast %cst_33 : f32 to vector<256x128xf32>
    %80 = arith.maximumf %78, %79 : vector<256x128xf32>
    %cst_34 = arith.constant 0.000000e+00 : f32
    %81 = vector.shape_cast %10 : vector<256x1xi1> to vector<256x1xi1>
    %82 = vector.broadcast %81 : vector<256x1xi1> to vector<256x128xi1>
    %83 = vector.broadcast %cst_34 : f32 to vector<256x128xf32>
    %84 = arith.select %82, %80, %83 : vector<256x128xi1>, vector<256x128xf32>
    %c1_i32_35 = arith.constant 1 : i32
    %85 = tpu.dynamic_rotate %84 by %c1_i32_35 dim 0 : vector<256x128xf32>, i32 -> vector<256x128xf32>
    %c255_i32_36 = arith.constant 255 : i32
    %86 = tpu.dynamic_rotate %84 by %c255_i32_36 dim 0 : vector<256x128xf32>, i32 -> vector<256x128xf32>
    %87 = vector.shape_cast %13 : vector<1x128xi1> to vector<1x128xi1>
    %88 = vector.broadcast %87 : vector<1x128xi1> to vector<256x128xi1>
    %89 = arith.select %88, %85, %84 : vector<256x128xi1>, vector<256x128xf32>
    %90 = arith.truncf %89 : vector<256x128xf32> to vector<256x128xbf16>
    %91 = arith.truncf %86 : vector<256x128xf32> to vector<256x128xbf16>
    %c0_37 = arith.constant 0 : index
    %c0_38 = arith.constant 0 : index
    %92 = vector.load %arg12[%c0_37, %c0_38] : memref<128x8xbf16, #tpu.memory_space<vmem>>, vector<128x8xbf16>
    %cst_39 = arith.constant dense<0.000000e+00> : vector<256x8xf32>
    %93 = tpu.matmul %90, %92, %cst_39 {dimension_numbers = #tpu.dot_dimension_numbers<[1], [0], [0], [1], [0, 0, 1, 1], [], []>} : vector<256x128xbf16>, vector<128x8xbf16>, vector<256x8xf32> -> vector<256x8xf32>
    %c0_40 = arith.constant 0 : index
    %c0_41 = arith.constant 0 : index
    %94 = vector.load %arg13[%c0_40, %c0_41] : memref<128x8xbf16, #tpu.memory_space<vmem>>, vector<128x8xbf16>
    %cst_42 = arith.constant dense<0.000000e+00> : vector<256x8xf32>
    %95 = tpu.matmul %91, %94, %cst_42 {dimension_numbers = #tpu.dot_dimension_numbers<[1], [0], [0], [1], [0, 0, 1, 1], [], []>} : vector<256x128xbf16>, vector<128x8xbf16>, vector<256x8xf32> -> vector<256x8xf32>
    %96 = arith.addf %93, %95 : vector<256x8xf32>
    %c0_43 = arith.constant 0 : index
    %c0_44 = arith.constant 0 : index
    %97 = vector.load %arg14[%c0_43, %c0_44] : memref<1x8xf32, #tpu.memory_space<vmem>>, vector<1x8xf32>
    %98 = vector.broadcast %97 : vector<1x8xf32> to vector<256x8xf32>
    %99 = arith.addf %96, %98 : vector<256x8xf32>
    %c0_45 = arith.constant 0 : index
    %c0_46 = arith.constant 0 : index
    %c0_47 = arith.constant 0 : index
    %c0_48 = arith.constant 0 : index
    %100 = vector.load %arg15[%c0_45, %c0_46, %c0_47, %c0_48] : memref<1x1x256x8xf32, #tpu.memory_space<vmem>>, vector<1x1x256x8xf32>
    %101 = vector.shape_cast %100 : vector<1x1x256x8xf32> to vector<256x8xf32>
    %102 = vector.shape_cast %99 : vector<256x8xf32> to vector<1x1x256x8xf32>
    tpu.vector_store %arg15[%c0_45, %c0_46, %c0_47, %c0_48], %102 {strides = array<i32>} : memref<1x1x256x8xf32, #tpu.memory_space<vmem>>, vector<1x1x256x8xf32>,
    return
  }
  func.func @transform_0(%arg0: i32, %arg1: i32) -> (i32, i32, i32, i32) {
    %c0_i32 = arith.constant 0 : i32
    %c0_i32_0 = arith.constant 0 : i32
    %c0_i32_1 = arith.constant 0 : i32
    return %arg0, %arg1, %c0_i32, %c0_i32_0 : i32, i32, i32, i32
  }
  func.func @transform_1(%arg0: i32, %arg1: i32) -> (i32, i32) {
    %c0_i32 = arith.constant 0 : i32
    %c0_i32_0 = arith.constant 0 : i32
    %c0_i32_1 = arith.constant 0 : i32
    return %c0_i32, %c0_i32_0 : i32, i32
  }
  func.func @transform_2(%arg0: i32, %arg1: i32) -> (i32, i32) {
    %c0_i32 = arith.constant 0 : i32
    %c0_i32_0 = arith.constant 0 : i32
    %c0_i32_1 = arith.constant 0 : i32
    return %c0_i32, %c0_i32_0 : i32, i32
  }
  func.func @transform_3(%arg0: i32, %arg1: i32) -> (i32, i32) {
    %c0_i32 = arith.constant 0 : i32
    %c0_i32_0 = arith.constant 0 : i32
    %c0_i32_1 = arith.constant 0 : i32
    return %c0_i32, %c0_i32_0 : i32, i32
  }
  func.func @transform_4(%arg0: i32, %arg1: i32) -> (i32, i32) {
    %c0_i32 = arith.constant 0 : i32
    %c0_i32_0 = arith.constant 0 : i32
    %c0_i32_1 = arith.constant 0 : i32
    return %c0_i32, %c0_i32_0 : i32, i32
  }
  func.func @transform_5(%arg0: i32, %arg1: i32) -> (i32, i32) {
    %c0_i32 = arith.constant 0 : i32
    %c0_i32_0 = arith.constant 0 : i32
    %c0_i32_1 = arith.constant 0 : i32
    return %c0_i32, %c0_i32_0 : i32, i32
  }
  func.func @transform_6(%arg0: i32, %arg1: i32) -> (i32, i32) {
    %c0_i32 = arith.constant 0 : i32
    %c0_i32_0 = arith.constant 0 : i32
    %c0_i32_1 = arith.constant 0 : i32
    return %c0_i32, %c0_i32_0 : i32, i32
  }
  func.func @transform_7(%arg0: i32, %arg1: i32) -> (i32, i32) {
    %c0_i32 = arith.constant 0 : i32
    %c0_i32_0 = arith.constant 0 : i32
    %c0_i32_1 = arith.constant 0 : i32
    return %c0_i32, %c0_i32_0 : i32, i32
  }
  func.func @transform_8(%arg0: i32, %arg1: i32) -> (i32, i32) {
    %c0_i32 = arith.constant 0 : i32
    %c0_i32_0 = arith.constant 0 : i32
    %c0_i32_1 = arith.constant 0 : i32
    return %c0_i32, %c0_i32_0 : i32, i32
  }
  func.func @transform_9(%arg0: i32, %arg1: i32) -> (i32, i32) {
    %c0_i32 = arith.constant 0 : i32
    %c0_i32_0 = arith.constant 0 : i32
    %c0_i32_1 = arith.constant 0 : i32
    return %c0_i32, %c0_i32_0 : i32, i32
  }
  func.func @transform_10(%arg0: i32, %arg1: i32) -> (i32, i32) {
    %c0_i32 = arith.constant 0 : i32
    %c0_i32_0 = arith.constant 0 : i32
    %c0_i32_1 = arith.constant 0 : i32
    return %c0_i32, %c0_i32_0 : i32, i32
  }
  func.func @transform_11(%arg0: i32, %arg1: i32) -> (i32, i32) {
    %c0_i32 = arith.constant 0 : i32
    %c0_i32_0 = arith.constant 0 : i32
    %c0_i32_1 = arith.constant 0 : i32
    return %c0_i32, %c0_i32_0 : i32, i32
  }
  func.func @transform_12(%arg0: i32, %arg1: i32) -> (i32, i32) {
    %c0_i32 = arith.constant 0 : i32
    %c0_i32_0 = arith.constant 0 : i32
    %c0_i32_1 = arith.constant 0 : i32
    return %c0_i32, %c0_i32_0 : i32, i32
  }
  func.func @transform_13(%arg0: i32, %arg1: i32) -> (i32, i32, i32, i32) {
    %c0_i32 = arith.constant 0 : i32
    %c0_i32_0 = arith.constant 0 : i32
    %c0_i32_1 = arith.constant 0 : i32
    return %arg0, %arg1, %c0_i32, %c0_i32_0 : i32, i32, i32, i32
  }
}

</mosaic_0001>

<bundles_post_ra>
// kernel: tpu_custom_call.1
= control target key start
LH: loop header
LB: loop body
LE: loop exit
PB: predicated region body
PF: predicated region fallthrough
CT: control target
= control target key end

     0   :  { %s5211_s25 = smov 0   ;;  %s5213_s26 = smov 0   ;;  %s8054_s0 = inlined_call_operand.vmem [shape: f32[2,3,256,1], index: 0, kind: input, shape index: {}]   ;;  %s8055_s1 = inlined_call_operand.vmem [shape: f32[3,128], index: 1, kind: input, shape index: {}]   ;;  %s8056_s2 = inlined_call_operand.vmem [shape: f32[1,128], index: 2, kind: input, shape index: {}]   ;;  %s8057_s3 = inlined_call_operand.vmem [shape: bf16[128,128], index: 3, kind: input, shape index: {}]   ;;  %s8058_s4 = inlined_call_operand.vmem [shape: bf16[128,128], index: 4, kind: input, shape index: {}]   ;;  %s8059_s5 = inlined_call_operand.vmem [shape: f32[1,128], index: 5, kind: input, shape index: {}]   ;;  %s8060_s6 = inlined_call_operand.vmem [shape: bf16[128,128], index: 6, kind: input, shape index: {}]   ;;  %s8061_s7 = inlined_call_operand.vmem [shape: bf16[128,128], index: 7, kind: input, shape index: {}]   ;;  %s8062_s8 = inlined_call_operand.vmem [shape: bf16[128,128], index: 8, kind: input, shape index: {}]   ;;  %s8063_s9 = inlined_call_operand.vmem [shape: f32[1,128], index: 9, kind: input, shape index: {}]   ;;  %s8064_s10 = inlined_call_operand.vmem [shape: bf16[128,8], index: 10, kind: input, shape index: {}]   ;;  %s8065_s11 = inlined_call_operand.vmem [shape: bf16[128,8], index: 11, kind: input, shape index: {}]   ;;  %s8066_s12 = inlined_call_operand.vmem [shape: f32[1,8], index: 12, kind: input, shape index: {}]   ;;  %s8067_s13 = inlined_call_operand.vmem [shape: f32[2,3,256,8], index: 13, kind: output, shape index: {}]  }
   0x1   :  { %s5215_s27 = smov 0   ;;  %s5217_s28 = smov 0  }
   0x2   :  { %s5219_s29 = smov 0  }
   0x3 LB: > { %s32_s30 = sadd.s32 1, %s5130_s27  ;;  %s35_s14 = sadd.s32 1, %s5134_s28  ;;  %s5138_s29 = sphi %s5219_s29, %s23_s29   ;;  %s5134_s28 = sphi %s5217_s28, %s8738_s28   ;;  %s5130_s27 = sphi %s5215_s27, %s8737_s27   ;;  %s5126_s26 = sphi %s5213_s26, %s8736_s26   ;;  %s5122_s25 = sphi %s5211_s25, %s8735_s25  }
   0x4   : > { %p33_p0 = scmp.ge.s32.totalorder %s32_s30, 3  ;;  %p4204_p1 = scmp.ge.s32.totalorder %s5138_s29, 1 }
   0x5   : > { %p407_p2 = scmp.lt.s32.totalorder %s5138_s29, 7 }
   0x6   : > { %s8740_s30 = smov (%p33_p0, %s32_s30), 0  ;;  %s8742_s14 = smov (!%p33_p0, %s35_s14), %s5134_s28 }
   0x7   : > { %p408_p3 = pnand %p4204_p1, %p407_p2  ;;  %p37_p4 = scmp.ge.s32.totalorder %s8742_s14, 2 }
   0x9   : > { %s8744_s14 = smov (%p37_p4, %s8742_s14), 0  ;;  %411 = sbr.rel (%p408_p3) target bundleno = 1234 (0x4d2), region = 72 }
  0x10   : > { %p459_p5 = scmp.lt.s32.totalorder %s5126_s26, 1  ;;  %p461_p6 = scmp.lt.s32.totalorder %s5122_s25, 2  ;;  %v5140_v0 = vmov 0   ;;  %v479_v1 = vlaneseq  ;;  %v5043_v18 = vld [vmem:[%s8058_s4] sm:$0xff]   ;;  %v5044_v21 = vld [vmem:[%s8058_s4 + $0x8] sm:$0xff]   ;;  %v5045_v25 = vld [vmem:[%s8058_s4 + $0x10] sm:$0xff]  }
  0x11   : > { %5042 = vset.pattern.permute.xlu0 %v5140_v0  ;;  %5041 = vset.pattern.permute.xlu1 %v5140_v0  ;;  %v5046_v31 = vld [vmem:[%s8058_s4 + $0x18] sm:$0xff]   ;;  %v5047_v40 = vld [vmem:[%s8058_s4 + $0x20] sm:$0xff]   ;;  %v5048_v44 = vld [vmem:[%s8058_s4 + $0x28] sm:$0xff]  }
  0x12   : > { %s8746_s26 = smov (!%p459_p5, %s5126_s26), 1  ;;  %v5248_v2 = vshrl.u32 %v479_v1, 7  ;;  %4519 = vmatprep.subr.bf16.mxu0 %v5043_v18  ;;  %4855 = vmatprep.subr.bf16.mxu1 %v5043_v18  ;;  %v5049_v48 = vld [vmem:[%s8058_s4 + $0x30] sm:$0xff]   ;;  %v5050_v51 = vld [vmem:[%s8058_s4 + $0x38] sm:$0xff]  }
  0x13   : > { %s462_s15 = scalar_select %p461_p6, %s5122_s25, 2  ;;  %4520 = vmatpush3.bf16.msra.mxu0 %v5043_v18  ;;  %4863 = vmatpush3.bf16.msra.mxu1 %v5043_v18 }
  0x14   : > { %s4999_s16 = smul.u32 96, %s8746_s26  ;;  %vm8069_vm0 = vcmp.lt.s32.totalorder %v5248_v2, 1  ;;  %vm8070_vm1 = vcmp.lt.s32.totalorder %v5248_v2, 7  ;;  %4521 = vmatprep.subr.bf16.mxu0 %v5044_v21  ;;  %4856 = vmatprep.subr.bf16.mxu1 %v5044_v21 }
  0x15   : > { %s4205_s17 = sshll.u32 %s462_s15, 5  ;;  %s478_s26 = smul.u32 248, %s5122_s25 }
  0x16   : > { %s5245_s18 = sadd.s32 %s4999_s16, %s4205_s17 }
  0x17   : > { %s4206_s19 = sshll.u32 %s5245_s18, 3  ;;  %4522 = vmatpush3.bf16.msra.mxu0 %v5044_v21  ;;  %4864 = vmatpush3.bf16.msra.mxu1 %v5044_v21 }
  0x18   : > { %s5256_s22 = scalar_lea.vmem %s8054_s0, %s4206_s19  ;;  %4523 = vmatprep.subr.bf16.mxu0 %v5045_v25  ;;  %4857 = vmatprep.subr.bf16.mxu1 %v5045_v25  ;;  %s7941_s24 = scalar_lea.vmem %s8067_s13, %s4206_s19 }
  0x19   : > { %v677_v3 = vld [vmem:[%s5256_s22 + $0x8] sm:$0xff]  ;;  %v5260_v4 = vld [vmem:[%s5256_s22] sm:$0xff]  ;;  %v678_v5 = vld [vmem:[%s5256_s22 + $0x10] sm:$0xff] }
  0x1a   : > { %1042 = vperm.xlu0 %5042, %v677_v3   ;;  %1037 = vperm.xlu1 %5041, %v5260_v4   ;;  %v708_v6 = vrot.slane %v5260_v4, 7  ;;  %v5266_v7 = vld [vmem:[%s5256_s22 + $0xf8] sm:$0xff]  ;;  %v709_v8 = vrot.slane %v677_v3, 7  ;;  %v710_v9 = vrot.slane %v678_v5, 7  ;;  %v680_v12 = vld [vmem:[%s5256_s22 + $0x20] sm:$0xff]  ;;  %v774_v22 = vrot.slane %v677_v3, 1 }
  0x1b   : > { %v739_v10 = vrot.slane %v5266_v7, 7  ;;  %v679_v11 = vld [vmem:[%s5256_s22 + $0x18] sm:$0xff]  ;;  %v712_v17 = vrot.slane %v680_v12, 7  ;;  %v773_v23 = vrot.slane %v5260_v4, 1  ;;  %v775_v24 = vrot.slane %v678_v5, 1  ;;  %v681_v30 = vld [vmem:[%s5256_s22 + $0x28] sm:$0xff]  ;;  %4524 = vmatpush3.bf16.msra.mxu0 %v5045_v25  ;;  %4865 = vmatpush3.bf16.msra.mxu1 %v5045_v25 }
  0x1c   : > { %v770_v14 = vsel %vm8069_vm0, %v709_v8, %v710_v9  ;;  %v771_v15 = vsel %vm8069_vm0, %v708_v6, %v709_v8  ;;  %v711_v16 = vrot.slane %v679_v11, 7  ;;  %v776_v28 = vrot.slane %v679_v11, 1  ;;  %v682_v36 = vld [vmem:[%s5256_s22 + $0x30] sm:$0xff]  ;;  %4525 = vmatprep.subr.bf16.mxu0 %v5046_v31  ;;  %4858 = vmatprep.subr.bf16.mxu1 %v5046_v31  ;;  %v683_v41 = vld [vmem:[%s5256_s22 + $0x38] sm:$0xff]  ;;  %v684_v45 = vld [vmem:[%s5256_s22 + $0x40] sm:$0xff] }
  0x1d   : > { %v772_v13 = vsel %vm8069_vm0, %v739_v10, %v708_v6  ;;  %v835_v26 = vsel %vm8070_vm1, %v774_v22, %v775_v24  ;;  %v836_v27 = vsel %vm8070_vm1, %v773_v23, %v774_v22  ;;  %v777_v29 = vrot.slane %v680_v12, 1  ;;  %v685_v52 = vld [vmem:[%s5256_s22 + $0x48] sm:$0xff]  ;;  %v686_v58 = vld [vmem:[%s5256_s22 + $0x50] sm:$0xff]  ;;  %v687_v0 = vld [vmem:[%s5256_s22 + $0x58] sm:$0xff] }
  0x1e   : > { %1047 = vperm.xlu1 %5041, %v678_v5   ;;  %841 = vperm.xlu0 %5042, %v772_v13   ;;  %v768_v19 = vsel %vm8069_vm0, %v711_v16, %v712_v17  ;;  %v769_v20 = vsel %vm8069_vm0, %v710_v9, %v711_v16  ;;  %v834_v33 = vsel %vm8070_vm1, %v775_v24, %v776_v28  ;;  %v713_v34 = vrot.slane %v681_v30, 7  ;;  %v5348_v3 = vld [vmem:[%s5256_s22 + $0xf0] sm:$0xff]  ;;  %v688_v6 = vld [vmem:[%s5256_s22 + $0x60] sm:$0xff]  ;;  %v5352_v8 = vld [vmem:[%s5256_s22 + $0xe8] sm:$0xff] }
  0x1f   : > { %v833_v32 = vsel %vm8070_vm1, %v776_v28, %v777_v29  ;;  %v778_v35 = vrot.slane %v681_v30, 1  ;;  %4526 = vmatpush3.bf16.msra.mxu0 %v5046_v31  ;;  %v714_v39 = vrot.slane %v682_v36, 7  ;;  %4866 = vmatpush3.bf16.msra.mxu1 %v5046_v31  ;;  %v715_v43 = vrot.slane %v683_v41, 7  ;;  %v689_v21 = vld [vmem:[%s5256_s22 + $0x68] sm:$0xff]  ;;  %v691_v31 = vld [vmem:[%s5256_s22 + $0x78] sm:$0xff] }
  0x20   : > { %v767_v37 = vsel %vm8069_vm0, %v712_v17, %v713_v34  ;;  %4527 = vmatprep.subr.bf16.mxu0 %v5047_v40  ;;  %4859 = vmatprep.subr.bf16.mxu1 %v5047_v40  ;;  %v716_v47 = vrot.slane %v684_v45, 7  ;;  %v779_v50 = vrot.slane %v682_v36, 1  ;;  %v780_v53 = vrot.slane %v683_v41, 1 }
  0x21   : > { %v832_v38 = vsel %vm8070_vm1, %v777_v29, %v778_v35  ;;  %v766_v42 = vsel %vm8069_vm0, %v713_v34, %v714_v39  ;;  %v765_v46 = vsel %vm8069_vm0, %v714_v39, %v715_v43  ;;  %v781_v54 = vrot.slane %v684_v45, 1  ;;  %v692_v34 = vld [vmem:[%s5256_s22 + $0x80] sm:$0xff] }
  0x22   : > { %851 = vperm.xlu1 %5041, %v770_v14   ;;  %846 = vperm.xlu0 %5042, %v771_v15   ;;  %v764_v49 = vsel %vm8069_vm0, %v715_v43, %v716_v47  ;;  %v831_v55 = vsel %vm8070_vm1, %v778_v35, %v779_v50  ;;  %v717_v56 = vrot.slane %v685_v52, 7  ;;  %v782_v57 = vrot.slane %v685_v52, 1  ;;  %v5394_v43 = vld [vmem:[%s8057_s3] sm:$0xff]  }
  0x23   : > { %4528 = vmatpush3.bf16.msra.mxu0 %v5047_v40  ;;  %4867 = vmatpush3.bf16.msra.mxu1 %v5047_v40  ;;  %v829_v59 = vsel %vm8070_vm1, %v780_v53, %v781_v54  ;;  %v830_v60 = vsel %vm8070_vm1, %v779_v50, %v780_v53  ;;  %v718_v63 = vrot.slane %v686_v58, 7  ;;  %v719_v5 = vrot.slane %v687_v0, 7  ;;  %v695_v53 = vld [vmem:[%s5256_s22 + $0x98] sm:$0xff] }
  0x24   : > { %4529 = vmatprep.subr.bf16.mxu0 %v5048_v44  ;;  %4860 = vmatprep.subr.bf16.mxu1 %v5048_v44  ;;  %v763_v61 = vsel %vm8069_vm0, %v716_v47, %v717_v56  ;;  %v828_v62 = vsel %vm8070_vm1, %v781_v54, %v782_v57  ;;  %v720_v14 = vrot.slane %v688_v6, 7  ;;  %v783_v17 = vrot.slane %v686_v58, 1 }
  0x25   : > { %v762_v9 = vsel %vm8069_vm0, %v717_v56, %v718_v63  ;;  %v761_v13 = vsel %vm8069_vm0, %v718_v63, %v719_v5  ;;  %v721_v25 = vrot.slane %v689_v21, 7  ;;  %v788_v40 = vrot.slane %v691_v31, 1  ;;  %v696_v56 = vld [vmem:[%s5256_s22 + $0xa0] sm:$0xff] }
  0x26   : > { %861 = vperm.xlu1 %5041, %v768_v19   ;;  %856 = vperm.xlu0 %5042, %v769_v20   ;;  %v760_v16 = vsel %vm8069_vm0, %v719_v5, %v720_v14  ;;  %v827_v18 = vsel %vm8070_vm1, %v782_v57, %v783_v17  ;;  %v784_v19 = vrot.slane %v687_v0, 1  ;;  %v785_v20 = vrot.slane %v688_v6, 1 }
  0x27   : > { %4530 = vmatpush3.bf16.msra.mxu0 %v5048_v44  ;;  %4868 = vmatpush3.bf16.msra.mxu1 %v5048_v44  ;;  %v759_v28 = vsel %vm8069_vm0, %v720_v14, %v721_v25  ;;  %v728_v57 = vrot.slane %v696_v56, 7  ;;  %v5441_v14 = vld [vmem:[%s5256_s22 + $0xb8] sm:$0xff] }
  0x28   : > { %4531 = vmatprep.subr.bf16.mxu0 %v5049_v48  ;;  %4861 = vmatprep.subr.bf16.mxu1 %v5049_v48  ;;  %v825_v22 = vsel %vm8070_vm1, %v784_v19, %v785_v20  ;;  %v826_v24 = vsel %vm8070_vm1, %v783_v17, %v784_v19 }
  0x2a   : > { %1057 = vperm.xlu1 %5041, %v680_v12   ;;  %1052 = vperm.xlu0 %5042, %v679_v11   ;;  %v738_v11 = vrot.slane %v5348_v3, 7  ;;  %v737_v12 = vrot.slane %v5352_v8, 7 }
  0x2b   : > { %4532 = vmatpush3.bf16.msra.mxu0 %v5049_v48  ;;  %4869 = vmatpush3.bf16.msra.mxu1 %v5049_v48 }
  0x2c   : > { %4533 = vmatprep.subr.bf16.mxu0 %v5050_v51  ;;  %4862 = vmatprep.subr.bf16.mxu1 %v5050_v51  ;;  %v5364_v15 = vsel %vm8069_vm0, %v737_v12, %v738_v11  ;;  %v741_v47 = vsel %vm8069_vm0, %v738_v11, %v739_v10 }
  0x2e   : > { %1270 = vperm.xlu1 %5041, %v835_v26   ;;  %1265 = vperm.xlu0 %5042, %v836_v27   ;;  %v786_v26 = vrot.slane %v689_v21, 1  ;;  %v690_v27 = vld [vmem:[%s5256_s22 + $0x70] sm:$0xff] }
  0x2f   : > { %4534 = vmatpush3.bf16.msra.mxu0 %v5050_v51  ;;  %4870 = vmatpush3.bf16.msra.mxu1 %v5050_v51 }
  0x30   : > { %v824_v29 = vsel %vm8070_vm1, %v785_v20, %v786_v26  ;;  %4567 = vmatprep.subr.bf16.mxu0 %v5394_v43  ;;  %v731_v20 = vrot.slane %v5441_v14, 7 }
  0x32   : > { %1280 = vperm.xlu1 %5041, %v833_v32   ;;  %1275 = vperm.xlu0 %5042, %v834_v33   ;;  %v723_v33 = vrot.slane %v691_v31, 7 }
  0x36   : > { %866 = vperm.xlu1 %5041, %v767_v37   ;;  %1285 = vperm.xlu0 %5042, %v832_v38   ;;  %v787_v38 = vrot.slane %v690_v27, 1 }
  0x38   : > { %v823_v39 = vsel %vm8070_vm1, %v786_v26, %v787_v38  ;;  %v5455_v26 = vld [vmem:[%s5256_s22 + $0xc0] sm:$0xff] }
  0x3a   : > { %1062 = vperm.xlu1 %5041, %v681_v30   ;;  %871 = vperm.xlu0 %5042, %v766_v42   ;;  %v722_v30 = vrot.slane %v690_v27, 7  ;;  %v693_v42 = vld [vmem:[%s5256_s22 + $0x88] sm:$0xff] }
  0x3b   : > { %v725_v51 = vrot.slane %v693_v42, 7 }
  0x3c   : > { %v758_v32 = vsel %vm8069_vm0, %v721_v25, %v722_v30  ;;  %v757_v35 = vsel %vm8069_vm0, %v722_v30, %v723_v33 }
  0x3e   : > { %876 = vperm.xlu1 %5041, %v765_v46   ;;  %1067 = vperm.xlu0 %5042, %v682_v36   ;;  %v724_v36 = vrot.slane %v692_v34, 7  ;;  %v790_v46 = vrot.slane %v693_v42, 1 }
  0x40   : > { %v756_v37 = vsel %vm8069_vm0, %v723_v33, %v724_v36  ;;  %v755_v10 = vsel %vm8069_vm0, %v724_v36, %v725_v51  ;;  %v732_v33 = vrot.slane %v5455_v26, 7  ;;  %v5467_v36 = vld [vmem:[%s5256_s22 + $0xc8] sm:$0xff] }
  0x42   : > { %1072 = vperm.xlu1 %5041, %v683_v41   ;;  %881 = vperm.xlu0 %5042, %v764_v49   ;;  %v789_v41 = vrot.slane %v692_v34, 1  ;;  %v804_v49 = vrot.slane %v5266_v7, 1 }
  0x44   : > { %v821_v44 = vsel %vm8070_vm1, %v788_v40, %v789_v41  ;;  %v820_v48 = vsel %vm8070_vm1, %v789_v41, %v790_v46  ;;  %v837_v50 = vsel %vm8070_vm1, %v804_v49, %v773_v23 }
  0x46   : > { %1290 = vperm.xlu1 %5041, %v831_v55   ;;  %1077 = vperm.xlu0 %5042, %v684_v45   ;;  %v822_v45 = vsel %vm8070_vm1, %v787_v38, %v788_v40  ;;  %v727_v55 = vrot.slane %v695_v53, 7 }
  0x4a   : > { %1300 = vperm.xlu1 %5041, %v829_v59   ;;  %1295 = vperm.xlu0 %5042, %v830_v60   ;;  %v792_v60 = vrot.slane %v695_v53, 1 }
  0x4e   : > { %886 = vperm.xlu1 %5041, %v763_v61   ;;  %1305 = vperm.xlu0 %5042, %v828_v62   ;;  %v5427_v61 = vld [vmem:[%s5256_s22 + $0xa8] sm:$0xff]  ;;  %v793_v62 = vrot.slane %v696_v56, 1 }
  0x4f   : > { %v794_v5 = vrot.slane %v5427_v61, 1  ;;  %v729_v11 = vrot.slane %v5427_v61, 7 }
  0x52   : > { %1082 = vperm.xlu1 %5041, %v685_v52   ;;  %891 = vperm.xlu0 %5042, %v762_v9   ;;  %v694_v52 = vld [vmem:[%s5256_s22 + $0x90] sm:$0xff]  ;;  %v817_v9 = vsel %vm8070_vm1, %v792_v60, %v793_v62 }
  0x53   : > { %v726_v54 = vrot.slane %v694_v52, 7  ;;  %v791_v59 = vrot.slane %v694_v52, 1 }
  0x55   : > { %v753_v4 = vsel %vm8069_vm0, %v726_v54, %v727_v55  ;;  %v754_v23 = vsel %vm8069_vm0, %v725_v51, %v726_v54  ;;  %v818_v63 = vsel %vm8070_vm1, %v791_v59, %v792_v60  ;;  %v748_v51 = vsel %vm8069_vm0, %v731_v20, %v732_v33 }
  0x56   : > { %896 = vperm.xlu1 %5041, %v761_v13   ;;  %1087 = vperm.xlu0 %5042, %v686_v58   ;;  %v752_v58 = vsel %vm8069_vm0, %v727_v55, %v728_v57  ;;  %v698_v13 = vld [vmem:[%s5256_s22 + $0xb0] sm:$0xff]  ;;  %v5503_v60 = vand.u32 127, %v479_v1 }
  0x57   : > { %v730_v19 = vrot.slane %v698_v13, 7 }
  0x58   : > { %8211 = vst [vmem:[#allocation2_spill] sm:$0xff] %v5503_v60  ;;  %vm8068_vm14 = vcmp.lt.s32.totalorder %v5503_v60, 64 }
  0x59   : > { %v750_v25 = vsel %vm8069_vm0, %v729_v11, %v730_v19 }
  0x5a   : > { %1092 = vperm.xlu1 %5041, %v687_v0   ;;  %901 = vperm.xlu0 %5042, %v760_v16   ;;  %v819_v0 = vsel %vm8070_vm1, %v790_v46, %v791_v59  ;;  %v797_v46 = vrot.slane %v5455_v26, 1 }
  0x5e   : > { %1310 = vperm.xlu1 %5041, %v827_v18   ;;  %1097 = vperm.xlu0 %5042, %v688_v6   ;;  %v816_v6 = vsel %vm8070_vm1, %v793_v62, %v794_v5  ;;  %v751_v18 = vsel %vm8069_vm0, %v728_v57, %v729_v11 }
  0x62   : > { %1320 = vperm.xlu1 %5041, %v825_v22   ;;  %1315 = vperm.xlu0 %5042, %v826_v24   ;;  %v749_v24 = vsel %vm8069_vm0, %v730_v19, %v731_v20 }
  0x66   : > { %906 = vperm.xlu1 %5041, %v759_v28   ;;  %1325 = vperm.xlu0 %5042, %v824_v29   ;;  %v5458_v28 = vstv %s478_s26  ;;  %v1001_v29 = vsub.s32 0, %v5248_v2 }
  0x6a   : > { %1102 = vperm.xlu1 %5041, %v689_v21   ;;  %911 = vperm.xlu0 %5042, %v758_v32   ;;  %v1197_v32 = vsub.s32 1, %v5248_v2 }
  0x6e   : > { %916 = vperm.xlu1 %5041, %v757_v35   ;;  %1107 = vperm.xlu0 %5042, %v690_v27   ;;  %v481_v27 = vadd.s32 8, %v5248_v2  ;;  %v483_v35 = vadd.s32 24, %v5248_v2 }
  0x70   : > { %v514_v38 = vadd.s32 %v5458_v28, %v481_v27  ;;  %v5532_v27 = vld [vmem:[%s8056_s2] ss:$0 sm:$0xff] }
  0x72   : > { %1112 = vperm.xlu1 %5041, %v691_v31   ;;  %921 = vperm.xlu0 %5042, %v756_v37   ;;  %v838_v37 = vld [vmem:[%s8055_s1] sm:$0x7] }
  0x76   : > { %1330 = vperm.xlu1 %5041, %v823_v39   ;;  %1117 = vperm.xlu0 %5042, %v692_v34   ;;  %v513_v34 = vadd.s32 %v5458_v28, %v5248_v2  ;;  %v5473_v39 = vrot.slane %v838_v37, %v1001_v29  ;;  %v733_v29 = vrot.slane %v5467_v36, 7 }
  0x7a   : > { %1340 = vperm.xlu1 %5041, %v821_v44   ;;  %1335 = vperm.xlu0 %5042, %v822_v45   ;;  %v795_v44 = vrot.slane %v698_v13, 1  ;;  %v796_v45 = vrot.slane %v5441_v14, 1 }
  0x7c   : > { %v815_v57 = vsel %vm8070_vm1, %v794_v5, %v795_v44  ;;  %v813_v1 = vsel %vm8070_vm1, %v796_v45, %v797_v46 }
  0x7e   : > { %996 = vperm.xlu1 %5041, %v741_v47   ;;  %1345 = vperm.xlu0 %5042, %v820_v48   ;;  %v482_v47 = vadd.s32 16, %v5248_v2  ;;  %v798_v48 = vrot.slane %v5467_v36, 1 }
  0x80   : > { %v515_v59 = vadd.s32 %v5458_v28, %v482_v47  ;;  %v5543_v47 = vld [vmem:[%s5256_s22 + $0xe0] sm:$0xff] }
  0x82   : > { %1420 = vperm.xlu1 %5041, %v837_v50   ;;  %1192 = vperm.xlu0 %5042, %v5266_v7   ;;  %v5483_v50 = vrot.slane %v838_v37, %v1197_v32  ;;  %v4211_v20 = vadd.s32 4294967292, %v515_v59 }
  0x84   : > { %vm579_vm9 = vcmp.ge.s32.totalorder %v4211_v20, 0  ;;  %vm611_vm10 = vcmp.lt.s32.totalorder %v4211_v20, 600 }
  0x85   : > { %vm5590_vm13 = vmand %vm579_vm9, %vm611_vm10 }
  0x86   : > { %1122 = vperm.xlu1 %5041, %v693_v42   ;;  %926 = vperm.xlu0 %5042, %v755_v10   ;;  %v1425_v42 = vsub.s32 2, %v5248_v2  ;;  %v5490_v10 = vadd.s32 4294967292, %v514_v38 }
  0x88   : > { %vm578_vm4 = vcmp.ge.s32.totalorder %v5490_v10, 0  ;;  %vm610_vm5 = vcmp.lt.s32.totalorder %v5490_v10, 600  ;;  %v8218_v10 = vmov 0 }
  0x89   : > { %vm5560_vm11 = vmand %vm578_vm4, %vm610_vm5 }
  0x8a   : > { %936 = vperm.xlu1 %5041, %v753_v4   ;;  %931 = vperm.xlu0 %5042, %v754_v23   ;;  %v5493_v23 = vrot.slane %v838_v37, %v1425_v42 }
  0x8e   : > { %1132 = vperm.xlu1 %5041, %v695_v53   ;;  %1127 = vperm.xlu0 %5042, %v694_v52   ;;  %v4209_v52 = vadd.s32 4294967292, %v513_v34  ;;  %v516_v53 = vadd.s32 %v5458_v28, %v483_v35 }
  0x90   : > { %vm577_vm2 = vcmp.ge.s32.totalorder %v4209_v52, 0  ;;  %vm609_vm3 = vcmp.lt.s32.totalorder %v4209_v52, 600 }
  0x91   : > { %vm5548_vm8 = vmand %vm577_vm2, %vm609_vm3 }
  0x92   : > { %1137 = vperm.xlu1 %5041, %v696_v56   ;;  %941 = vperm.xlu0 %5042, %v752_v58   ;;  %v814_v56 = vsel %vm8070_vm1, %v795_v44, %v796_v45 }
  0x96   : > { %1355 = vperm.xlu1 %5041, %v818_v63   ;;  %1350 = vperm.xlu0 %5042, %v819_v0   ;;  %v4212_v63 = vadd.s32 4294967292, %v516_v53  ;;  %v8212_v53 = vmov 0 }
  0x97   : > { %v8213_v53 = vsel %vm5548_vm8, 4294967295, %v8212_v53 }
  0x98   : > { %vm580_vm6 = vcmp.ge.s32.totalorder %v4212_v63, 0  ;;  %vm612_vm7 = vcmp.lt.s32.totalorder %v4212_v63, 600  ;;  %8214 = vst [vmem:[#allocation3_spill] sm:$0xff] %v8213_v53 }
  0x99   : > { %v1043_v16 = vpop.permute.xlu0 %1042  ;;  %v1038_v17 = vpop.permute.xlu1 %1037  ;;  %vm5571_vm12 = vmand %vm580_vm6, %vm612_vm7 }
  0x9a   : > { %1365 = vperm.xlu1 %5041, %v816_v6   ;;  %1360 = vperm.xlu0 %5042, %v817_v9   ;;  %v1199_v62 = vmul.f32 %v5483_v50, %v1038_v17  ;;  %v1200_v0 = vmul.f32 %v5483_v50, %v1043_v16  ;;  %v5519_v17 = vld [vmem:[%s5256_s22 + $0xd0] sm:$0xff]  ;;  %v8219_v10 = vsel %vm5571_vm12, 4294967295, %v8218_v10 }
  0x9b   : > { %v734_v32 = vrot.slane %v5519_v17, 7  ;;  %8220 = vst [vmem:[#allocation5_spill] sm:$0xff] %v8219_v10 }
  0x9d   : > { %v5447_v21 = vpop.permute.xlu1 %1047  ;;  %v842_v22 = vpop.permute.xlu0 %841 }
  0x9e   : > { %1142 = vperm.xlu1 %5041, %v5427_v61   ;;  %946 = vperm.xlu0 %5042, %v751_v18   ;;  %v1003_v54 = vmul.f32 %v5473_v39, %v842_v22  ;;  %v812_v61 = vsel %vm8070_vm1, %v797_v46, %v798_v48  ;;  %v5524_v22 = vld [vmem:[%s5256_s22 + $0xd8] sm:$0xff] }
  0xa0   : > { %v1231_v5 = vadd.f32 %v1199_v62, %v1003_v54  ;;  %v747_v54 = vsel %vm8069_vm0, %v732_v33, %v733_v29  ;;  %v736_v33 = vrot.slane %v5543_v47, 7 }
  0xa1   : > { %v852_v30 = vpop.permute.xlu1 %851  ;;  %v847_v31 = vpop.permute.xlu0 %846 }
  0xa2   : > { %956 = vperm.xlu1 %5041, %v749_v24   ;;  %951 = vperm.xlu0 %5042, %v750_v25   ;;  %v1004_v58 = vmul.f32 %v5473_v39, %v847_v31  ;;  %v1005_v6 = vmul.f32 %v5473_v39, %v852_v30  ;;  %v1201_v24 = vmul.f32 %v5483_v50, %v5447_v21 }
  0xa4   : > { %v1232_v16 = vadd.f32 %v1200_v0, %v1004_v58  ;;  %v1233_v34 = vadd.f32 %v1201_v24, %v1005_v6  ;;  %v8221_v6 = vmov 0 }
  0xa5   : > { %v5475_v40 = vpop.permute.xlu1 %861  ;;  %v857_v41 = vpop.permute.xlu0 %856  ;;  %v8222_v6 = vsel %vm5590_vm13, 4294967295, %v8221_v6 }
  0xa6   : > { %1152 = vperm.xlu1 %5041, %v5441_v14   ;;  %1147 = vperm.xlu0 %5042, %v698_v13   ;;  %v484_v14 = vadd.s32 32, %v5248_v2  ;;  %v1006_v25 = vmul.f32 %v5473_v39, %v857_v41  ;;  %v735_v41 = vrot.slane %v5524_v22, 7  ;;  %v1007_v58 = vmul.f32 %v5473_v39, %v5475_v40  ;;  %8223 = vst [vmem:[#allocation6_spill] sm:$0xff] %v8222_v6 }
  0xa8   : > { %v517_v38 = vadd.s32 %v5458_v28, %v484_v14  ;;  %v745_v40 = vsel %vm8069_vm0, %v734_v32, %v735_v41  ;;  %v746_v14 = vsel %vm8069_vm0, %v733_v29, %v734_v32  ;;  %v744_v20 = vsel %vm8069_vm0, %v735_v41, %v736_v33 }
  0xa9   : > { %v1058_v55 = vpop.permute.xlu1 %1057  ;;  %v1053_v4 = vpop.permute.xlu0 %1052  ;;  %v799_v41 = vrot.slane %v5519_v17, 1 }
  0xaa   : > { %1157 = vperm.xlu1 %5041, %v5455_v26   ;;  %961 = vperm.xlu0 %5042, %v748_v51   ;;  %v1202_v9 = vmul.f32 %v5483_v50, %v1053_v4  ;;  %v1203_v51 = vmul.f32 %v5483_v50, %v1058_v55  ;;  %v8215_v55 = vmov 0  ;;  %v4213_v26 = vadd.s32 4294967292, %v517_v38 }
  0xab   : > { %v8216_v55 = vsel %vm5560_vm11, 4294967295, %v8215_v55  ;;  %v485_v38 = vadd.s32 40, %v5248_v2 }
  0xac   : > { %v1234_v35 = vadd.f32 %v1202_v9, %v1006_v25  ;;  %8217 = vst [vmem:[#allocation4_spill] sm:$0xff] %v8216_v55  ;;  %vm581_vm15 = vcmp.ge.s32.totalorder %v4213_v26, 0  ;;  %vm613_vm2 = vcmp.lt.s32.totalorder %v4213_v26, 600  ;;  %v499_v26 = vadd.s32 152, %v5248_v2 }
  0xad   : > { %v1271_v11 = vpop.permute.xlu1 %1270  ;;  %v1266_v13 = vpop.permute.xlu0 %1265  ;;  %vm5614_vm3 = vmand %vm581_vm15, %vm613_vm2 }
  0xae   : > { %v1428_v18 = vmul.f32 %v5493_v23, %v1271_v11  ;;  %v1427_v19 = vmul.f32 %v5493_v23, %v1266_v13  ;;  %1375 = vperm.xlu1 %5041, %v814_v56   ;;  %1370 = vperm.xlu0 %5042, %v815_v57  }
  0xb0   : > { %v1460_v30 = vadd.f32 %v1428_v18, %v1232_v16  ;;  %v1459_v31 = vadd.f32 %v1427_v19, %v1231_v5 }
  0xb1   : > { %v1281_v37 = vpop.permute.xlu1 %1280  ;;  %v1276_v21 = vpop.permute.xlu0 %1275 }
  0xb2   : > { %v1499_v42 = vadd.f32 %v5532_v27, %v1460_v30  ;;  %v1498_v44 = vadd.f32 %v5532_v27, %v1459_v31  ;;  %v1430_v45 = vmul.f32 %v5493_v23, %v1281_v37  ;;  %v1429_v46 = vmul.f32 %v5493_v23, %v1276_v21  ;;  %1385 = vperm.xlu1 %5041, %v812_v61  }
  0xb3   : > { %1380 = vperm.xlu0 %5042, %v813_v1   ;;  %v1235_v1 = vadd.f32 %v1203_v51, %v1007_v58  ;;  %v8224_v37 = vmov 0  ;;  %v486_v58 = vadd.s32 48, %v5248_v2 }
  0xb4   : > { %v1531_v52 = vmax.f32 %v1499_v42, 0.0  ;;  %v1530_v4 = vmax.f32 %v1498_v44, 0.0  ;;  %v1462_v56 = vadd.f32 %v1430_v45, %v1234_v35  ;;  %v1461_v57 = vadd.f32 %v1429_v46, %v1233_v34 }
  0xb5   : > { %v5566_v59 = vpop.permute.xlu1 %866  ;;  %v1286_v61 = vpop.permute.xlu0 %1285  ;;  %v8225_v37 = vsel %vm5614_vm3, 4294967295, %v8224_v37  ;;  %v800_v42 = vrot.slane %v5524_v22, 1 }
  0xb6   : > { %v1501_v62 = vadd.f32 %v5532_v27, %v1462_v56  ;;  %v1500_v0 = vadd.f32 %v5532_v27, %v1461_v57  ;;  %1162 = vperm.xlu1 %5041, %v5467_v36   ;;  %v5582_v5 = vsel %vm5560_vm11, %v1531_v52, 0.0  ;;  %v5586_v63 = vsel %vm5548_vm8, %v1530_v4, 0.0  ;;  %8226 = vst [vmem:[#allocation7_spill] sm:$0xff] %v8225_v37 }
  0xb7   : > { %v1431_v9 = vmul.f32 %v5493_v23, %v1286_v61  ;;  %966 = vperm.xlu0 %5042, %v747_v54   ;;  %v8087_v24 = vrot.slane %v5582_v5, 7  ;;  %v8073_v29 = vrot.slane %v5586_v63, 1  ;;  %v1723_v35 = vrot.slane %v5582_v5, 1 }
  0xb8   : > { %v1533_v11 = vmax.f32 %v1501_v62, 0.0  ;;  %v1532_v13 = vmax.f32 %v1500_v0, 0.0  ;;  %v487_v52 = vadd.s32 56, %v5248_v2 }
  0xb9   : > { %v1463_v16 = vadd.f32 %v1431_v9, %v1235_v1  ;;  %v1063_v18 = vpop.permute.xlu1 %1062  ;;  %v5598_v19 = vpop.permute.xlu0 %871  ;;  %v1784_v0 = vsel %vm8070_vm1, %v8073_v29, %v1723_v35  ;;  %v496_v29 = vadd.s32 128, %v5248_v2 }
  0xba   : > { %v1629_v25 = vsel %vm5571_vm12, %v1533_v11, 0.0  ;;  %v1628_v30 = vsel %vm5590_vm13, %v1532_v13, 0.0  ;;  %976 = vperm.xlu1 %5041, %v745_v40   ;;  %v518_v11 = vadd.s32 %v5458_v28, %v485_v38  ;;  %v520_v38 = vadd.s32 %v5458_v28, %v487_v52 }
  0xbb   : > { %v1661_v31 = vrot.slane %v1629_v25, 7  ;;  %v1660_v32 = vrot.slane %v1628_v30, 7  ;;  %v1502_v34 = vadd.f32 %v5532_v27, %v1463_v16  ;;  %971 = vperm.xlu0 %5042, %v746_v14   ;;  %v1724_v21 = vrot.slane %v1628_v30, 1 }
  0xbc   : > { %v1725_v4 = vrot.slane %v1629_v25, 1  ;;  %v810_v16 = vsel %vm8070_vm1, %v799_v41, %v800_v42 }
  0xbd   : > { %v1718_v44 = vsel %vm8069_vm0, %v1660_v32, %v1661_v31  ;;  %v1719_v45 = vsel %vm8069_vm0, %v8087_v24, %v1660_v32  ;;  %v1534_v46 = vmax.f32 %v1502_v34, 0.0  ;;  %v877_v51 = vpop.permute.xlu1 %876  ;;  %v1068_v54 = vpop.permute.xlu0 %1067  ;;  %v1783_v62 = vsel %vm8070_vm1, %v1723_v35, %v1724_v21 }
  0xbe   : > { %v5630_v56 = vsel %vm8068_vm14, %v1719_v45, %v1628_v30  ;;  %v5634_v57 = vsel %vm8068_vm14, %v1718_v44, %v1629_v25  ;;  %1172 = vperm.xlu1 %5041, %v5524_v22   ;;  %v1836_v9 = vpack.c.bf16 %v1783_v62, %v1784_v0  ;;  %v1204_v25 = vmul.f32 %v5483_v50, %v1063_v18  ;;  %v5052_v18 = vld [vmem:[%s8057_s3 + $0x8] sm:$0xff]  }
  0xbf   : > { %v5642_v61 = vsel %vm5614_vm3, %v1534_v46, 0.0  ;;  %1167 = vperm.xlu0 %5042, %v5519_v17   ;;  %v801_v17 = vrot.slane %v5543_v47, 1  ;;  %v1782_v32 = vsel %vm8070_vm1, %v1724_v21, %v1725_v4  ;;  %v802_v34 = vrot.slane %v5352_v8, 1 }
  0xc0   : > { %v1662_v40 = vrot.slane %v5642_v61, 7  ;;  %v1726_v1 = vrot.slane %v5642_v61, 1  ;;  %4535 = vmatprep.mubr.bf16.mxu0 %v1836_v9  ;;  %v519_v44 = vadd.s32 %v5458_v28, %v486_v58  ;;  %v1008_v21 = vmul.f32 %v5473_v39, %v5566_v59 }
  0xc1   : > { %v1073_v13 = vpop.permute.xlu1 %1072  ;;  %v5654_v14 = vpop.permute.xlu0 %881  ;;  %v4214_v46 = vadd.s32 4294967292, %v518_v11  ;;  %v488_v59 = vadd.s32 64, %v5248_v2  ;;  %v4216_v9 = vadd.s32 4294967292, %v520_v38 }
  0xc2   : > { %1177 = vperm.xlu1 %5041, %v5543_v47   ;;  %v1781_v30 = vsel %vm8070_vm1, %v1725_v4, %v1726_v1  ;;  %v1717_v45 = vsel %vm8069_vm0, %v1661_v31, %v1662_v40  ;;  %v1205_v4 = vmul.f32 %v5483_v50, %v1068_v54  ;;  %v1206_v58 = vmul.f32 %v5483_v50, %v1073_v13  ;;  %v5053_v13 = vld [vmem:[%s8057_s3 + $0x10] sm:$0xff]  }
  0xc3   : > { %981 = vperm.xlu0 %5042, %v744_v20   ;;  %v1837_v35 = vpack.c.bf16 %v1781_v30, %v1782_v32  ;;  %v811_v20 = vsel %vm8070_vm1, %v798_v48, %v799_v41  ;;  %v5688_v52 = vsel %vm8068_vm14, %v1717_v45, %v5642_v61  ;;  %v1236_v0 = vadd.f32 %v1204_v25, %v1008_v21 }
  0xc4   : > { %v808_v48 = vsel %vm8070_vm1, %v801_v17, %v802_v34  ;;  %v1009_v41 = vmul.f32 %v5473_v39, %v5598_v19  ;;  %v1010_v54 = vmul.f32 %v5473_v39, %v877_v51  ;;  %v4215_v11 = vadd.s32 4294967292, %v519_v44 }
  0xc5   : > { %4536 = vmatmul.mubr.bf16.vlgmr.msra.gmra.mrb[0].mxu0 %v1837_v35  ;;  %v1291_v31 = vpop.permute.xlu1 %1290  ;;  %v1078_v62 = vpop.permute.xlu0 %1077  ;;  %vm582_vm4 = vcmp.ge.s32.totalorder %v4214_v46, 0  ;;  %vm614_vm5 = vcmp.lt.s32.totalorder %v4214_v46, 600  ;;  %v521_v32 = vadd.s32 %v5458_v28, %v488_v59  ;;  %v743_v35 = vsel %vm8069_vm0, %v736_v33, %v737_v12  ;;  %v5054_v12 = vld [vmem:[%s8057_s3 + $0x18] sm:$0xff]  }
  0xc6   : > { %v1432_v36 = vmul.f32 %v5493_v23, %v1291_v31  ;;  %1395 = vperm.xlu1 %5041, %v810_v16   ;;  %4568 = vmatpush3.bf16.msra.mxu0 %v5394_v43  ;;  %v809_v43 = vsel %vm8070_vm1, %v800_v42, %v801_v17  ;;  %v1237_v25 = vadd.f32 %v1205_v4, %v1009_v41  ;;  %vm5720_vm6 = vmand %vm582_vm4, %vm614_vm5  ;;  %v8227_v42 = vmov 0  ;;  %v5055_v41 = vld [vmem:[%s8057_s3 + $0x20] sm:$0xff]  }
  0xc7   : > { %1390 = vperm.xlu0 %5042, %v811_v20   ;;  %4569 = vmatprep.subr.bf16.mxu0 %v5052_v18  ;;  %v1238_v19 = vadd.f32 %v1206_v58, %v1010_v54  ;;  %v8228_v42 = vsel %vm5720_vm6, 4294967295, %v8227_v42  ;;  %v1207_v17 = vmul.f32 %v5483_v50, %v1078_v62  ;;  %vm584_vm7 = vcmp.ge.s32.totalorder %v4216_v9, 0 }
  0xc8   : > { %v1464_v16 = vadd.f32 %v1432_v36, %v1236_v0  ;;  %8229 = vst [vmem:[#allocation8_spill] sm:$0xff] %v8228_v42  ;;  %vm616_vm9 = vcmp.lt.s32.totalorder %v4216_v9, 600  ;;  %vm583_vm10 = vcmp.ge.s32.totalorder %v4215_v11, 0  ;;  %vm615_vm15 = vcmp.lt.s32.totalorder %v4215_v11, 600 }
  0xc9   : > { %v1301_v30 = vpop.permute.xlu1 %1300  ;;  %v1296_v51 = vpop.permute.xlu0 %1295  ;;  %v1011_v45 = vmul.f32 %v5473_v39, %v5654_v14  ;;  %vm5734_vm2 = vmand %vm584_vm7, %vm616_vm9  ;;  %v8230_v4 = vmov 0  ;;  %v4217_v62 = vadd.s32 4294967292, %v521_v32  ;;  %v8233_v0 = vmov 0 }
  0xca   : > { %v1503_v38 = vadd.f32 %v5532_v27, %v1464_v16  ;;  %v1434_v22 = vmul.f32 %v5493_v23, %v1301_v30  ;;  %v1433_v44 = vmul.f32 %v5493_v23, %v1296_v51  ;;  %1405 = vperm.xlu1 %5041, %v808_v48   ;;  %4570 = vmatpush3.bf16.msra.mxu0 %v5052_v18  ;;  %v8231_v4 = vsel %vm5734_vm2, 4294967295, %v8230_v4  ;;  %vm5742_vm4 = vmand %vm583_vm10, %vm615_vm15 }
  0xcb   : > { %1400 = vperm.xlu0 %5042, %v809_v43   ;;  %4571 = vmatprep.subr.bf16.mxu0 %v5053_v13  ;;  %8232 = vst [vmem:[#allocation9_spill] sm:$0xff] %v8231_v4  ;;  %v1239_v14 = vadd.f32 %v1207_v17, %v1011_v45  ;;  %v8234_v0 = vsel %vm5742_vm4, 4294967295, %v8233_v0  ;;  %v803_v48 = vrot.slane %v5348_v3, 1  ;;  %vm585_vm5 = vcmp.ge.s32.totalorder %v4217_v62, 0  ;;  %v5072_v4 = vld [vmem:[%s8060_s6 + $0x28] sm:$0xff]  }
  0xcc   : > { %v1535_v47 = vmax.f32 %v1503_v38, 0.0  ;;  %v1466_v33 = vadd.f32 %v1434_v22, %v1238_v19  ;;  %v1465_v18 = vadd.f32 %v1433_v44, %v1237_v25  ;;  %8235 = vst [vmem:[#allocation10_spill] sm:$0xff] %v8234_v0  ;;  %vm617_vm7 = vcmp.lt.s32.totalorder %v4217_v62, 600  ;;  %v5056_v38 = vld [vmem:[%s8057_s3 + $0x28] sm:$0xff]  }
  0xcd   : > { %v5730_v21 = vpop.permute.xlu1 %886  ;;  %v1306_v46 = vpop.permute.xlu0 %1305  ;;  %v489_v44 = vadd.s32 72, %v5248_v2  ;;  %vm5784_vm9 = vmand %vm585_vm5, %vm617_vm7  ;;  %v490_v61 = vadd.s32 80, %v5248_v2 }
  0xce   : > { %v1631_v20 = vsel %vm5720_vm6, %v1535_v47, 0.0  ;;  %v1505_v58 = vadd.f32 %v5532_v27, %v1466_v33  ;;  %v1504_v31 = vadd.f32 %v5532_v27, %v1465_v18  ;;  %1182 = vperm.xlu1 %5041, %v5352_v8   ;;  %4572 = vmatpush3.bf16.msra.mxu0 %v5053_v13  ;;  %v1435_v36 = vmul.f32 %v5493_v23, %v1306_v46 }
  0xcf   : > { %v1663_v59 = vrot.slane %v1631_v20, 7  ;;  %986 = vperm.xlu0 %5042, %v743_v35   ;;  %4573 = vmatprep.subr.bf16.mxu0 %v5054_v12  ;;  %v1727_v13 = vrot.slane %v1631_v20, 1 }
  0xd0   : > { %v1537_v54 = vmax.f32 %v1505_v58, 0.0  ;;  %v1536_v9 = vmax.f32 %v1504_v31, 0.0  ;;  %v1467_v16 = vadd.f32 %v1435_v36, %v1239_v14  ;;  %v522_v31 = vadd.s32 %v5458_v28, %v489_v44 }
  0xd1   : > { %v1083_v43 = vpop.permute.xlu1 %1082  ;;  %v5751_v11 = vpop.permute.xlu0 %891  ;;  %v1716_v25 = vsel %vm8069_vm0, %v1662_v40, %v1663_v59  ;;  %v806_v40 = vsel %vm8070_vm1, %v803_v48, %v804_v49  ;;  %v1780_v8 = vsel %vm8070_vm1, %v1726_v1, %v1727_v13  ;;  %v5057_v1 = vld [vmem:[%s8057_s3 + $0x30] sm:$0xff]  }
  0xd2   : > { %v5759_v19 = vsel %vm5734_vm2, %v1537_v54, 0.0  ;;  %v1632_v30 = vsel %vm5742_vm4, %v1536_v9, 0.0  ;;  %1187 = vperm.xlu1 %5041, %v5348_v3   ;;  %4574 = vmatpush3.bf16.msra.mxu0 %v5054_v12  ;;  %v1506_v22 = vadd.f32 %v5532_v27, %v1467_v16  ;;  %v807_v3 = vsel %vm8070_vm1, %v802_v34, %v803_v48 }
  0xd3   : > { %v8074_v51 = vrot.slane %v5759_v19, 7  ;;  %v1664_v32 = vrot.slane %v1632_v30, 7  ;;  %v1728_v35 = vrot.slane %v1632_v30, 1  ;;  %991 = vperm.xlu0 %5042, %v5364_v15   ;;  %4575 = vmatprep.subr.bf16.mxu0 %v5055_v41  ;;  %v5781_v7 = vsel %vm8068_vm14, %v1716_v25, %v1631_v20 }
  0xd4   : > { %v8236_v15 = vmov 0  ;;  %v1538_v33 = vmax.f32 %v1506_v22, 0.0  ;;  %v1729_v45 = vrot.slane %v5759_v19, 1  ;;  %v491_v48 = vadd.s32 88, %v5248_v2 }
  0xd5   : > { %v8237_v15 = vsel %vm5784_vm9, 4294967295, %v8236_v15  ;;  %v897_v49 = vpop.permute.xlu1 %896  ;;  %v1088_v17 = vpop.permute.xlu0 %1087  ;;  %v1779_v12 = vsel %vm8070_vm1, %v1727_v13, %v1728_v35  ;;  %v1714_v47 = vsel %vm8069_vm0, %v1664_v32, %v8074_v51  ;;  %v1715_v46 = vsel %vm8069_vm0, %v1663_v59, %v1664_v32 }
  0xd6   : > { %8238 = vst [vmem:[#allocation11_spill] sm:$0xff] %v8237_v15  ;;  %1415 = vperm.xlu1 %5041, %v806_v40   ;;  %v1838_v18 = vpack.c.bf16 %v1779_v12, %v1780_v8  ;;  %4576 = vmatpush3.bf16.msra.mxu0 %v5055_v41  ;;  %v5810_v20 = vsel %vm8068_vm14, %v1714_v47, %v5759_v19  ;;  %v5814_v58 = vsel %vm5784_vm9, %v1538_v33, 0.0  ;;  %v4218_v32 = vadd.s32 4294967292, %v522_v31 }
  0xd7   : > { %1410 = vperm.xlu0 %5042, %v807_v3   ;;  %4577 = vmatprep.subr.bf16.mxu0 %v5056_v38  ;;  %v5819_v62 = vsel %vm8068_vm14, %v1715_v46, %v1632_v30  ;;  %v1730_v14 = vrot.slane %v5814_v58, 1  ;;  %v1208_v54 = vmul.f32 %v5483_v50, %v1083_v43  ;;  %v1778_v13 = vsel %vm8070_vm1, %v1728_v35, %v1729_v45  ;;  %v5058_v43 = vld [vmem:[%s8057_s3 + $0x38] sm:$0xff]  }
  0xd8   : > { %4539 = vmatprep.mubr.bf16.mxu0 %v1838_v18  ;;  %v523_v16 = vadd.s32 %v5458_v28, %v490_v61  ;;  %v1012_v25 = vmul.f32 %v5473_v39, %v5730_v21  ;;  %v1209_v40 = vmul.f32 %v5483_v50, %v1088_v17  ;;  %v524_v3 = vadd.s32 %v5458_v28, %v491_v48 }
  0xd9   : > { %v1093_v36 = vpop.permute.xlu1 %1092  ;;  %v902_v59 = vpop.permute.xlu0 %901  ;;  %v1777_v9 = vsel %vm8070_vm1, %v1729_v45, %v1730_v14  ;;  %v492_v35 = vadd.s32 96, %v5248_v2  ;;  %v1013_v8 = vmul.f32 %v5473_v39, %v5751_v11  ;;  %v1014_v33 = vmul.f32 %v5473_v39, %v897_v49 }
  0xda   : > { %4578 = vmatpush3.bf16.msra.mxu0 %v5056_v38  ;;  %v1839_v30 = vpack.c.bf16 %v1777_v9, %v1778_v13  ;;  %v1240_v44 = vadd.f32 %v1208_v54, %v1012_v25  ;;  %v1210_v12 = vmul.f32 %v5483_v50, %v1093_v36  ;;  %v4219_v47 = vadd.s32 4294967292, %v523_v16 }
  0xdb   : > { %4579 = vmatprep.subr.bf16.mxu0 %v5057_v1  ;;  %vm586_vm10 = vcmp.ge.s32.totalorder %v4218_v32, 0  ;;  %vm618_vm15 = vcmp.lt.s32.totalorder %v4218_v32, 600  ;;  %v1241_v18 = vadd.f32 %v1209_v40, %v1013_v8  ;;  %v4220_v45 = vadd.s32 4294967292, %v524_v3 }
  0xdc   : > { %4540 = vmatmul.mubr.bf16.gmra.mrb[4].mxu0 %v1839_v30  ;;  %v525_v31 = vadd.s32 %v5458_v28, %v492_v35  ;;  %v1242_v36 = vadd.f32 %v1210_v12, %v1014_v33  ;;  %vm5850_vm5 = vmand %vm586_vm10, %vm618_vm15  ;;  %vm587_vm7 = vcmp.ge.s32.totalorder %v4219_v47, 0  ;;  %vm619_vm14 = vcmp.lt.s32.totalorder %v4219_v47, 600 }
  0xdd   : > { %v1311_v38 = vpop.permute.xlu1 %1310  ;;  %v1098_v22 = vpop.permute.xlu0 %1097  ;;  %v1015_v25 = vmul.f32 %v5473_v39, %v902_v59  ;;  %vm588_vm0 = vcmp.ge.s32.totalorder %v4220_v45, 0  ;;  %vm620_vm1 = vcmp.lt.s32.totalorder %v4220_v45, 600  ;;  %vm5863_vm10 = vmand %vm587_vm7, %vm619_vm14  ;;  %v8242_v35 = vmov 0 }
  0xde   : > { %v1436_v21 = vmul.f32 %v5493_v23, %v1311_v38  ;;  %4580 = vmatpush3.bf16.msra.mxu0 %v5057_v1  ;;  %v8239_v1 = vmov 0  ;;  %v1211_v49 = vmul.f32 %v5483_v50, %v1098_v22  ;;  %v4221_v3 = vadd.s32 4294967292, %v525_v31  ;;  %vm5875_vm15 = vmand %vm588_vm0, %vm620_vm1 }
  0xdf   : > { %4581 = vmatprep.subr.bf16.mxu0 %v5058_v43  ;;  %v8240_v1 = vsel %vm5850_vm5, 4294967295, %v8239_v1  ;;  %v8243_v35 = vsel %vm5863_vm10, 4294967295, %v8242_v35  ;;  %v8245_v33 = vmov 0  ;;  %vm8251_vm1 = vcmp.lt.s32.totalorder %v5248_v2, 7 }
  0xe0   : > { %v1468_v17 = vadd.f32 %v1436_v21, %v1240_v44  ;;  %8241 = vst [vmem:[#allocation12_spill] sm:$0xff] %v8240_v1  ;;  %8244 = vst [vmem:[#allocation13_spill] sm:$0xff] %v8243_v35  ;;  %v5871_v44 = vld [vmem:[%s8061_s7] sm:$0xff]   ;;  %v8246_v33 = vsel %vm5875_vm15, 4294967295, %v8245_v33  ;;  %vm589_vm14 = vcmp.ge.s32.totalorder %v4221_v3, 0  ;;  %vm621_vm7 = vcmp.lt.s32.totalorder %v4221_v3, 600 }
  0xe1   : > { %v1321_v61 = vpop.permute.xlu1 %1320  ;;  %v1316_v46 = vpop.permute.xlu0 %1315  ;;  %8247 = vst [vmem:[#allocation14_spill] sm:$0xff] %v8246_v33  ;;  %4615 = vmatprep.subr.bf16.mxu1 %v5871_v44  ;;  %vm5891_vm0 = vmand %vm589_vm14, %vm621_vm7  ;;  %v529_v34 = vadd.s32 %v5458_v28, %v496_v29 }
  0xe2   : > { %v1507_v48 = vadd.f32 %v5532_v27, %v1468_v17  ;;  %v1438_v54 = vmul.f32 %v5493_v23, %v1321_v61  ;;  %v1437_v11 = vmul.f32 %v5493_v23, %v1316_v46  ;;  %4582 = vmatpush3.bf16.msra.mxu0 %v5058_v43  ;;  %v1243_v43 = vadd.f32 %v1211_v49, %v1015_v25  ;;  %vm8254_vm14 = vmmov %vm8251_vm1 }
  0xe4   : > { %v1539_v9 = vmax.f32 %v1507_v48, 0.0  ;;  %v1470_v13 = vadd.f32 %v1438_v54, %v1242_v36  ;;  %v1469_v16 = vadd.f32 %v1437_v11, %v1241_v18  ;;  %v493_v36 = vadd.s32 104, %v5248_v2 }
  0xe5   : > { %v907_v30 = vpop.permute.xlu1 %906  ;;  %v1326_v32 = vpop.permute.xlu0 %1325  ;;  %v8248_v48 = vmov 0 }
  0xe6   : > { %v5858_v40 = vsel %vm5850_vm5, %v1539_v9, 0.0  ;;  %v1509_v38 = vadd.f32 %v5532_v27, %v1470_v13  ;;  %v1508_v22 = vadd.f32 %v5532_v27, %v1469_v16  ;;  %v1439_v59 = vmul.f32 %v5493_v23, %v1326_v32  ;;  %vm8252_vm5 = vmmov %vm8251_vm1 }
  0xe7   : > { %v1731_v8 = vrot.slane %v5858_v40, 1  ;;  %v8249_v48 = vsel %vm5891_vm0, 4294967295, %v8248_v48  ;;  %v494_v32 = vadd.s32 112, %v5248_v2 }
  0xe8   : > { %v1541_v12 = vmax.f32 %v1509_v38, 0.0  ;;  %v1540_v21 = vmax.f32 %v1508_v22, 0.0  ;;  %v1471_v47 = vadd.f32 %v1439_v59, %v1243_v43  ;;  %8250 = vst [vmem:[#allocation15_spill] sm:$0xff] %v8249_v48  ;;  %v526_v22 = vadd.s32 %v5458_v28, %v493_v36 }
  0xe9   : > { %v1103_v17 = vpop.permute.xlu1 %1102  ;;  %v912_v18 = vpop.permute.xlu0 %911  ;;  %v1776_v9 = vsel %vm8252_vm5, %v1730_v14, %v1731_v8  ;;  %vm8253_vm5 = vmmov %vm8251_vm1 }
  0xea   : > { %v5882_v61 = vsel %vm5863_vm10, %v1540_v21, 0.0  ;;  %v5887_v45 = vsel %vm5875_vm15, %v1541_v12, 0.0  ;;  %v1510_v31 = vadd.f32 %v5532_v27, %v1471_v47  ;;  %v495_v12 = vadd.s32 120, %v5248_v2 }
  0xeb   : > { %v1732_v46 = vrot.slane %v5882_v61, 1  ;;  %v1733_v25 = vrot.slane %v5887_v45, 1  ;;  %v1212_v14 = vmul.f32 %v5483_v50, %v1103_v17  ;;  %v527_v47 = vadd.s32 %v5458_v28, %v494_v32 }
  0xec   : > { %v1542_v13 = vmax.f32 %v1510_v31, 0.0  ;;  %v1016_v31 = vmul.f32 %v5473_v39, %v907_v30  ;;  %v528_v17 = vadd.s32 %v5458_v28, %v495_v12  ;;  %v1669_v48 = vrot.slane %v5887_v45, 7 }
  0xed   : > { %v917_v54 = vpop.permute.xlu1 %916  ;;  %v1108_v11 = vpop.permute.xlu0 %1107  ;;  %v1775_v49 = vsel %vm8251_vm1, %v1731_v8, %v1732_v46  ;;  %v1774_v8 = vsel %vm8254_vm14, %v1732_v46, %v1733_v25  ;;  %v4223_v32 = vadd.s32 4294967292, %v527_v47 }
  0xee   : > { %v1840_v16 = vpack.c.bf16 %v1775_v49, %v1776_v9  ;;  %v5905_v38 = vsel %vm5891_vm0, %v1542_v13, 0.0  ;;  %v4222_v49 = vadd.s32 4294967292, %v526_v22  ;;  %v1213_v9 = vmul.f32 %v5483_v50, %v1108_v11 }
  0xef   : > { %v1734_v3 = vrot.slane %v5905_v38, 1  ;;  %v1244_v41 = vadd.f32 %v1212_v14, %v1016_v31  ;;  %v1018_v30 = vmul.f32 %v5473_v39, %v917_v54  ;;  %v511_v14 = vadd.s32 248, %v5248_v2 }
  0xf0   : > { %4543 = vmatprep.mubr.bf16.mxu0 %v1840_v16  ;;  %vm590_vm7 = vcmp.ge.s32.totalorder %v4222_v49, 0  ;;  %vm622_vm1 = vcmp.lt.s32.totalorder %v4222_v49, 600  ;;  %vm623_vm0 = vcmp.lt.s32.totalorder %v4223_v32, 600 }
  0xf1   : > { %v1113_v43 = vpop.permute.xlu1 %1112  ;;  %v922_v59 = vpop.permute.xlu0 %921  ;;  %v1773_v21 = vsel %vm8253_vm5, %v1733_v25, %v1734_v3  ;;  %v1017_v25 = vmul.f32 %v5473_v39, %v912_v18  ;;  %vm591_vm5 = vcmp.ge.s32.totalorder %v4223_v32, 0  ;;  %vm5933_vm14 = vmand %vm590_vm7, %vm622_vm1 }
  0xf2   : > { %v1841_v36 = vpack.c.bf16 %v1773_v21, %v1774_v8  ;;  %v1214_v51 = vmul.f32 %v5483_v50, %v1113_v43  ;;  %v4224_v21 = vadd.s32 4294967292, %v528_v17  ;;  %v4225_v17 = vadd.s32 4294967292, %v529_v34  ;;  %vm5946_vm7 = vmand %vm591_vm5, %vm623_vm0 }
  0xf3   : > { %v1245_v22 = vadd.f32 %v1213_v9, %v1017_v25  ;;  %v544_v25 = vadd.s32 %v5458_v28, %v511_v14  ;;  %vm8267_vm5 = vcmp.lt.s32.totalorder %v5248_v2, 7 }
  0xf4   : > { %4544 = vmatmul.mubr.bf16.gmra.mrb[8].mxu0 %v1841_v36  ;;  %v1246_v43 = vadd.f32 %v1214_v51, %v1018_v30  ;;  %v1019_v51 = vmul.f32 %v5473_v39, %v922_v59  ;;  %vm592_vm15 = vcmp.ge.s32.totalorder %v4224_v21, 0  ;;  %vm624_vm9 = vcmp.lt.s32.totalorder %v4224_v21, 600 }
  0xf5   : > { %v1331_v13 = vpop.permute.xlu1 %1330  ;;  %v1118_v16 = vpop.permute.xlu0 %1117  ;;  %vm5951_vm1 = vmand %vm592_vm15, %vm624_vm9  ;;  %v8261_v21 = vmov 0  ;;  %vm593_vm10 = vcmp.ge.s32.totalorder %v4225_v17, 0  ;;  %vm625_vm6 = vcmp.lt.s32.totalorder %v4225_v17, 600 }
  0xf6   : > { %v1440_v46 = vmul.f32 %v5493_v23, %v1331_v13  ;;  %v1215_v54 = vmul.f32 %v5483_v50, %v1118_v16  ;;  %v8262_v21 = vsel %vm5951_vm1, 4294967295, %v8261_v21  ;;  %vm5970_vm9 = vmand %vm593_vm10, %vm625_vm6 }
  0xf7   : > { %8263 = vst [vmem:[#allocation18_spill] sm:$0xff] %v8262_v21  ;;  %vm8272_vm10 = vmmov %vm8267_vm5 }
  0xf8   : > { %v1472_v11 = vadd.f32 %v1440_v46, %v1244_v41  ;;  %v8255_v41 = vmov 0 }
  0xf9   : > { %v1341_v8 = vpop.permute.xlu1 %1340  ;;  %v1336_v12 = vpop.permute.xlu0 %1335  ;;  %v8256_v41 = vsel %vm5933_vm14, 4294967295, %v8255_v41 }
  0xfa   : > { %v1511_v31 = vadd.f32 %v5532_v27, %v1472_v11  ;;  %v1442_v36 = vmul.f32 %v5493_v23, %v1341_v8  ;;  %v1441_v18 = vmul.f32 %v5493_v23, %v1336_v12  ;;  %8257 = vst [vmem:[#allocation16_spill] sm:$0xff] %v8256_v41  ;;  %v1247_v11 = vadd.f32 %v1215_v54, %v1019_v51 }
  0xfc   : > { %v1543_v47 = vmax.f32 %v1511_v31, 0.0  ;;  %v1474_v9 = vadd.f32 %v1442_v36, %v1246_v43  ;;  %v1473_v29 = vadd.f32 %v1441_v18, %v1245_v22  ;;  %v8258_v22 = vmov 0 }
  0xfd   : > { %v997_v13 = vpop.permute.xlu1 %996  ;;  %v1346_v46 = vpop.permute.xlu0 %1345  ;;  %v8259_v22 = vsel %vm5946_vm7, 4294967295, %v8258_v22  ;;  %v4240_v43 = vadd.s32 4294967292, %v544_v25  ;;  %v8264_v25 = vmov 0 }
  0xfe   : > { %v1513_v16 = vadd.f32 %v5532_v27, %v1474_v9  ;;  %v1512_v49 = vadd.f32 %v5532_v27, %v1473_v29  ;;  %v5943_v30 = vsel %vm5933_vm14, %v1543_v47, 0.0  ;;  %8260 = vst [vmem:[#allocation17_spill] sm:$0xff] %v8259_v22  ;;  %v1443_v34 = vmul.f32 %v5493_v23, %v1346_v46  ;;  %vm8268_vm14 = vmmov %vm8267_vm5 }
  0xff   : > { %v1735_v32 = vrot.slane %v5943_v30, 1  ;;  %v1034_v18 = vmul.f32 %v5473_v39, %v997_v13  ;;  %v8265_v25 = vsel %vm5970_vm9, 4294967295, %v8264_v25  ;;  %vm608_vm15 = vcmp.ge.s32.totalorder %v4240_v43, 0 }
 0x100   : > { %v1545_v59 = vmax.f32 %v1513_v16, 0.0  ;;  %v1544_v8 = vmax.f32 %v1512_v49, 0.0  ;;  %v1475_v12 = vadd.f32 %v1443_v34, %v1247_v11  ;;  %8266 = vst [vmem:[#allocation19_spill] sm:$0xff] %v8265_v25  ;;  %vm640_vm0 = vcmp.lt.s32.totalorder %v4240_v43, 600 }
 0x101   : > { %v1421_v14 = vpop.permute.xlu1 %1420  ;;  %v1193_v31 = vpop.permute.xlu0 %1192  ;;  %v498_v11 = vadd.s32 144, %v5248_v2  ;;  %v1772_v17 = vsel %vm8268_vm14, %v1734_v3, %v1735_v32  ;;  %vm5992_vm6 = vmand %vm608_vm15, %vm640_vm0  ;;  %v8274_v25 = vrot.slane %v5582_v5, 7  ;;  %vm8275_vm15 = vcmp.lt.s32.totalorder %v5248_v2, 1 }
 0x102   : > { %v5958_v36 = vsel %vm5946_vm7, %v1544_v8, 0.0  ;;  %v1230_v54 = vmul.f32 %v5483_v50, %v1193_v31  ;;  %v5965_v9 = vsel %vm5951_vm1, %v1545_v59, 0.0  ;;  %v1514_v29 = vadd.f32 %v5532_v27, %v1475_v12  ;;  %vm8273_vm14 = vmmov %vm8267_vm5 }
 0x103   : > { %v1736_v47 = vrot.slane %v5958_v36, 1  ;;  %v1458_v51 = vmul.f32 %v5493_v23, %v1421_v14  ;;  %v497_v8 = vadd.s32 136, %v5248_v2  ;;  %v1737_v12 = vrot.slane %v5965_v9, 1  ;;  %vm8276_vm0 = vmmov %vm8275_vm15 }
 0x104   : > { %v1262_v46 = vadd.f32 %v1230_v54, %v1034_v18  ;;  %v1546_v34 = vmax.f32 %v1514_v29, 0.0  ;;  %v1658_v54 = vrot.slane %v5586_v63, 7  ;;  %v8280_v22 = vpack.c.bf16 %v5634_v57, %v5630_v56 }
 0x105   : > { %v1123_v13 = vpop.permute.xlu1 %1122  ;;  %v927_v16 = vpop.permute.xlu0 %926  ;;  %v1771_v49 = vsel %vm8267_vm5, %v1735_v32, %v1736_v47  ;;  %v1770_v43 = vsel %vm8273_vm14, %v1736_v47, %v1737_v12  ;;  %vm8277_vm5 = vcmp.lt.s32.totalorder %v5503_v60, 64  ;;  %vm8283_vm14 = vmmov %vm8276_vm0 }
 0x106   : > { %v1490_v59 = vadd.f32 %v1458_v51, %v1262_v46  ;;  %v1842_v14 = vpack.c.bf16 %v1771_v49, %v1772_v17  ;;  %v5985_v31 = vsel %vm5970_vm9, %v1546_v34, 0.0  ;;  %v8269_v51 = vmov 0 }
 0x107   : > { %v8090_v29 = vrot.slane %v5985_v31, 1  ;;  %v8270_v51 = vsel %vm5992_vm6, 4294967295, %v8269_v51  ;;  %v531_v46 = vadd.s32 %v5458_v28, %v498_v11  ;;  %v530_v34 = vadd.s32 %v5458_v28, %v497_v8 }
 0x108   : > { %v1529_v18 = vadd.f32 %v5532_v27, %v1490_v59  ;;  %8271 = vst [vmem:[#allocation20_spill] sm:$0xff] %v8270_v51  ;;  %4547 = vmatprep.mubr.bf16.mxu0 %v1842_v14  ;;  %v500_v17 = vadd.s32 160, %v5248_v2 }
 0x109   : > { %v937_v3 = vpop.permute.xlu1 %936  ;;  %v932_v32 = vpop.permute.xlu0 %931  ;;  %v1769_v59 = vsel %vm8272_vm10, %v1737_v12, %v8090_v29  ;;  %v1720_v29 = vsel %vm8275_vm15, %v1658_v54, %v8274_v25  ;;  %v4227_v41 = vadd.s32 4294967292, %v531_v46  ;;  %v4226_v12 = vadd.s32 4294967292, %v530_v34  ;;  %vm8278_vm10 = vmmov %vm8277_vm5 }
 0x10a   : > { %v1561_v49 = vmax.f32 %v1529_v18, 0.0  ;;  %v1843_v11 = vpack.c.bf16 %v1769_v59, %v1770_v43  ;;  %v532_v59 = vadd.s32 %v5458_v28, %v499_v26  ;;  %v1667_v43 = vrot.slane %v5858_v40, 7  ;;  %vm8284_vm15 = vmmov %vm8277_vm5 }
 0x10b   : > { %v1789_v25 = vsel %vm8278_vm10, %v1720_v29, %v5582_v5  ;;  %v1216_v34 = vmul.f32 %v5483_v50, %v1123_v13  ;;  %v1020_v26 = vmul.f32 %v5473_v39, %v927_v16  ;;  %v1021_v5 = vmul.f32 %v5473_v39, %v932_v32  ;;  %vm8279_vm10 = vmmov %vm8276_vm0 }
 0x10c   : > { %v6008_v14 = vsel %vm5992_vm6, %v1561_v49, 0.0  ;;  %4548 = vmatmul.mubr.bf16.gmra.mrb[12].mxu0 %v1843_v11  ;;  %v533_v49 = vadd.s32 %v5458_v28, %v500_v17  ;;  %v1022_v33 = vmul.f32 %v5473_v39, %v937_v3 }
 0x10d   : > { %v8097_v18 = vrot.slane %v6008_v14, 7  ;;  %v1133_v8 = vpop.permute.xlu1 %1132  ;;  %v1128_v24 = vpop.permute.xlu0 %1127 }
 0x10e   : > { %v1217_v17 = vmul.f32 %v5483_v50, %v1128_v24  ;;  %v1218_v13 = vmul.f32 %v5483_v50, %v1133_v8  ;;  %v8281_v8 = vpack.c.bf16 %v5781_v7, %v5688_v52 }
 0x10f   : > { %v1721_v47 = vsel %vm8276_vm0, %v8097_v18, %v1658_v54  ;;  %v1666_v54 = vrot.slane %v5814_v58, 7  ;;  %v4228_v18 = vadd.s32 4294967292, %v532_v59 }
 0x110   : > { %v1788_v51 = vsel %vm8277_vm5, %v1721_v47, %v5586_v63  ;;  %v4229_v47 = vadd.s32 4294967292, %v533_v49  ;;  %v1248_v49 = vadd.f32 %v1216_v34, %v1020_v26  ;;  %v1249_v59 = vadd.f32 %v1217_v17, %v1021_v5 }
 0x111   : > { %v1138_v46 = vpop.permute.xlu1 %1137  ;;  %v942_v11 = vpop.permute.xlu0 %941  ;;  %v1820_v21 = vpack.c.bf16 %v1789_v25, %v1788_v51  ;;  %v1712_v29 = vsel %vm8279_vm10, %v1666_v54, %v1667_v43  ;;  %v1668_v51 = vrot.slane %v5882_v61, 7  ;;  %v8282_v34 = vrot.slane %v5759_v19, 7  ;;  %vm8285_vm10 = vmmov %vm8276_vm0 }
 0x112   : > { %v1219_v16 = vmul.f32 %v5483_v50, %v1138_v46  ;;  %v1023_v24 = vmul.f32 %v5473_v39, %v942_v11  ;;  %v1797_v57 = vsel %vm8284_vm15, %v1712_v29, %v5858_v40  ;;  %v1250_v3 = vadd.f32 %v1218_v13, %v1022_v33 }
 0x113   : > { %4583 = vmatprep.mubr.bf16.mxu0 %v1820_v21  ;;  %v1713_v56 = vsel %vm8283_vm14, %v8282_v34, %v1666_v54  ;;  %v1710_v17 = vsel %vm8285_vm10, %v1668_v51, %v1669_v48  ;;  %vm8286_vm5 = vcmp.lt.s32.totalorder %v4227_v41, 600  ;;  %vm8287_vm0 = vcmp.ge.s32.totalorder %v4227_v41, 0 }
 0x114   : > { %4584 = vmatmul.mubr.bf16.vlgmr.msra.gmra.mrb[0].mxu0 %v8280_v22  ;;  %v1671_v22 = vrot.slane %v5943_v30, 7  ;;  %v1251_v26 = vadd.f32 %v1219_v16, %v1023_v24  ;;  %vm6061_vm6 = vmand %vm8287_vm0, %vm8286_vm5  ;;  %v8288_v19 = vmov 0  ;;  %v1670_v5 = vrot.slane %v5905_v38, 7 }
 0x115   : > { %v1356_v21 = vpop.permute.xlu1 %1355  ;;  %v1351_v25 = vpop.permute.xlu0 %1350  ;;  %4587 = vmatprep.mubr.bf16.mxu0 %v8281_v8  ;;  %v8289_v19 = vsel %vm6061_vm6, 4294967295, %v8288_v19  ;;  %vm8291_vm14 = vcmp.lt.s32.totalorder %v4226_v12, 600  ;;  %vm8292_vm15 = vcmp.ge.s32.totalorder %v4226_v12, 0  ;;  %v8293_v29 = vmov 0 }
 0x116   : > { %v1445_v32 = vmul.f32 %v5493_v23, %v1356_v21  ;;  %v1444_v1 = vmul.f32 %v5493_v23, %v1351_v25  ;;  %8290 = vst [vmem:[#allocation21_spill] sm:$0xff] %v8289_v19  ;;  %vm6072_vm9 = vmand %vm8292_vm15, %vm8291_vm14  ;;  %vm8296_vm5 = vcmp.lt.s32.totalorder %v5503_v60, 64  ;;  %v1711_v13 = vsel %vm8285_vm10, %v1667_v43, %v1668_v51 }
 0x117   : > { %v8294_v29 = vsel %vm6072_vm9, 4294967295, %v8293_v29  ;;  %v1796_v41 = vsel %vm8296_vm5, %v1713_v56, %v5814_v58  ;;  %vm8297_vm14 = vmmov %vm8296_vm5  ;;  %vm8299_vm5 = vcmp.lt.s32.totalorder %v4229_v47, 600  ;;  %v8301_v51 = vmov 0 }
 0x118   : > { %v1477_v46 = vadd.f32 %v1445_v32, %v1249_v59  ;;  %v1476_v11 = vadd.f32 %v1444_v1, %v1248_v49  ;;  %8295 = vst [vmem:[#allocation22_spill] sm:$0xff] %v8294_v29  ;;  %v1824_v59 = vpack.c.bf16 %v1797_v57, %v1796_v41  ;;  %v1799_v12 = vsel %vm8297_vm14, %v1710_v17, %v5887_v45  ;;  %vm8298_vm15 = vmmov %vm8285_vm10 }
 0x119   : > { %v1366_v52 = vpop.permute.xlu1 %1365  ;;  %v1361_v7 = vpop.permute.xlu0 %1360  ;;  %v1708_v8 = vsel %vm8298_vm15, %v1670_v5, %v1671_v22  ;;  %vm8300_vm10 = vcmp.ge.s32.totalorder %v4229_v47, 0  ;;  %v1673_v34 = vrot.slane %v5965_v9, 7  ;;  %v1672_v56 = vrot.slane %v5958_v36, 7 }
 0x11a   : > { %v1516_v1 = vadd.f32 %v5532_v27, %v1477_v46  ;;  %v1515_v54 = vadd.f32 %v5532_v27, %v1476_v11  ;;  %v1447_v40 = vmul.f32 %v5493_v23, %v1366_v52  ;;  %v1446_v33 = vmul.f32 %v5493_v23, %v1361_v7  ;;  %vm6098_vm0 = vmand %vm8300_vm10, %vm8299_vm5 }
 0x11b   : > { %v8302_v51 = vsel %vm6098_vm0, 4294967295, %v8301_v51  ;;  %v8304_v11 = vpack.c.bf16 %v5810_v20, %v5819_v62  ;;  %vm8305_vm14 = vcmp.lt.s32.totalorder %v4228_v18, 600  ;;  %vm8306_vm15 = vcmp.ge.s32.totalorder %v4228_v18, 0 }
 0x11c   : > { %v1548_v16 = vmax.f32 %v1516_v1, 0.0  ;;  %v1547_v24 = vmax.f32 %v1515_v54, 0.0  ;;  %v1479_v21 = vadd.f32 %v1447_v40, %v1251_v26  ;;  %v1478_v25 = vadd.f32 %v1446_v33, %v1250_v3  ;;  %8303 = vst [vmem:[#allocation23_spill] sm:$0xff] %v8302_v51 }
 0x11d   : > { %v1143_v49 = vpop.permute.xlu1 %1142  ;;  %v947_v32 = vpop.permute.xlu0 %946  ;;  %4588 = vmatmul.mubr.bf16.gmra.mrb[4].mxu0 %v8304_v11  ;;  %v8307_v47 = vmov 0  ;;  %vm8310_vm5 = vcmp.lt.s32.totalorder %v5503_v60, 64  ;;  %vm8311_vm10 = vcmp.lt.s32.totalorder %v5248_v2, 1  ;;  %v502_v17 = vadd.s32 176, %v5248_v2 }
 0x11e   : > { %v6090_v58 = vsel %vm6061_vm6, %v1548_v16, 0.0  ;;  %v6094_v43 = vsel %vm6072_vm9, %v1547_v24, 0.0  ;;  %v1518_v45 = vadd.f32 %v5532_v27, %v1479_v21  ;;  %v1517_v46 = vadd.f32 %v5532_v27, %v1478_v25  ;;  %vm6111_vm9 = vmand %vm8306_vm15, %vm8305_vm14  ;;  %4591 = vmatprep.mubr.bf16.mxu0 %v1824_v59 }
 0x11f   : > { %v8308_v47 = vsel %vm6111_vm9, 4294967295, %v8307_v47  ;;  %v1798_v57 = vsel %vm8310_vm5, %v1711_v13, %v5882_v61  ;;  %v1709_v27 = vsel %vm8311_vm10, %v1669_v48, %v1670_v5  ;;  %v1739_v3 = vrot.slane %v6094_v43, 1  ;;  %vm8312_vm14 = vmmov %vm8310_vm5 }
 0x120   : > { %8309 = vst [vmem:[#allocation24_spill] sm:$0xff] %v8308_v47  ;;  %v1550_v20 = vmax.f32 %v1518_v45, 0.0  ;;  %v1549_v62 = vmax.f32 %v1517_v46, 0.0  ;;  %v1740_v26 = vrot.slane %v6090_v58, 1  ;;  %v1801_v7 = vsel %vm8312_vm14, %v1708_v8, %v5943_v30  ;;  %vm8313_vm15 = vmmov %vm8310_vm5 }
 0x121   : > { %v6122_v52 = vpop.permute.xlu1 %956  ;;  %v952_v18 = vpop.permute.xlu0 %951  ;;  %v501_v61 = vadd.s32 168, %v5248_v2  ;;  %v1825_v54 = vpack.c.bf16 %v1799_v12, %v1798_v57  ;;  %v504_v40 = vadd.s32 192, %v5248_v2  ;;  %v1675_v33 = vrot.slane %v6094_v43, 7 }
 0x122   : > { %v6131_v48 = vsel %vm6098_vm0, %v1550_v20, 0.0  ;;  %v6135_v1 = vsel %vm6111_vm9, %v1549_v62, 0.0  ;;  %v1800_v13 = vsel %vm8313_vm15, %v1709_v27, %v5905_v38  ;;  %vm8314_vm5 = vcmp.lt.s32.totalorder %v5248_v2, 7  ;;  %v5060_v62 = vld [vmem:[%s8061_s7 + $0x8] sm:$0xff]  }
 0x123   : > { %v1742_v5 = vrot.slane %v6131_v48, 1  ;;  %v1741_v41 = vrot.slane %v6135_v1, 1  ;;  %v1767_v16 = vsel %vm8314_vm5, %v1739_v3, %v1740_v26  ;;  %v8315_v24 = vrot.slane %v5985_v31, 1  ;;  %vm8316_vm10 = vmmov %vm8314_vm5 }
 0x124   : > { %v1826_v25 = vpack.c.bf16 %v1801_v7, %v1800_v13  ;;  %vm8317_vm14 = vcmp.lt.s32.totalorder %v5248_v2, 1  ;;  %v1674_v12 = vrot.slane %v5985_v31, 7  ;;  %vm8318_vm15 = vmmov %vm8314_vm5  ;;  %v535_v20 = vadd.s32 %v5458_v28, %v502_v17 }
 0x125   : > { %v1768_v21 = vsel %vm8316_vm10, %v8315_v24, %v1739_v3  ;;  %v1706_v59 = vsel %vm8317_vm14, %v1672_v56, %v1673_v34  ;;  %v1153_v45 = vpop.permute.xlu1 %1152  ;;  %v1148_v46 = vpop.permute.xlu0 %1147  ;;  %v1765_v38 = vsel %vm8318_vm15, %v1741_v41, %v1742_v5  ;;  %v1766_v11 = vsel %vm8314_vm5, %v1740_v26, %v1741_v41  ;;  %4592 = vmatmul.mubr.bf16.gmra.mrb[8].mxu0 %v1825_v54  ;;  %vm8319_vm10 = vmmov %vm8317_vm14 }
 0x126   : > { %v1844_v8 = vpack.c.bf16 %v1767_v16, %v1768_v21  ;;  %v1845_v57 = vpack.c.bf16 %v1765_v38, %v1766_v11  ;;  %v1707_v27 = vsel %vm8319_vm10, %v1671_v22, %v1672_v56  ;;  %4595 = vmatprep.mubr.bf16.mxu0 %v1826_v25  ;;  %vm8320_vm14 = vmmov %vm8319_vm10  ;;  %v534_v26 = vadd.s32 %v5458_v28, %v501_v61 }
 0x127   : > { %v1704_v3 = vsel %vm8320_vm14, %v1674_v12, %v1675_v33  ;;  %v537_v30 = vadd.s32 %v5458_v28, %v504_v40  ;;  %v1220_v7 = vmul.f32 %v5483_v50, %v1143_v49  ;;  %v1024_v22 = vmul.f32 %v5473_v39, %v947_v32  ;;  %v5061_v40 = vld [vmem:[%s8061_s7 + $0x10] sm:$0xff]  }
 0x128   : > { %4551 = vmatprep.mubr.bf16.mxu1 %v1844_v8  ;;  %vm8321_vm15 = vcmp.lt.s32.totalorder %v5503_v60, 64  ;;  %v503_v17 = vadd.s32 184, %v5248_v2  ;;  %v1677_v54 = vrot.slane %v6135_v1, 7  ;;  %v1221_v41 = vmul.f32 %v5483_v50, %v1148_v46 }
 0x129   : > { %4552 = vmatmul.mubr.bf16.vlgmr.msra.gmra.mrb[0].mxu1 %v1845_v57  ;;  %v1803_v56 = vsel %vm8321_vm15, %v1706_v59, %v5965_v9  ;;  %v1158_v13 = vpop.permute.xlu1 %1157  ;;  %v962_v16 = vpop.permute.xlu0 %961  ;;  %vm8322_vm5 = vmmov %vm8321_vm15  ;;  %v1705_v49 = vsel %vm8319_vm10, %v1673_v34, %v1674_v12  ;;  %v4231_v32 = vadd.s32 4294967292, %v535_v20  ;;  %v1676_v24 = vrot.slane %v6090_v58, 7 }
 0x12a   : > { %v1802_v61 = vsel %vm8322_vm5, %v1707_v27, %v5958_v36  ;;  %4616 = vmatpush3.bf16.msra.mxu1 %v5871_v44  ;;  %vm8323_vm14 = vmmov %vm8322_vm5  ;;  %v1025_v21 = vmul.f32 %v5473_v39, %v952_v18  ;;  %v4230_v36 = vadd.s32 4294967292, %v534_v26  ;;  %v6195_v25 = vadd.s32 4294967292, %v537_v30 }
 0x12b   : > { %v1805_v9 = vsel %vm8323_vm14, %v1704_v3, %v6094_v43  ;;  %4617 = vmatprep.subr.bf16.mxu1 %v5060_v62  ;;  %v1252_v34 = vadd.f32 %v1220_v7, %v1024_v22  ;;  %v1827_v59 = vpack.c.bf16 %v1803_v56, %v1802_v61  ;;  %vm8324_vm15 = vmmov %vm8322_vm5  ;;  %v536_v12 = vadd.s32 %v5458_v28, %v503_v17  ;;  %v5062_v3 = vld [vmem:[%s8061_s7 + $0x18] sm:$0xff]  }
 0x12c   : > { %v1804_v44 = vsel %vm8324_vm15, %v1705_v49, %v5985_v31  ;;  %v1253_v8 = vadd.f32 %v1221_v41, %v1025_v21  ;;  %v1223_v46 = vmul.f32 %v5483_v50, %v1158_v13  ;;  %vm8325_vm5 = vmmov %vm8319_vm10  ;;  %v1027_v27 = vmul.f32 %v5473_v39, %v962_v16  ;;  %v5063_v49 = vld [vmem:[%s8061_s7 + $0x20] sm:$0xff]  }
 0x12d   : > { %v1376_v38 = vpop.permute.xlu1 %1375  ;;  %v1828_v11 = vpack.c.bf16 %v1805_v9, %v1804_v44  ;;  %v1371_v57 = vpop.permute.xlu0 %1370  ;;  %v1702_v18 = vsel %vm8325_vm5, %v1676_v24, %v1677_v54  ;;  %4596 = vmatmul.mubr.bf16.gmra.mrb[12].mxu0 %v1827_v59  ;;  %v1222_v26 = vmul.f32 %v5483_v50, %v1153_v45  ;;  %vm631_vm14 = vcmp.lt.s32.totalorder %v4231_v32, 600  ;;  %vm8326_vm10 = vmmov %vm8325_vm5 }
 0x12e   : > { %4618 = vmatpush3.bf16.msra.mxu1 %v5060_v62  ;;  %v1449_v31 = vmul.f32 %v5493_v23, %v1376_v38  ;;  %v1448_v20 = vmul.f32 %v5493_v23, %v1371_v57  ;;  %v1703_v7 = vsel %vm8326_vm10, %v1675_v33, %v1676_v24  ;;  %v1026_v22 = vmul.f32 %v5473_v39, %v6122_v52  ;;  %v6233_v52 = vld [vmem:[%s8056_s2] ss:$0 sm:$0xff] }
 0x12f   : > { %4619 = vmatprep.subr.bf16.mxu1 %v5061_v40  ;;  %4599 = vmatprep.mubr.bf16.mxu0 %v1828_v11  ;;  %v4232_v45 = vadd.s32 4294967292, %v536_v12  ;;  %v1807_v17 = vsel %vm8324_vm15, %v1702_v18, %v6135_v1  ;;  %v1255_v41 = vadd.f32 %v1223_v46, %v1027_v27  ;;  %vm8327_vm0 = vcmp.ge.s32.totalorder %v4231_v32, 0 }
 0x130   : > { %v1481_v62 = vadd.f32 %v1449_v31, %v1253_v8  ;;  %v1480_v30 = vadd.f32 %v1448_v20, %v1252_v34  ;;  %vm6226_vm5 = vmand %vm8327_vm0, %vm631_vm14  ;;  %v8328_v43 = vmov 0  ;;  %v1678_v32 = vrot.slane %v6131_v48, 7 }
 0x131   : > { %v1386_v56 = vpop.permute.xlu1 %1385  ;;  %v8329_v43 = vsel %vm6226_vm5, 4294967295, %v8328_v43  ;;  %v1254_v9 = vadd.f32 %v1222_v26, %v1026_v22  ;;  %vm8331_vm0 = vcmp.lt.s32.totalorder %v4230_v36, 600  ;;  %vm8332_vm10 = vcmp.ge.s32.totalorder %v4230_v36, 0 }
 0x132   : > { %4620 = vmatpush3.bf16.msra.mxu1 %v5061_v40  ;;  %8330 = vst [vmem:[#allocation25_spill] sm:$0xff] %v8329_v43  ;;  %v1520_v33 = vadd.f32 %v6233_v52, %v1481_v62  ;;  %v1519_v13 = vadd.f32 %v6233_v52, %v1480_v30  ;;  %v1451_v16 = vmul.f32 %v5493_v23, %v1386_v56  ;;  %v1381_v61 = vpop.permute.xlu0 %1380  ;;  %vm6244_vm14 = vmand %vm8332_vm10, %vm8331_vm0  ;;  %v8333_v40 = vmov 0 }
 0x133   : > { %4621 = vmatprep.subr.bf16.mxu1 %v5062_v3  ;;  %v8334_v40 = vsel %vm6244_vm14, 4294967295, %v8333_v40  ;;  %v1450_v24 = vmul.f32 %v5493_v23, %v1381_v61  ;;  %v1806_v21 = vsel %vm8324_vm15, %v1703_v7, %v6090_v58  ;;  %vm632_vm0 = vcmp.lt.s32.totalorder %v4232_v45, 600  ;;  %v5064_v58 = vld [vmem:[%s8061_s7 + $0x28] sm:$0xff]  }
 0x134   : > { %8335 = vst [vmem:[#allocation26_spill] sm:$0xff] %v8334_v40  ;;  %v1552_v34 = vmax.f32 %v1520_v33, 0.0  ;;  %v1551_v59 = vmax.f32 %v1519_v13, 0.0  ;;  %v1483_v44 = vadd.f32 %v1451_v16, %v1255_v41  ;;  %v1829_v12 = vpack.c.bf16 %v1807_v17, %v1806_v21 }
 0x135   : > { %v1482_v8 = vadd.f32 %v1450_v24, %v1254_v9  ;;  %v1163_v46 = vpop.permute.xlu1 %1162  ;;  %vm8336_vm10 = vcmp.lt.s32.totalorder %v6195_v25, 600  ;;  %vm8337_vm15 = vcmp.ge.s32.totalorder %v6195_v25, 0  ;;  %v8338_v20 = vmov 0 }
 0x136   : > { %4622 = vmatpush3.bf16.msra.mxu1 %v5062_v3  ;;  %v1648_v36 = vsel %vm6226_vm5, %v1552_v34, 0.0  ;;  %v1647_v38 = vsel %vm6244_vm14, %v1551_v59, 0.0  ;;  %v1522_v11 = vadd.f32 %v6233_v52, %v1483_v44  ;;  %4600 = vmatmul.mubr.bf16.gmra.mrb[16].mxu0 %v1829_v12  ;;  %v967_v57 = vpop.permute.xlu0 %966  ;;  %vm6264_vm9 = vmand %vm8337_vm15, %vm8336_vm10  ;;  %v506_v3 = vadd.s32 208, %v5248_v2 }
 0x137   : > { %4623 = vmatprep.subr.bf16.mxu1 %v5063_v49  ;;  %v1744_v18 = vrot.slane %v1648_v36, 1  ;;  %v1679_v27 = vrot.slane %v1647_v38, 7  ;;  %v1743_v31 = vrot.slane %v1647_v38, 1  ;;  %v8339_v20 = vsel %vm6264_vm9, 4294967295, %v8338_v20 }
 0x138   : > { %8340 = vst [vmem:[#allocation27_spill] sm:$0xff] %v8339_v20  ;;  %v1554_v26 = vmax.f32 %v1522_v11, 0.0  ;;  %v1521_v62 = vadd.f32 %v6233_v52, %v1482_v8  ;;  %vm8341_vm14 = vcmp.lt.s32.totalorder %v5248_v2, 1  ;;  %v1680_v7 = vrot.slane %v1648_v36, 7 }
 0x139   : > { %v1701_v30 = vsel %vm8341_vm14, %v1677_v54, %v1678_v32  ;;  %vm8342_vm5 = vcmp.ge.s32.totalorder %v4232_v45, 0  ;;  %v8343_v22 = vmov 0  ;;  %v6279_v25 = vpop.permute.xlu1 %976  ;;  %vm8346_vm10 = vcmp.lt.s32.totalorder %v5248_v2, 7  ;;  %vm8348_vm1 = vmmov %vm8341_vm14 }
 0x13a   : > { %vm6275_vm6 = vmand %vm8342_vm5, %vm632_vm0  ;;  %v1763_v56 = vsel %vm8346_vm10, %v1743_v31, %v1744_v18  ;;  %v1700_v1 = vsel %vm8348_vm1, %v1678_v32, %v1679_v27  ;;  %4624 = vmatpush3.bf16.msra.mxu1 %v5063_v49  ;;  %v6291_v54 = vsel %vm6264_vm9, %v1554_v26, 0.0  ;;  %v1553_v45 = vmax.f32 %v1521_v62, 0.0  ;;  %v972_v41 = vpop.permute.xlu0 %971 }
 0x13b   : > { %v8344_v22 = vsel %vm6275_vm6, 4294967295, %v8343_v22  ;;  %vm8347_vm15 = vmmov %vm8346_vm10  ;;  %4625 = vmatprep.subr.bf16.mxu1 %v5064_v58  ;;  %v1746_v33 = vrot.slane %v6291_v54, 1  ;;  %v539_v16 = vadd.s32 %v5458_v28, %v506_v3  ;;  %v505_v61 = vadd.s32 200, %v5248_v2 }
 0x13c   : > { %8345 = vst [vmem:[#allocation28_spill] sm:$0xff] %v8344_v22  ;;  %v1764_v17 = vsel %vm8347_vm15, %v1742_v5, %v1743_v31  ;;  %v6298_v5 = vsel %vm6275_vm6, %v1553_v45, 0.0  ;;  %vm8349_vm1 = vcmp.lt.s32.totalorder %v5503_v60, 64  ;;  %v508_v9 = vadd.s32 224, %v5248_v2  ;;  %vm8351_vm0 = vmmov %vm8346_vm10 }
 0x13d   : > { %v1846_v13 = vpack.c.bf16 %v1763_v56, %v1764_v17  ;;  %v1808_v49 = vsel %vm8349_vm1, %v1701_v30, %v6131_v48  ;;  %vm8350_vm5 = vmmov %vm8349_vm1  ;;  %v1681_v24 = vrot.slane %v6298_v5, 7  ;;  %v1745_v21 = vrot.slane %v6298_v5, 1  ;;  %v1173_v34 = vpop.permute.xlu1 %1172 }
 0x13e   : > { %v1809_v32 = vsel %vm8350_vm5, %v1700_v1, %v1647_v38  ;;  %v1699_v44 = vsel %vm8341_vm14, %v1679_v27, %v1680_v7  ;;  %4626 = vmatpush3.bf16.msra.mxu1 %v5064_v58  ;;  %v1168_v12 = vpop.permute.xlu0 %1167  ;;  %vm8352_vm10 = vmmov %vm8351_vm0  ;;  %v538_v11 = vadd.s32 %v5458_v28, %v505_v61  ;;  %v507_v3 = vadd.s32 216, %v5248_v2 }
 0x13f   : > { %4555 = vmatprep.mubr.bf16.mxu1 %v1846_v13  ;;  %v1830_v59 = vpack.c.bf16 %v1809_v32, %v1808_v49  ;;  %v1761_v48 = vsel %vm8351_vm0, %v1745_v21, %v1746_v33  ;;  %v1762_v8 = vsel %vm8352_vm10, %v1744_v18, %v1745_v21  ;;  %vm8353_vm15 = vmmov %vm8341_vm14  ;;  %v1810_v58 = vsel %vm8349_vm1, %v1699_v44, %v1648_v36 }
 0x140   : > { %v1698_v38 = vsel %vm8353_vm15, %v1680_v7, %v1681_v24  ;;  %v1847_v31 = vpack.c.bf16 %v1761_v48, %v1762_v8  ;;  %vm8354_vm5 = vmmov %vm8349_vm1  ;;  %v4235_v18 = vadd.s32 4294967292, %v539_v16  ;;  %v541_v30 = vadd.s32 %v5458_v28, %v508_v9 }
 0x141   : > { %4603 = vmatprep.mubr.bf16.mxu0 %v1830_v59  ;;  %v1811_v27 = vsel %vm8354_vm5, %v1698_v38, %v6298_v5  ;;  %v1178_v26 = vpop.permute.xlu1 %1177  ;;  %v1225_v56 = vmul.f32 %v5483_v50, %v1168_v12  ;;  %v1224_v17 = vmul.f32 %v5483_v50, %v1163_v46  ;;  %v1028_v1 = vmul.f32 %v5473_v39, %v967_v57 }
 0x142   : > { %v1831_v62 = vpack.c.bf16 %v1811_v27, %v1810_v58  ;;  %4556 = vmatmul.mubr.bf16.gmra.mrb[4].mxu1 %v1847_v31  ;;  %v982_v7 = vpop.permute.xlu0 %981  ;;  %v4234_v36 = vadd.s32 4294967292, %v538_v11  ;;  %v1029_v45 = vmul.f32 %v5473_v39, %v972_v41  ;;  %v540_v13 = vadd.s32 %v5458_v28, %v507_v3 }
 0x143   : > { %v510_v61 = vadd.s32 240, %v5248_v2  ;;  %vm603_vm14 = vcmp.ge.s32.totalorder %v4235_v18, 0  ;;  %vm635_vm0 = vcmp.lt.s32.totalorder %v4235_v18, 600  ;;  %v4237_v49 = vadd.s32 4294967292, %v541_v30 }
 0x144   : > { %4604 = vmatmul.mubr.bf16.gmra.mrb[20].mxu0 %v1831_v62  ;;  %v1257_v32 = vadd.f32 %v1225_v56, %v1029_v45  ;;  %v1227_v9 = vmul.f32 %v5483_v50, %v1178_v26  ;;  %v1031_v21 = vmul.f32 %v5473_v39, %v982_v7  ;;  %v1256_v59 = vadd.f32 %v1224_v17, %v1028_v1  ;;  %vm6348_vm5 = vmand %vm603_vm14, %vm635_vm0 }
 0x145   : > { %v1396_v16 = vpop.permute.xlu1 %1395  ;;  %v1226_v44 = vmul.f32 %v5483_v50, %v1173_v34  ;;  %vm602_vm10 = vcmp.ge.s32.totalorder %v4234_v36, 0  ;;  %vm634_vm15 = vcmp.lt.s32.totalorder %v4234_v36, 600  ;;  %v4236_v48 = vadd.s32 4294967292, %v540_v13 }
 0x146   : > { %v1453_v46 = vmul.f32 %v5493_v23, %v1396_v16  ;;  %v1391_v57 = vpop.permute.xlu0 %1390  ;;  %v543_v8 = vadd.s32 %v5458_v28, %v510_v61  ;;  %v1030_v38 = vmul.f32 %v5473_v39, %v6279_v25  ;;  %v509_v58 = vadd.s32 232, %v5248_v2  ;;  %vm6356_vm9 = vmand %vm602_vm10, %vm634_vm15 }
 0x147   : > { %v1452_v41 = vmul.f32 %v5493_v23, %v1391_v57  ;;  %v1682_v27 = vrot.slane %v6291_v54, 7  ;;  %v1259_v3 = vadd.f32 %v1227_v9, %v1031_v21  ;;  %v8355_v56 = vmov 0 }
 0x148   : > { %v1485_v12 = vadd.f32 %v1453_v46, %v1257_v32  ;;  %v1258_v30 = vadd.f32 %v1226_v44, %v1030_v38  ;;  %v8356_v56 = vsel %vm6348_vm5, 4294967295, %v8355_v56  ;;  %vm637_vm1 = vcmp.lt.s32.totalorder %v4237_v49, 600 }
 0x149   : > { %v1484_v11 = vadd.f32 %v1452_v41, %v1256_v59  ;;  %v1406_v31 = vpop.permute.xlu1 %1405  ;;  %8357 = vst [vmem:[#allocation29_spill] sm:$0xff] %v8356_v56  ;;  %v8358_v1 = vmov 0  ;;  %vm604_vm6 = vcmp.ge.s32.totalorder %v4236_v48, 0  ;;  %v6360_v13 = vadd.s32 4294967292, %v543_v8 }
 0x14a   : > { %v1524_v34 = vadd.f32 %v6233_v52, %v1485_v12  ;;  %v1455_v26 = vmul.f32 %v5493_v23, %v1406_v31  ;;  %v1401_v62 = vpop.permute.xlu0 %1400  ;;  %v8359_v1 = vsel %vm6356_vm9, 4294967295, %v8358_v1  ;;  %vm636_vm14 = vcmp.lt.s32.totalorder %v4236_v48, 600 }
 0x14b   : > { %v1523_v25 = vadd.f32 %v6233_v52, %v1484_v11  ;;  %v1454_v7 = vmul.f32 %v5493_v23, %v1401_v62  ;;  %8360 = vst [vmem:[#allocation30_spill] sm:$0xff] %v8359_v1  ;;  %v542_v32 = vadd.s32 %v5458_v28, %v509_v58  ;;  %vm8361_vm0 = vcmp.lt.s32.totalorder %v5248_v2, 1 }
 0x14c   : > { %v1556_v17 = vmax.f32 %v1524_v34, 0.0  ;;  %v1487_v45 = vadd.f32 %v1455_v26, %v1259_v3  ;;  %v1697_v46 = vsel %vm8361_vm0, %v1681_v24, %v1682_v27  ;;  %vm8362_vm10 = vcmp.ge.s32.totalorder %v4237_v49, 0 }
 0x14d   : > { %v1555_v18 = vmax.f32 %v1523_v25, 0.0  ;;  %v1486_v61 = vadd.f32 %v1454_v7, %v1258_v30  ;;  %v1183_v16 = vpop.permute.xlu1 %1182  ;;  %vm6374_vm15 = vmand %vm8362_vm10, %vm637_vm1  ;;  %v8363_v44 = vmov 0  ;;  %v8365_v5 = vmov 0 }
 0x14e   : > { %v1652_v9 = vsel %vm6348_vm5, %v1556_v17, 0.0  ;;  %v1526_v21 = vadd.f32 %v6233_v52, %v1487_v45  ;;  %v987_v36 = vpop.permute.xlu0 %986  ;;  %v8364_v44 = vsel %vm6374_vm15, 4294967295, %v8363_v44  ;;  %vm6381_vm5 = vmand %vm604_vm6, %vm636_vm14  ;;  %vm8368_vm1 = vcmp.lt.s32.totalorder %v5503_v60, 64 }
 0x14f   : > { %v1748_v57 = vrot.slane %v1652_v9, 1  ;;  %v1651_v59 = vsel %vm6356_vm9, %v1555_v18, 0.0  ;;  %v1525_v28 = vadd.f32 %v6233_v52, %v1486_v61  ;;  %v8366_v5 = vsel %vm6381_vm5, 4294967295, %v8365_v5  ;;  %vm8371_vm10 = vmmov %vm8361_vm0 }
 0x150   : > { %v1683_v41 = vrot.slane %v1651_v59, 7  ;;  %v1747_v12 = vrot.slane %v1651_v59, 1  ;;  %v1558_v8 = vmax.f32 %v1526_v21, 0.0  ;;  %8367 = vst [vmem:[#allocation31_spill] sm:$0xff] %v8366_v5  ;;  %v1684_v24 = vrot.slane %v1652_v9, 7 }
 0x151   : > { %v1557_v38 = vmax.f32 %v1525_v28, 0.0  ;;  %v1188_v49 = vpop.permute.xlu1 %1187  ;;  %v1812_v11 = vsel %vm8368_vm1, %v1697_v46, %v6291_v54  ;;  %v4238_v31 = vadd.s32 4294967292, %v542_v32  ;;  %v1228_v48 = vmul.f32 %v5483_v50, %v1183_v16 }
 0x152   : > { %v6391_v58 = vsel %vm6374_vm15, %v1558_v8, 0.0  ;;  %v1229_v3 = vmul.f32 %v5483_v50, %v1188_v49  ;;  %v992_v34 = vpop.permute.xlu0 %991  ;;  %vm8369_vm6 = vcmp.lt.s32.totalorder %v5248_v2, 7  ;;  %v1032_v25 = vmul.f32 %v5473_v39, %v987_v36 }
 0x153   : > { %v1759_v26 = vsel %vm8369_vm6, %v1747_v12, %v1748_v57  ;;  %v1750_v62 = vrot.slane %v6391_v58, 1  ;;  %v1653_v30 = vsel %vm6381_vm5, %v1557_v38, 0.0  ;;  %v1033_v7 = vmul.f32 %v5473_v39, %v992_v34  ;;  %vm8370_vm14 = vmmov %vm8369_vm6 }
 0x154   : > { %v1685_v17 = vrot.slane %v1653_v30, 7  ;;  %v1749_v45 = vrot.slane %v1653_v30, 1  ;;  %v1760_v50 = vsel %vm8370_vm14, %v1746_v33, %v1747_v12  ;;  %v1696_v18 = vsel %vm8371_vm10, %v1682_v27, %v1683_v41  ;;  %vm8372_vm6 = vmmov %vm8361_vm0 }
 0x155   : > { %v1261_v61 = vadd.f32 %v1229_v3, %v1033_v7  ;;  %v1848_v16 = vpack.c.bf16 %v1759_v26, %v1760_v50  ;;  %v1416_v32 = vpop.permute.xlu1 %1415  ;;  %v1813_v21 = vsel %vm8368_vm1, %v1696_v18, %v1651_v59  ;;  %v1695_v36 = vsel %vm8372_vm6, %v1683_v41, %v1684_v24  ;;  %vm8373_vm0 = vmmov %vm8370_vm14 }
 0x156   : > { %v1457_v39 = vmul.f32 %v5493_v23, %v1416_v32  ;;  %v1832_v46 = vpack.c.bf16 %v1813_v21, %v1812_v11  ;;  %v1411_v28 = vpop.permute.xlu0 %1410  ;;  %v1757_v54 = vsel %vm8373_vm0, %v1749_v45, %v1750_v62  ;;  %vm8374_vm14 = vmmov %vm8373_vm0  ;;  %v1260_v27 = vadd.f32 %v1228_v48, %v1032_v25 }
 0x157   : > { %v1758_v33 = vsel %vm8374_vm14, %v1748_v57, %v1749_v45  ;;  %4559 = vmatprep.mubr.bf16.mxu1 %v1848_v16  ;;  %v1456_v12 = vmul.f32 %v5493_v23, %v1411_v28  ;;  %vm8375_vm10 = vmmov %vm8372_vm6  ;;  %vm639_vm1 = vcmp.lt.s32.totalorder %v6360_v13, 600  ;;  %vm8376_vm6 = vcmp.lt.s32.totalorder %v5503_v60, 64 }
 0x158   : > { %v1849_v8 = vpack.c.bf16 %v1757_v54, %v1758_v33  ;;  %v1694_v59 = vsel %vm8375_vm10, %v1684_v24, %v1685_v17  ;;  %v1489_v41 = vadd.f32 %v1457_v39, %v1261_v61  ;;  %4607 = vmatprep.mubr.bf16.mxu0 %v1832_v46  ;;  %v1814_v38 = vsel %vm8376_vm6, %v1695_v36, %v1652_v9  ;;  %vm8377_vm0 = vmmov %vm8376_vm6 }
 0x159   : > { %v1815_v49 = vsel %vm8377_vm0, %v1694_v59, %v1653_v30  ;;  %vm606_vm15 = vcmp.ge.s32.totalorder %v4238_v31, 0  ;;  %vm638_vm14 = vcmp.lt.s32.totalorder %v4238_v31, 600  ;;  %v1488_v57 = vadd.f32 %v1456_v12, %v1260_v27  ;;  %v5066_v59 = vld [vmem:[%s8061_s7 + $0x38] sm:$0xff]  }
 0x15a   : > { %4560 = vmatmul.mubr.bf16.gmra.mrb[8].mxu1 %v1849_v8  ;;  %v1833_v11 = vpack.c.bf16 %v1815_v49, %v1814_v38  ;;  %v1686_v23 = vrot.slane %v6391_v58, 7  ;;  %v1528_v48 = vadd.f32 %v6233_v52, %v1489_v41  ;;  %vm8378_vm10 = vcmp.ge.s32.totalorder %v6360_v13, 0  ;;  %vm6434_vm6 = vmand %vm606_vm15, %vm638_vm14  ;;  %v5065_v8 = vld [vmem:[%s8061_s7 + $0x30] sm:$0xff]   ;;  %v6485_v41 = vld [vmem:[%s8059_s5] ss:$0 sm:$0xff] }
 0x15b   : > { %vm6429_vm9 = vmand %vm8378_vm10, %vm639_vm1  ;;  %v1527_v9 = vadd.f32 %v6233_v52, %v1488_v57  ;;  %v8381_v34 = vmov 0  ;;  %v1753_v26 = vrot.slane %v6008_v14, 1  ;;  %vm8383_vm0 = vcmp.lt.s32.totalorder %v5248_v2, 1  ;;  %4627 = vmatprep.subr.bf16.mxu1 %v5065_v8 }
 0x15c   : > { %4608 = vmatmul.mubr.bf16.gmra.mrb[24].mxu0 %v1833_v11  ;;  %v1560_v3 = vmax.f32 %v1528_v48, 0.0  ;;  %v8382_v34 = vsel %vm6434_vm6, 4294967295, %v8381_v34  ;;  %v1693_v13 = vsel %vm8383_vm0, %v1685_v17, %v1686_v23  ;;  %vm8384_vm15 = vcmp.lt.s32.totalorder %v5248_v2, 7  ;;  %vm8389_vm10 = vmmov %vm8383_vm0  ;;  %4628 = vmatpush3.bf16.msra.mxu1 %v5065_v8 }
 0x15d   : > { %v1559_v31 = vmax.f32 %v1527_v9, 0.0  ;;  %v8385_v61 = vrot.slane %v5586_v63, 1  ;;  %vm8386_vm1 = vmmov %vm8384_vm15  ;;  %vm8387_vm14 = vcmp.lt.s32.totalorder %v5503_v60, 64  ;;  %v8388_v17 = vrot.slane %v6008_v14, 7  ;;  %4629 = vmatprep.subr.bf16.mxu1 %v5066_v59 }
 0x15e   : > { %v1656_v30 = vsel %vm6429_vm9, %v1560_v3, 0.0  ;;  %v1816_v32 = vsel %vm8387_vm14, %v1693_v13, %v6391_v58  ;;  %vm8390_vm0 = vmmov %vm8386_vm1 }
 0x15f   : > { %v1688_v25 = vrot.slane %v1656_v30, 7  ;;  %v1752_v7 = vrot.slane %v1656_v30, 1  ;;  %v1655_v52 = vsel %vm6434_vm6, %v1559_v31, 0.0  ;;  %v1785_v16 = vsel %vm8386_vm1, %v1753_v26, %v8385_v61  ;;  %vm8391_vm6 = vmmov %vm8390_vm0 }
 0x160   : > { %v1687_v45 = vrot.slane %v1655_v52, 7  ;;  %v1751_v50 = vrot.slane %v1655_v52, 1  ;;  %vm8393_vm1 = vmmov %vm8387_vm14  ;;  %4630 = vmatpush3.bf16.msra.mxu1 %v5066_v59 }
 0x161   : > { %v1754_v18 = vsel %vm8384_vm15, %v1752_v7, %v1753_v26  ;;  %v1690_v21 = vsel %vm8389_vm10, %v1688_v25, %v8388_v17  ;;  %vm8392_vm15 = vmmov %vm8389_vm10 }
 0x162   : > { %v1755_v36 = vsel %vm8390_vm0, %v1751_v50, %v1752_v7  ;;  %v1756_v39 = vsel %vm8391_vm6, %v1750_v62, %v1751_v50  ;;  %v1851_v46 = vpack.c.bf16 %v1785_v16, %v1754_v18  ;;  %v1692_v63 = vsel %vm8392_vm15, %v1686_v23, %v1687_v45  ;;  %vm8394_vm14 = vmmov %vm8389_vm10 }
 0x163   : > { %v1850_v28 = vpack.c.bf16 %v1755_v36, %v1756_v39  ;;  %v1817_v54 = vsel %vm8393_vm1, %v1692_v63, %v1655_v52  ;;  %v1691_v58 = vsel %vm8394_vm14, %v1687_v45, %v1688_v25  ;;  %vm8395_vm10 = vmmov %vm8393_vm1 }
 0x164   : > { %v1819_v33 = vsel %vm8395_vm10, %v1690_v21, %v6008_v14  ;;  %v1834_v27 = vpack.c.bf16 %v1817_v54, %v1816_v32  ;;  %vm8396_vm0 = vmmov %vm8393_vm1  ;;  %v5067_v14 = vld [vmem:[%s8060_s6] sm:$0xff]   ;;  %v5068_v54 = vld [vmem:[%s8060_s6 + $0x8] sm:$0xff]  }
 0x165   : > { %v1818_v12 = vsel %vm8396_vm0, %v1691_v58, %v1656_v30  ;;  %4563 = vmatprep.mubr.bf16.mxu1 %v1850_v28  ;;  %4663 = vmatprep.subr.bf16.mxu1 %v5067_v14  ;;  %vm4267_vm6 = vmpackc.low %vm5560_vm11, %vm5548_vm8 }
 0x166   : > { %v1835_v62 = vpack.c.bf16 %v1819_v33, %v1818_v12  ;;  %4564 = vmatmul.mubr.bf16.gmra.mrb[12].mxu1 %v1851_v46  ;;  %4611 = vmatprep.mubr.bf16.mxu0 %v1834_v27  ;;  %vm4270_vm15 = vmpackc.low %vm5571_vm12, %vm5590_vm13 }
 0x167   : > { %vm8397_vm1 = vmmov %vm8394_vm14  ;;  %vm8398_vm14 = vcmp.lt.s32.totalorder %v5248_v2, 7 }
 0x168   : > { %4612 = vmatmul.mubr.bf16.gmra.mrb[28].mxu0 %v1835_v62  ;;  %vm8400_vm10 = vmmov %vm8397_vm1 }
 0x169   : > { %vm8401_vm0 = vmmov %vm8397_vm1 }
 0x1e7   : > { %v4585_v38 = vpop.f32.mrb[0].mxu0 }
 0x1e8   : > { %v2311_v49 = vadd.f32 %v4585_v38, %v6485_v41  ;;  %v2175_v57 = vpop.f32.mrb[1].mxu0 }
 0x1e9   : > { %v2309_v11 = vadd.f32 %v6485_v41, %v2175_v57  ;;  %v4586_v23 = vpop.f32.mrb[2].mxu0 }
 0x1ea   : > { %v2343_v48 = vmax.f32 %v2311_v49, 0.0  ;;  %v2312_v9 = vadd.f32 %v4586_v23, %v6485_v41  ;;  %v2178_v3 = vpop.f32.mrb[3].mxu0 }
 0x1eb   : > { %v2341_v31 = vmax.f32 %v2309_v11, 0.0  ;;  %v2310_v26 = vadd.f32 %v6485_v41, %v2178_v3 }
 0x1ec   : > { %v2375_v30 = vsel %vm5590_vm13, %v2343_v48, 0.0  ;;  %v2344_v13 = vmax.f32 %v2312_v9, 0.0 }
 0x1ed   : > { %v6495_v25 = vsel %vm5548_vm8, %v2341_v31, 0.0  ;;  %v2342_v7 = vmax.f32 %v2310_v26, 0.0  ;;  %v2407_v52 = vrot.slane %v2375_v30, 7  ;;  %v2471_v45 = vrot.slane %v2375_v30, 1  ;;  %v5069_v26 = vld [vmem:[%s8060_s6 + $0x10] sm:$0xff]  }
 0x1ee   : > { %v6499_v50 = vsel %vm5571_vm12, %v2344_v13, 0.0  ;;  %v4271_v18 = vpack.c.bf16 %v2344_v13, %v2343_v48  ;;  %v8137_v36 = vrot.slane %v6495_v25, 7  ;;  %v8136_v58 = vrot.slane %v6495_v25, 1 }
 0x1ef   : > { %v2408_v61 = vrot.slane %v6499_v50, 7  ;;  %v2472_v16 = vrot.slane %v6499_v50, 1  ;;  %v2374_v32 = vsel %vm5560_vm11, %v2342_v7, 0.0  ;;  %v4268_v17 = vpack.c.bf16 %v2342_v7, %v2341_v31 }
 0x1f0   : > { %v4589_v21 = vpop.f32.mrb[4].mxu0  ;;  %v2406_v39 = vrot.slane %v2374_v32, 7  ;;  %v2470_v46 = vrot.slane %v2374_v32, 1 }
 0x1f1   : > { %v2315_v63 = vadd.f32 %v4589_v21, %v6485_v41  ;;  %v2191_v28 = vpop.f32.mrb[5].mxu0  ;;  %v6523_v33 = vsel %vm8397_vm1, %v2407_v52, %v2408_v61  ;;  %v6527_v27 = vsel %vm8398_vm14, %v2471_v45, %v2472_v16  ;;  %4631 = vmatprep.mubr.msk.bf16.mxu1 %vm4267_vm6, %v4268_v17  ;;  %vm8402_vm6 = vmmov %vm8398_vm14  ;;  %vm8404_vm1 = vnez %v8228_v42 }
 0x1f2   : > { %8399 = vst [vmem:[#allocation32_spill] sm:$0xff] %v6527_v27  ;;  %v2313_v12 = vadd.f32 %v6485_v41, %v2191_v28  ;;  %v4590_v62 = vpop.f32.mrb[6].mxu0  ;;  %v6537_v8 = vsel %vm8400_vm10, %v2406_v39, %v2407_v52  ;;  %4632 = vmatmul.mubr.msk.bf16.vlgmr.msra.gmra.mrb[16].mxu1 %vm4270_vm15, %v4271_v18  ;;  %v6549_v57 = vsel %vm8401_vm0, %v8137_v36, %v2406_v39  ;;  %vm8403_vm15 = vmmov %vm8402_vm6 }
 0x1f3   : > { %v2347_v59 = vmax.f32 %v2315_v63, 0.0  ;;  %v2316_v38 = vadd.f32 %v4590_v62, %v6485_v41  ;;  %v2194_v49 = vpop.f32.mrb[7].mxu0  ;;  %4664 = vmatpush3.bf16.msra.mxu1 %v5067_v14  ;;  %v6556_v9 = vsel %vm8402_vm6, %v2470_v46, %v2471_v45  ;;  %v6569_v30 = vsel %vm8403_vm15, %v8136_v58, %v2470_v46  ;;  %vm4273_vm14 = vmpackc.low %vm8404_vm1, %vm5614_vm3 }
 0x1f4   : > { %v2345_v23 = vmax.f32 %v2313_v12, 0.0  ;;  %v2314_v48 = vadd.f32 %v6485_v41, %v2194_v49  ;;  %4665 = vmatprep.subr.bf16.mxu1 %v5068_v54  ;;  %vm4276_vm10 = vmpackc.low %vm5734_vm2, %vm5742_vm4 }
 0x1f5   : > { %v6560_v3 = vsel %vm5742_vm4, %v2347_v59, 0.0  ;;  %v2348_v31 = vmax.f32 %v2316_v38, 0.0  ;;  %vm8405_vm0 = vmmov %vm8402_vm6  ;;  %vm8407_vm6 = vcmp.lt.s32.totalorder %v5248_v2, 1 }
 0x1f6   : > { %v2411_v14 = vrot.slane %v6560_v3, 7  ;;  %v8141_v13 = vrot.slane %v6560_v3, 1  ;;  %v6575_v7 = vsel %vm5614_vm3, %v2345_v23, 0.0  ;;  %v2346_v52 = vmax.f32 %v2314_v48, 0.0  ;;  %vm8408_vm15 = vmmov %vm8407_vm6 }
 0x1f7   : > { %v2409_v45 = vrot.slane %v6575_v7, 7  ;;  %v8138_v18 = vrot.slane %v6575_v7, 1  ;;  %v6581_v32 = vsel %vm5734_vm2, %v2348_v31, 0.0  ;;  %v4277_v17 = vpack.c.bf16 %v2348_v31, %v2347_v59  ;;  %4666 = vmatpush3.bf16.msra.mxu1 %v5068_v54 }
 0x1f8   : > { %v8139_v21 = vrot.slane %v6581_v32, 7  ;;  %v6591_v46 = vsel %vm8404_vm1, %v2346_v52, 0.0  ;;  %v4274_v63 = vpack.c.bf16 %v2346_v52, %v2345_v23  ;;  %v4593_v28 = vpop.f32.mrb[8].mxu0  ;;  %4667 = vmatprep.subr.bf16.mxu1 %v5069_v26  ;;  %v5070_v23 = vld [vmem:[%s8060_s6 + $0x18] sm:$0xff]   ;;  %vm8424_vm3 = vcmp.lt.s32.totalorder %v5248_v2, 7 }
 0x1f9   : > { %v6601_v12 = vsel %vm8405_vm0, %v2472_v16, %v8138_v18  ;;  %v2410_v62 = vrot.slane %v6591_v46, 7  ;;  %v2474_v59 = vrot.slane %v6591_v46, 1  ;;  %v2319_v38 = vadd.f32 %v4593_v28, %v6485_v41  ;;  %v2207_v49 = vpop.f32.mrb[9].mxu0  ;;  %vm8410_vm0 = vmmov %vm8407_vm6 }
 0x1fa   : > { %8406 = vst [vmem:[#allocation33_spill] sm:$0xff] %v6601_v12  ;;  %v2317_v48 = vadd.f32 %v6485_v41, %v2207_v49  ;;  %v4594_v31 = vpop.f32.mrb[10].mxu0  ;;  %4635 = vmatprep.mubr.msk.bf16.mxu1 %vm4273_vm14, %v4274_v63  ;;  %v6623_v52 = vsel %vm8407_vm6, %v2408_v61, %v2409_v45  ;;  %v6629_v46 = vsel %vm8408_vm15, %v2411_v14, %v8139_v21  ;;  %vm8409_vm14 = vmmov %vm8407_vm6  ;;  %vm8412_vm6 = vcmp.lt.s32.totalorder %v5248_v2, 7 }
 0x1fb   : > { %v2351_v28 = vmax.f32 %v2319_v38, 0.0  ;;  %v2320_v49 = vadd.f32 %v4594_v31, %v6485_v41  ;;  %v2210_v54 = vpop.f32.mrb[11].mxu0  ;;  %4636 = vmatmul.mubr.msk.bf16.gmra.mrb[20].mxu1 %vm4276_vm10, %v4277_v17  ;;  %v6641_v61 = vsel %vm8409_vm14, %v2409_v45, %v2410_v62  ;;  %v6645_v63 = vsel %vm8410_vm0, %v2410_v62, %v2411_v14  ;;  %v5071_v14 = vld [vmem:[%s8060_s6 + $0x20] sm:$0xff]  }
 0x1fc   : > { %v6617_v16 = vpop.f32.mrb[0].mxu1  ;;  %v2349_v38 = vmax.f32 %v2317_v48, 0.0  ;;  %v2318_v31 = vadd.f32 %v6485_v41, %v2210_v54  ;;  %4668 = vmatpush3.bf16.msra.mxu1 %v5069_v26  ;;  %vm8411_vm10 = vnez %v8243_v35  ;;  %v6669_v62 = vsel %vm8412_vm6, %v2474_v59, %v8141_v13  ;;  %v8415_v26 = vld [vmem:[#allocation14_spill] sm:$0xff]  ;;  %v8417_v13 = vld [vmem:[#allocation12_spill] sm:$0xff] }
 0x1fd   : > { %v6637_v50 = vpop.f32.mrb[1].mxu1  ;;  %v6656_v45 = vsel %vm8411_vm10, %v2351_v28, 0.0  ;;  %v2352_v36 = vmax.f32 %v2320_v49, 0.0  ;;  %4669 = vmatprep.subr.bf16.mxu1 %v5070_v23  ;;  %8413 = vst [vmem:[#allocation34_spill] sm:$0xff] %v6669_v62  ;;  %vm8414_vm15 = vnez %v8237_v15  ;;  %vm8416_vm14 = vnez %v8415_v26 }
 0x1fe   : > { %v6648_v11 = vpop.f32.mrb[2].mxu1  ;;  %v2415_v54 = vrot.slane %v6656_v45, 7  ;;  %v6675_v49 = vsel %vm8414_vm15, %v2349_v38, 0.0  ;;  %v2350_v17 = vmax.f32 %v2318_v31, 0.0  ;;  %vm8418_vm0 = vnez %v8417_v13 }
 0x1ff   : > { %v6658_v39 = vpop.f32.mrb[3].mxu1  ;;  %v2413_v58 = vrot.slane %v6675_v49, 7  ;;  %v6681_v21 = vsel %vm8416_vm14, %v2352_v36, 0.0  ;;  %v4283_v42 = vpack.c.bf16 %v2352_v36, %v2351_v28  ;;  %vm8420_vm6 = vcmp.lt.s32.totalorder %v5248_v2, 1  ;;  %vm8421_vm1 = vmpackc.low %vm8418_vm0, %vm8414_vm15 }
 0x200   : > { %v2416_v48 = vrot.slane %v6681_v21, 7  ;;  %v6691_v31 = vsel %vm8418_vm0, %v2350_v17, 0.0  ;;  %v4280_v37 = vpack.c.bf16 %v2350_v17, %v2349_v38  ;;  %v4597_v18 = vpop.f32.mrb[12].mxu0  ;;  %4670 = vmatpush3.bf16.msra.mxu1 %v5070_v23  ;;  %v8419_v38 = vrot.slane %v6581_v32, 7  ;;  %vm8422_vm2 = vmmov %vm8420_vm6 }
 0x201   : > { %v2414_v36 = vrot.slane %v6691_v31, 7  ;;  %v2323_v0 = vadd.f32 %v4597_v18, %v6485_v41  ;;  %v2223_v60 = vpop.f32.mrb[13].mxu0  ;;  %4671 = vmatprep.subr.bf16.mxu1 %v5071_v14  ;;  %v8423_v28 = vrot.slane %v6575_v7, 1 }
 0x202   : > { %v6707_v17 = vsel %vm8420_vm6, %v8419_v38, %v2413_v58  ;;  %v2321_v23 = vadd.f32 %v6485_v41, %v2223_v60  ;;  %v4598_v55 = vpop.f32.mrb[14].mxu0  ;;  %4639 = vmatprep.mubr.msk.bf16.mxu1 %vm8421_vm1, %v4280_v37  ;;  %v6717_v18 = vsel %vm8422_vm2, %v2415_v54, %v2416_v48  ;;  %v8426_v38 = vrot.slane %v6675_v49, 1  ;;  %vm8428_vm6 = vmmov %vm8424_vm3 }
 0x203   : > { %v6723_v10 = vsel %vm8424_vm3, %v8423_v28, %v2474_v59  ;;  %v8427_v60 = vrot.slane %v6581_v32, 1  ;;  %v2355_v15 = vmax.f32 %v2323_v0, 0.0  ;;  %v2324_v37 = vadd.f32 %v4598_v55, %v6485_v41  ;;  %v2226_v53 = vpop.f32.mrb[15].mxu0  ;;  %vm8429_vm2 = vmpackc.low %vm8416_vm14, %vm8411_vm10  ;;  %v8435_v55 = vld [vmem:[#allocation15_spill] sm:$0xff] }
 0x204   : > { %8425 = vst [vmem:[#allocation35_spill] sm:$0xff] %v6723_v10  ;;  %4640 = vmatmul.mubr.msk.bf16.gmra.mrb[24].mxu1 %vm8429_vm2, %v4283_v42  ;;  %vm8430_vm3 = vcmp.lt.s32.totalorder %v5248_v2, 1  ;;  %v2353_v28 = vmax.f32 %v2321_v23, 0.0  ;;  %v2322_v0 = vadd.f32 %v6485_v41, %v2226_v53  ;;  %vm8436_vm2 = vnez %v8435_v55 }
 0x205   : > { %v6731_v13 = vsel %vm8428_vm6, %v8427_v60, %v8426_v38  ;;  %v6741_v7 = vsel %vm8430_vm3, %v2413_v58, %v2414_v36  ;;  %vm8431_vm1 = vmmov %vm8430_vm3  ;;  %4672 = vmatpush3.bf16.msra.mxu1 %v5071_v14  ;;  %v6754_v42 = vsel %vm5946_vm7, %v2355_v15, 0.0  ;;  %v2356_v58 = vmax.f32 %v2324_v37, 0.0  ;;  %v5074_v37 = vld [vmem:[%s8060_s6 + $0x38] sm:$0xff]  }
 0x206   : > { %v6745_v59 = vsel %vm8431_vm1, %v2414_v36, %v2415_v54  ;;  %4673 = vmatprep.subr.bf16.mxu1 %v5072_v4  ;;  %v5073_v54 = vld [vmem:[%s8060_s6 + $0x30] sm:$0xff]   ;;  %v8433_v14 = vrot.slane %v6581_v32, 1  ;;  %v8434_v36 = vrot.slane %v6560_v3, 1  ;;  %v2419_v38 = vrot.slane %v6754_v42, 7  ;;  %v8437_v32 = vld [vmem:[#allocation18_spill] sm:$0xff] }
 0x207   : > { %v6773_v26 = vsel %vm8436_vm2, %v2353_v28, 0.0  ;;  %v2354_v35 = vmax.f32 %v2322_v0, 0.0  ;;  %vm8438_vm3 = vnez %v8437_v32  ;;  %v4289_v10 = vpack.c.bf16 %v2356_v58, %v2355_v15 }
 0x208   : > { %v6767_v23 = vsel %vm8428_vm6, %v8434_v36, %v8433_v14  ;;  %v2417_v6 = vrot.slane %v6773_v26, 7  ;;  %v6779_v3 = vsel %vm8438_vm3, %v2356_v58, 0.0  ;;  %v8439_v14 = vld [vmem:[#allocation16_spill] sm:$0xff]  ;;  %vm8441_vm6 = vcmp.lt.s32.totalorder %v5248_v2, 1 }
 0x209   : > { %vm8440_vm1 = vnez %v8439_v14  ;;  %v4286_v62 = vpack.c.bf16 %v2354_v35, %v2353_v28  ;;  %v4601_v53 = vpop.f32.mrb[16].mxu0  ;;  %4674 = vmatpush3.bf16.msra.mxu1 %v5072_v4  ;;  %v8443_v4 = vrot.slane %v6779_v3, 7  ;;  %vm8444_vm14 = vmmov %vm8441_vm6  ;;  %v8470_v55 = vrot.slane %v6773_v26, 1 }
 0x20a   : > { %v6789_v0 = vsel %vm8440_vm1, %v2354_v35, 0.0  ;;  %v2248_v36 = vadd.f32 %v4601_v53, %v6617_v16  ;;  %v2239_v27 = vpop.f32.mrb[17].mxu0  ;;  %4675 = vmatprep.subr.bf16.mxu1 %v5073_v54  ;;  %v6803_v35 = vsel %vm8441_vm6, %v2416_v48, %v2417_v6  ;;  %vm8442_vm0 = vmpackc.low %vm8440_vm1, %vm8436_vm2  ;;  %v8445_v48 = vrot.slane %v6656_v45, 1 }
 0x20b   : > { %v2418_v15 = vrot.slane %v6789_v0, 7  ;;  %v2482_v58 = vrot.slane %v6789_v0, 1  ;;  %v2240_v28 = vadd.f32 %v2239_v27, %v6637_v50  ;;  %v4602_v12 = vpop.f32.mrb[18].mxu0  ;;  %4643 = vmatprep.mubr.msk.bf16.mxu1 %vm8442_vm0, %v4286_v62  ;;  %v6815_v16 = vsel %vm8444_vm14, %v2419_v38, %v8443_v4  ;;  %vm8448_vm14 = vmpackc.low %vm8438_vm3, %vm5946_vm7 }
 0x20c   : > { %v8446_v27 = vrot.slane %v6691_v31, 1  ;;  %vm8447_vm6 = vcmp.lt.s32.totalorder %v5248_v2, 7  ;;  %v2327_v0 = vadd.f32 %v6485_v41, %v2248_v36  ;;  %v2251_v62 = vadd.f32 %v4602_v12, %v6648_v11  ;;  %v2242_v14 = vpop.f32.mrb[19].mxu0  ;;  %4644 = vmatmul.mubr.msk.bf16.gmra.mrb[28].mxu1 %vm8448_vm14, %v4289_v10 }
 0x20d   : > { %vm8449_vm0 = vcmp.lt.s32.totalorder %v5248_v2, 1  ;;  %v2243_v36 = vadd.f32 %v2242_v14, %v6658_v39  ;;  %4676 = vmatpush3.bf16.msra.mxu1 %v5073_v54  ;;  %v8452_v39 = vrot.slane %v6675_v49, 1  ;;  %v8454_v14 = vrot.slane %v6773_v26, 1 }
 0x20e   : > { %v6825_v50 = vsel %vm8447_vm6, %v8446_v27, %v8445_v48  ;;  %v6836_v4 = vsel %vm8449_vm0, %v2417_v6, %v2418_v15  ;;  %vm8450_vm1 = vmmov %vm8449_vm0  ;;  %v2325_v48 = vadd.f32 %v6485_v41, %v2240_v28  ;;  %v2359_v10 = vmax.f32 %v2327_v0, 0.0  ;;  %4677 = vmatprep.subr.bf16.mxu1 %v5074_v37  ;;  %v6852_v6 = vld [vmem:[%s8062_s8] sm:$0xff]  }
 0x20f   : > { %v6840_v53 = vsel %vm8450_vm1, %v2418_v15, %v2419_v38  ;;  %v2328_v27 = vadd.f32 %v6485_v41, %v2251_v62  ;;  %v8451_v38 = vrot.slane %v6691_v31, 1  ;;  %vm8453_vm1 = vmmov %vm8447_vm6  ;;  %v8455_v15 = vrot.slane %v6681_v21, 1 }
 0x210   : > { %vm8456_vm6 = vmmov %vm8453_vm1  ;;  %v2357_v0 = vmax.f32 %v2325_v48, 0.0  ;;  %v2326_v62 = vadd.f32 %v6485_v41, %v2243_v36  ;;  %v8458_v12 = vrot.slane %v6656_v45, 1  ;;  %vm8461_vm0 = vnez %v8289_v19  ;;  %v8464_v45 = vld [vmem:[#allocation19_spill] sm:$0xff] }
 0x211   : > { %v6860_v54 = vsel %vm8453_vm1, %v8452_v39, %v8451_v38  ;;  %v6868_v28 = vsel %vm8456_vm6, %v8455_v15, %v8454_v14  ;;  %v8457_v49 = vmov %v8455_v15  ;;  %vm8459_vm14 = vmmov %vm8453_vm1  ;;  %v2391_v39 = vsel %vm8461_vm0, %v2359_v10, 0.0  ;;  %4678 = vmatpush3.bf16.msra.mxu1 %v5074_v37 }
 0x212   : > { %v6879_v38 = vsel %vm8459_vm14, %v8458_v12, %v8457_v49  ;;  %v2360_v11 = vmax.f32 %v2328_v27, 0.0  ;;  %v8462_v36 = vrot.slane %v6754_v42, 1  ;;  %v2423_v21 = vrot.slane %v2391_v39, 7  ;;  %4711 = vmatprep.subr.bf16.mxu1 %v6852_v6 }
 0x213   : > { %8460 = vst [vmem:[#allocation36_spill] sm:$0xff] %v6879_v38  ;;  %v2487_v15 = vrot.slane %v2391_v39, 1  ;;  %vm8465_vm6 = vnez %v8464_v45  ;;  %v2358_v12 = vmax.f32 %v2326_v62, 0.0  ;;  %vm8466_vm14 = vnez %v8308_v47 }
 0x214   : > { %v6889_v14 = vsel %vm8453_vm1, %v2482_v58, %v8462_v36  ;;  %v2389_v31 = vsel %vm8465_vm6, %v2357_v0, 0.0  ;;  %v6895_v27 = vsel %vm8466_vm14, %v2360_v11, 0.0  ;;  %v4295_v48 = vpack.c.bf16 %v2360_v11, %v2359_v10  ;;  %vm4294_vm2 = vmpackc.low %vm8466_vm14, %vm8461_vm0 }
 0x215   : > { %8463 = vst [vmem:[#allocation37_spill] sm:$0xff] %v6889_v14  ;;  %v2421_v49 = vrot.slane %v2389_v31, 7  ;;  %v2485_v32 = vrot.slane %v2389_v31, 1  ;;  %vm8467_vm3 = vnez %v8294_v29  ;;  %v2424_v39 = vrot.slane %v6895_v27, 7 }
 0x216   : > { %vm4291_vm1 = vmpackc.low %vm8467_vm3, %vm8465_vm6  ;;  %v2488_v36 = vrot.slane %v6895_v27, 1  ;;  %v2390_v37 = vsel %vm8467_vm3, %v2358_v12, 0.0  ;;  %v4292_v62 = vpack.c.bf16 %v2358_v12, %v2357_v0  ;;  %v8468_v31 = vrot.slane %v6779_v3, 7  ;;  %v4557_v0 = vpop.f32.mrb[4].mxu1 }
 0x217   : > { %v2422_v11 = vrot.slane %v2390_v37, 7  ;;  %v2486_v10 = vrot.slane %v2390_v37, 1  ;;  %vm8469_vm6 = vcmp.lt.s32.totalorder %v5248_v2, 1  ;;  %vm8471_vm7 = vcmp.lt.s32.totalorder %v5248_v2, 7  ;;  %v4605_v47 = vpop.f32.mrb[20].mxu0 }
 0x218   : > { %v6914_v45 = vsel %vm8469_vm6, %v8468_v31, %v2421_v49  ;;  %v6920_v27 = vsel %vm8471_vm7, %v8470_v55, %v2482_v58  ;;  %4647 = vmatprep.mubr.msk.bf16.mxu1 %vm4291_vm1, %v4292_v62  ;;  %vm8473_vm3 = vmmov %vm8469_vm6  ;;  %v8474_v29 = vrot.slane %v6779_v3, 1  ;;  %v8478_v55 = vrot.slane %v6754_v42, 1  ;;  %v2046_v62 = vpop.f32.mrb[5].mxu1 }
 0x219   : > { %8472 = vst [vmem:[#allocation38_spill] sm:$0xff] %v6920_v27  ;;  %v6924_v12 = vsel %vm8473_vm3, %v2423_v21, %v2424_v39  ;;  %vm8475_vm6 = vmmov %vm8471_vm7  ;;  %4648 = vmatmul.mubr.msk.bf16.gmra.mrb[32].mxu1 %vm4294_vm2, %v4295_v48  ;;  %v6944_v37 = vsel %vm8473_vm3, %v2421_v49, %v2422_v11  ;;  %v2264_v3 = vadd.f32 %v4605_v47, %v4557_v0  ;;  %vm8491_vm0 = vcmp.lt.s32.totalorder %v5248_v2, 1 }
 0x21a   : > { %v6932_v31 = vsel %vm8475_vm6, %v8474_v29, %v2485_v32  ;;  %v8477_v26 = vmov %v8474_v29  ;;  %vm8479_vm7 = vmmov %vm8475_vm6  ;;  %v6954_v42 = vsel %vm8475_vm6, %v2486_v10, %v2487_v15 }
 0x21b   : > { %8476 = vst [vmem:[#allocation39_spill] sm:$0xff] %v6932_v31  ;;  %v6940_v58 = vsel %vm8479_vm7, %v8478_v55, %v8477_v26  ;;  %vm8481_vm1 = vmmov %vm8473_vm3  ;;  %v4558_v26 = vpop.f32.mrb[6].mxu1  ;;  %v2255_v55 = vpop.f32.mrb[21].mxu0  ;;  %v2331_v0 = vadd.f32 %v6485_v41, %v2264_v3  ;;  %vm8487_vm3 = vnez %v8329_v43 }
 0x21c   : > { %8480 = vst [vmem:[#allocation40_spill] sm:$0xff] %v6940_v58  ;;  %v6948_v19 = vsel %vm8481_vm1, %v2422_v11, %v2423_v21  ;;  %8482 = vst [vmem:[#allocation41_spill] sm:$0xff] %v6954_v42  ;;  %v2256_v11 = vadd.f32 %v2255_v55, %v2046_v62  ;;  %v2049_v60 = vpop.f32.mrb[7].mxu1  ;;  %v4606_v29 = vpop.f32.mrb[22].mxu0  ;;  %vm8488_vm1 = vnez %v8302_v51 }
 0x21d   : > { %vm8483_vm2 = vmmov %vm8475_vm6  ;;  %v2267_v48 = vadd.f32 %v4606_v29, %v4558_v26  ;;  %v2258_v31 = vpop.f32.mrb[23].mxu0  ;;  %v2363_v14 = vmax.f32 %v2331_v0, 0.0  ;;  %vm8489_vm6 = vnez %v8344_v22 }
 0x21e   : > { %v6962_v21 = vsel %vm8483_vm2, %v2485_v32, %v2486_v10  ;;  %vm8485_vm7 = vmmov %vm8483_vm2  ;;  %v2329_v49 = vadd.f32 %v6485_v41, %v2256_v11  ;;  %v2259_v27 = vadd.f32 %v2258_v31, %v2049_v60  ;;  %vm8490_vm2 = vnez %v8334_v40 }
 0x21f   : > { %8484 = vst [vmem:[#allocation42_spill] sm:$0xff] %v6962_v21  ;;  %v6968_v47 = vsel %vm8485_vm7, %v2487_v15, %v2488_v36  ;;  %v2332_v32 = vadd.f32 %v6485_v41, %v2267_v48  ;;  %v2395_v55 = vsel %vm8487_vm3, %v2363_v14, 0.0  ;;  %vm4297_vm7 = vmpackc.low %vm8490_vm2, %vm8488_vm1 }
 0x220   : > { %8486 = vst [vmem:[#allocation43_spill] sm:$0xff] %v6968_v47  ;;  %v2361_v10 = vmax.f32 %v2329_v49, 0.0  ;;  %v2330_v62 = vadd.f32 %v6485_v41, %v2259_v27  ;;  %v2427_v21 = vrot.slane %v2395_v55, 7  ;;  %v2491_v15 = vrot.slane %v2395_v55, 1  ;;  %vm4300_vm14 = vmpackc.low %vm8489_vm6, %vm8487_vm3 }
 0x221   : > { %v2364_v58 = vmax.f32 %v2332_v32, 0.0  ;;  %vm8494_vm15 = vmmov %vm8491_vm0 }
 0x222   : > { %v2393_v3 = vsel %vm8488_vm1, %v2361_v10, 0.0  ;;  %v2362_v29 = vmax.f32 %v2330_v62, 0.0  ;;  %vm8492_vm1 = vcmp.lt.s32.totalorder %v5248_v2, 7 }
 0x223   : > { %v2425_v26 = vrot.slane %v2393_v3, 7  ;;  %v2489_v42 = vrot.slane %v2393_v3, 1  ;;  %v6980_v60 = vsel %vm8489_vm6, %v2364_v58, 0.0  ;;  %v4301_v31 = vpack.c.bf16 %v2364_v58, %v2363_v14 }
 0x224   : > { %v2428_v27 = vrot.slane %v6980_v60, 7  ;;  %v2492_v48 = vrot.slane %v6980_v60, 1  ;;  %v2394_v49 = vsel %vm8490_vm2, %v2362_v29, 0.0  ;;  %v4298_v11 = vpack.c.bf16 %v2362_v29, %v2361_v10  ;;  %vm8495_vm2 = vmmov %vm8492_vm1 }
 0x225   : > { %v2426_v0 = vrot.slane %v2394_v49, 7  ;;  %v2490_v14 = vrot.slane %v2394_v49, 1  ;;  %v6996_v58 = vsel %vm8491_vm0, %v2424_v39, %v2425_v26  ;;  %v7000_v32 = vsel %vm8492_vm1, %v2488_v36, %v2489_v42  ;;  %vm8497_vm1 = vmmov %vm8491_vm0 }
 0x226   : > { %8493 = vst [vmem:[#allocation44_spill] sm:$0xff] %v7000_v32  ;;  %4651 = vmatprep.mubr.msk.bf16.mxu1 %vm4297_vm7, %v4298_v11  ;;  %v7004_v62 = vsel %vm8494_vm15, %v2427_v21, %v2428_v27  ;;  %v7010_v55 = vsel %vm8495_vm2, %v2491_v15, %v2492_v48  ;;  %vm8498_vm7 = vmmov %vm8495_vm2 }
 0x227   : > { %8496 = vst [vmem:[#allocation45_spill] sm:$0xff] %v7010_v55  ;;  %4652 = vmatmul.mubr.msk.bf16.gmra.mrb[36].mxu1 %vm4300_vm14, %v4301_v31  ;;  %v7014_v39 = vsel %vm8491_vm0, %v2425_v26, %v2426_v0  ;;  %v7018_v36 = vsel %vm8497_vm1, %v2426_v0, %v2427_v21  ;;  %v7022_v3 = vsel %vm8498_vm7, %v2490_v14, %v2491_v15  ;;  %vm8500_vm15 = vmmov %vm8495_vm2 }
 0x228   : > { %8499 = vst [vmem:[#allocation46_spill] sm:$0xff] %v7022_v3  ;;  %v7026_v29 = vsel %vm8500_vm15, %v2489_v42, %v2490_v14  ;;  %vm8502_vm14 = vnez %v8356_v56  ;;  %vm8503_vm2 = vnez %v8339_v20  ;;  %vm8504_vm0 = vnez %v8359_v1 }
 0x229   : > { %8501 = vst [vmem:[#allocation47_spill] sm:$0xff] %v7026_v29  ;;  %vm4303_vm1 = vmpackc.low %vm8504_vm0, %vm8503_vm2  ;;  %vm8505_vm15 = vcmp.lt.s32.totalorder %v5248_v2, 1 }
 0x22a   : > { %vm4306_vm7 = vmpackc.low %vm6381_vm5, %vm8502_vm14 }
 0x22d   : > { %v4561_v49 = vpop.f32.mrb[8].mxu1 }
 0x22e   : > { %v2062_v21 = vpop.f32.mrb[9].mxu1 }
 0x22f   : > { %v4609_v11 = vpop.f32.mrb[24].mxu0  ;;  %v4562_v0 = vpop.f32.mrb[10].mxu1 }
 0x230   : > { %v2280_v10 = vadd.f32 %v4609_v11, %v4561_v49  ;;  %v2271_v15 = vpop.f32.mrb[25].mxu0  ;;  %v2065_v40 = vpop.f32.mrb[11].mxu1 }
 0x231   : > { %v2272_v22 = vadd.f32 %v2271_v15, %v2062_v21  ;;  %v4610_v51 = vpop.f32.mrb[26].mxu0 }
 0x232   : > { %v2335_v42 = vadd.f32 %v6485_v41, %v2280_v10  ;;  %v2283_v14 = vadd.f32 %v4610_v51, %v4562_v0  ;;  %v2274_v43 = vpop.f32.mrb[27].mxu0 }
 0x233   : > { %v2333_v60 = vadd.f32 %v6485_v41, %v2272_v22  ;;  %v2275_v47 = vadd.f32 %v2274_v43, %v2065_v40 }
 0x234   : > { %v2367_v31 = vmax.f32 %v2335_v42, 0.0  ;;  %v2336_v32 = vadd.f32 %v6485_v41, %v2283_v14 }
 0x235   : > { %v2365_v26 = vmax.f32 %v2333_v60, 0.0  ;;  %v2334_v29 = vadd.f32 %v6485_v41, %v2275_v47 }
 0x236   : > { %v2399_v49 = vsel %vm8502_vm14, %v2367_v31, 0.0  ;;  %v2368_v11 = vmax.f32 %v2336_v32, 0.0  ;;  %vm8520_vm14 = vcmp.lt.s32.totalorder %v5248_v2, 7 }
 0x237   : > { %v2431_v3 = vrot.slane %v2399_v49, 7  ;;  %v2495_v21 = vrot.slane %v2399_v49, 1  ;;  %v2397_v10 = vsel %vm8503_vm2, %v2365_v26, 0.0  ;;  %v2366_v51 = vmax.f32 %v2334_v29, 0.0 }
 0x238   : > { %v2429_v0 = vrot.slane %v2397_v10, 7  ;;  %v2493_v15 = vrot.slane %v2397_v10, 1  ;;  %v7044_v43 = vsel %vm6381_vm5, %v2368_v11, 0.0  ;;  %v4307_v40 = vpack.c.bf16 %v2368_v11, %v2367_v31 }
 0x239   : > { %v2432_v22 = vrot.slane %v7044_v43, 7  ;;  %v2496_v47 = vrot.slane %v7044_v43, 1  ;;  %v2398_v32 = vsel %vm8504_vm0, %v2366_v51, 0.0  ;;  %v4304_v29 = vpack.c.bf16 %v2366_v51, %v2365_v26  ;;  %v4565_v42 = vpop.f32.mrb[12].mxu1  ;;  %vm8508_vm0 = vmmov %vm8505_vm15 }
 0x23a   : > { %v2430_v60 = vrot.slane %v2398_v32, 7  ;;  %v2494_v31 = vrot.slane %v2398_v32, 1  ;;  %v7060_v14 = vsel %vm8505_vm15, %v2428_v27, %v2429_v0  ;;  %vm8506_vm2 = vcmp.lt.s32.totalorder %v5248_v2, 7  ;;  %v2078_v11 = vpop.f32.mrb[13].mxu1 }
 0x23b   : > { %v7064_v49 = vsel %vm8506_vm2, %v2492_v48, %v2493_v15  ;;  %4655 = vmatprep.mubr.msk.bf16.mxu1 %vm4303_vm1, %v4304_v29  ;;  %v4613_v10 = vpop.f32.mrb[28].mxu0  ;;  %v7068_v26 = vsel %vm8508_vm0, %v2431_v3, %v2432_v22  ;;  %vm8509_vm5 = vmmov %vm8506_vm2  ;;  %v4566_v32 = vpop.f32.mrb[14].mxu1 }
 0x23c   : > { %8507 = vst [vmem:[#allocation48_spill] sm:$0xff] %v7064_v49  ;;  %v7074_v43 = vsel %vm8509_vm5, %v2495_v21, %v2496_v47  ;;  %v2296_v27 = vadd.f32 %v4613_v10, %v4565_v42  ;;  %4656 = vmatmul.mubr.msk.bf16.gmra.mrb[40].mxu1 %vm4306_vm7, %v4307_v40  ;;  %v2287_v1 = vpop.f32.mrb[29].mxu0  ;;  %vm8510_vm2 = vmmov %vm8508_vm0  ;;  %v2081_v20 = vpop.f32.mrb[15].mxu1  ;;  %vm8515_vm7 = vnez %v8364_v44 }
 0x23d   : > { %v7078_v48 = vsel %vm8510_vm2, %v2429_v0, %v2430_v60  ;;  %vm8511_vm1 = vmmov %vm8508_vm0  ;;  %v2288_v51 = vadd.f32 %v2287_v1, %v2078_v11  ;;  %v4614_v56 = vpop.f32.mrb[30].mxu0  ;;  %vm8518_vm2 = vnez %v8382_v34 }
 0x23e   : > { %v7082_v29 = vsel %vm8511_vm1, %v2430_v60, %v2431_v3  ;;  %vm8512_vm0 = vmmov %vm8509_vm5  ;;  %v2339_v3 = vadd.f32 %v6485_v41, %v2296_v27  ;;  %v2299_v60 = vadd.f32 %v4614_v56, %v4566_v32  ;;  %v2290_v10 = vpop.f32.mrb[31].mxu0 }
 0x23f   : > { %v7086_v5 = vsel %vm8512_vm0, %v2494_v31, %v2495_v21  ;;  %vm8513_vm5 = vmmov %vm8512_vm0  ;;  %v2337_v1 = vadd.f32 %v6485_v41, %v2288_v51  ;;  %v2291_v11 = vadd.f32 %v2290_v10, %v2081_v20  ;;  %v8516_v51 = vld [vmem:[#allocation20_spill] sm:$0xff] }
 0x240   : > { %v7094_v0 = vsel %vm8513_vm5, %v2493_v15, %v2494_v31  ;;  %v2371_v55 = vmax.f32 %v2339_v3, 0.0  ;;  %v2340_v40 = vadd.f32 %v6485_v41, %v2299_v60  ;;  %vm8517_vm15 = vnez %v8516_v51  ;;  %vm4309_vm1 = vmpackc.low %vm8518_vm2, %vm8515_vm7 }
 0x241   : > { %8514 = vst [vmem:[#allocation49_spill] sm:$0xff] %v7094_v0  ;;  %v2369_v49 = vmax.f32 %v2337_v1, 0.0  ;;  %v2338_v42 = vadd.f32 %v6485_v41, %v2291_v11  ;;  %vm4312_vm0 = vmpackc.low %vm8517_vm15, %vm6429_vm9  ;;  %vm8519_vm5 = vcmp.lt.s32.totalorder %v5248_v2, 1 }
 0x242   : > { %v2403_v15 = vsel %vm6429_vm9, %v2371_v55, 0.0  ;;  %v2372_v31 = vmax.f32 %v2340_v40, 0.0 }
 0x243   : > { %v2435_v38 = vrot.slane %v2403_v15, 7  ;;  %v2499_v27 = vrot.slane %v2403_v15, 1  ;;  %v2401_v56 = vsel %vm8515_vm7, %v2369_v49, 0.0  ;;  %v2370_v32 = vmax.f32 %v2338_v42, 0.0 }
 0x244   : > { %v2433_v21 = vrot.slane %v2401_v56, 7  ;;  %v2497_v0 = vrot.slane %v2401_v56, 1  ;;  %v2404_v20 = vsel %vm8517_vm15, %v2372_v31, 0.0  ;;  %v4313_v3 = vpack.c.bf16 %v2372_v31, %v2371_v55 }
 0x245   : > { %v2436_v41 = vrot.slane %v2404_v20, 7  ;;  %v2500_v60 = vrot.slane %v2404_v20, 1  ;;  %v2402_v40 = vsel %vm8518_vm2, %v2370_v32, 0.0  ;;  %v4310_v10 = vpack.c.bf16 %v2370_v32, %v2369_v49  ;;  %vm8522_vm2 = vmmov %vm8519_vm5 }
 0x246   : > { %v2434_v42 = vrot.slane %v2402_v40, 7  ;;  %v2498_v1 = vrot.slane %v2402_v40, 1  ;;  %v7120_v55 = vsel %vm8519_vm5, %v2432_v22, %v2433_v21  ;;  %v7124_v11 = vsel %vm8520_vm14, %v2496_v47, %v2497_v0  ;;  %vm8523_vm7 = vmmov %vm8522_vm2  ;;  %v5083_v40 = vld [vmem:[%s8065_s11] sm:$0xff]  }
 0x247   : > { %4659 = vmatprep.mubr.msk.bf16.mxu1 %vm4309_vm1, %v4310_v10  ;;  %v8521_v15 = vrot.slane %v6495_v25, 7  ;;  %v7132_v31 = vsel %vm8523_vm7, %v2435_v38, %v2436_v41  ;;  %v3028_v56 = vpack.c.bf16 %v7124_v11, %v7074_v43  ;;  %vm8524_vm5 = vmmov %vm8520_vm14  ;;  %4759 = vmatprep.subr.bf16.mxu0 %v5083_v40  ;;  %v7307_v43 = vld [vmem:[%s8064_s10] sm:$0xff]  }
 0x248   : > { %v7138_v22 = vsel %vm8524_vm5, %v2499_v27, %v2500_v60  ;;  %4660 = vmatmul.mubr.msk.bf16.gmra.mrb[44].mxu1 %vm4312_vm0, %v4313_v3  ;;  %vm8525_vm14 = vmmov %vm8522_vm2  ;;  %v7147_v20 = vsel %vm8522_vm2, %v2434_v42, %v2435_v38  ;;  %4760 = vmatpush3.bf16.msra.mxu0 %v5083_v40  ;;  %v8558_v40 = vld [vmem:[#allocation40_spill] sm:$0xff]  ;;  %v7313_v11 = vld [vmem:[%s8063_s9] ss:$0 sm:$0xff] }
 0x249   : > { %v2468_v49 = vsel %vm8522_vm2, %v2436_v41, %v8521_v15  ;;  %v7143_v32 = vsel %vm8525_vm14, %v2433_v21, %v2434_v42  ;;  %vm8526_vm7 = vmmov %vm8524_vm5  ;;  %v2548_v3 = vpack.c.bf16 %v7132_v31, %v7147_v20  ;;  %v8531_v15 = vpack.c.bf16 %v6641_v61, %v6623_v52  ;;  %v5088_v61 = vld [vmem:[%s8065_s11 + $0x28] sm:$0xff]   ;;  %v5079_v31 = vld [vmem:[%s8062_s8 + $0x20] sm:$0xff]  }
 0x24a   : > { %v2533_v47 = vpack.c.bf16 %v6549_v57, %v2468_v49  ;;  %v7151_v41 = vsel %vm8526_vm7, %v2498_v1, %v2499_v27  ;;  %v5084_v57 = vld [vmem:[%s8065_s11 + $0x8] sm:$0xff]   ;;  %v2547_v21 = vpack.c.bf16 %v7143_v32, %v7120_v55  ;;  %vm8527_vm1 = vmmov %vm8524_vm5  ;;  %v8528_v27 = vrot.slane %v6495_v25, 1  ;;  %v5077_v49 = vld [vmem:[%s8062_s8 + $0x10] sm:$0xff]  }
 0x24b   : > { %v7165_v38 = vsel %vm8527_vm1, %v2497_v0, %v2498_v1  ;;  %vm8529_vm0 = vmmov %vm8527_vm1  ;;  %4761 = vmatprep.subr.bf16.mxu0 %v5084_v57  ;;  %v5085_v0 = vld [vmem:[%s8065_s11 + $0x10] sm:$0xff]   ;;  %v5076_v25 = vld [vmem:[%s8062_s8 + $0x8] sm:$0xff]   ;;  %v8532_v52 = vpack.c.bf16 %v6629_v46, %v6645_v63  ;;  %v8534_v63 = vpack.c.bf16 %v6717_v18, %v6745_v59  ;;  %v8536_v18 = vpack.c.bf16 %v6815_v16, %v6840_v53 }
 0x24c   : > { %v7171_v10 = vsel %vm8529_vm0, %v2500_v60, %v8528_v27  ;;  %4679 = vmatprep.mubr.bf16.mxu1 %v2533_v47  ;;  %v3029_v42 = vpack.c.bf16 %v7151_v41, %v7165_v38  ;;  %4762 = vmatpush3.bf16.msra.mxu0 %v5084_v57  ;;  %v8530_v60 = vpack.c.bf16 %v6523_v33, %v6537_v8  ;;  %v5086_v1 = vld [vmem:[%s8065_s11 + $0x18] sm:$0xff]   ;;  %v5087_v33 = vld [vmem:[%s8065_s11 + $0x20] sm:$0xff]   ;;  %v5080_v46 = vld [vmem:[%s8062_s8 + $0x28] sm:$0xff]  }
 0x24d   : > { %v3030_v55 = vpack.c.bf16 %v7171_v10, %v7138_v22  ;;  %4763 = vmatprep.subr.bf16.mxu0 %v5085_v0  ;;  %v5078_v8 = vld [vmem:[%s8062_s8 + $0x18] sm:$0xff]   ;;  %v8537_v59 = vpack.c.bf16 %v6944_v37, %v6914_v45  ;;  %v8540_v32 = vpack.c.bf16 %v7004_v62, %v7018_v36  ;;  %v8541_v16 = vpack.c.bf16 %v7078_v48, %v7060_v14  ;;  %v8548_v62 = vld [vmem:[#allocation35_spill] sm:$0xff]  ;;  %v8555_v48 = vld [vmem:[#allocation38_spill] sm:$0xff] }
 0x24e   : > { %v5082_v47 = vld [vmem:[%s8062_s8 + $0x38] sm:$0xff]   ;;  %v8542_v53 = vpack.c.bf16 %v7068_v26, %v7082_v29  ;;  %v8550_v36 = vpack.c.bf16 %v6731_v13, %v6767_v23  ;;  %v8551_v14 = vpack.c.bf16 %v6825_v50, %v6860_v54  ;;  %v8552_v26 = vld [vmem:[#allocation36_spill] sm:$0xff]  ;;  %v8557_v20 = vld [vmem:[#allocation39_spill] sm:$0xff] }
 0x24f   : > { %v8544_v45 = vld [vmem:[#allocation33_spill] sm:$0xff]  ;;  %v8559_v57 = vpack.c.bf16 %v8557_v20, %v8558_v40  ;;  %v8563_v23 = vld [vmem:[#allocation44_spill] sm:$0xff]  ;;  %v8564_v27 = vld [vmem:[#allocation43_spill] sm:$0xff] }
 0x250   : > { %4680 = vmatmul.mubr.bf16.vlgmr.msra.gmra.mrb[16].mxu1 %v8530_v60  ;;  %4764 = vmatpush3.bf16.msra.mxu0 %v5085_v0  ;;  %v8565_v50 = vpack.c.bf16 %v8563_v23, %v8564_v27  ;;  %v8566_v54 = vld [vmem:[#allocation46_spill] sm:$0xff]  ;;  %v8567_v0 = vld [vmem:[#allocation47_spill] sm:$0xff]  ;;  %v8570_v60 = vld [vmem:[#allocation45_spill] sm:$0xff] }
 0x251   : > { %4712 = vmatpush3.bf16.msra.mxu1 %v6852_v6  ;;  %4683 = vmatprep.mubr.bf16.mxu1 %v8531_v15  ;;  %v8533_v6 = vpack.c.bf16 %v6741_v7, %v6707_v17  ;;  %v8535_v17 = vpack.c.bf16 %v6836_v4, %v6803_v35  ;;  %v5081_v7 = vld [vmem:[%s8062_s8 + $0x30] sm:$0xff]   ;;  %v8538_v35 = vpack.c.bf16 %v6924_v12, %v6948_v19  ;;  %v8572_v15 = vld [vmem:[#allocation49_spill] sm:$0xff]  ;;  %vm8584_vm14 = vmmov %vm8529_vm0 }
 0x252   : > { %4713 = vmatprep.subr.bf16.mxu1 %v5076_v25  ;;  %4765 = vmatprep.subr.bf16.mxu0 %v5086_v1  ;;  %v8539_v4 = vpack.c.bf16 %v7014_v39, %v6996_v58  ;;  %v8543_v19 = vpack.c.bf16 %v6556_v9, %v6569_v30  ;;  %v8545_v12 = vld [vmem:[#allocation32_spill] sm:$0xff]  ;;  %v8547_v58 = vld [vmem:[#allocation34_spill] sm:$0xff]  ;;  %v8553_v9 = vpack.c.bf16 %v6868_v28, %v8552_v26  ;;  %v8554_v30 = vld [vmem:[#allocation37_spill] sm:$0xff] }
 0x253   : > { %v8546_v37 = vpack.c.bf16 %v8544_v45, %v8545_v12  ;;  %v8549_v39 = vpack.c.bf16 %v8547_v58, %v8548_v62  ;;  %v8556_v29 = vpack.c.bf16 %v8554_v30, %v8555_v48  ;;  %v8568_v28 = vpack.c.bf16 %v8566_v54, %v8567_v0  ;;  %v8580_v30 = vld [vmem:[#allocation2_spill] sm:$0xff] }
 0x254   : > { %4766 = vmatpush3.bf16.msra.mxu0 %v5086_v1 }
 0x255   : > { %4714 = vmatpush3.bf16.msra.mxu1 %v5076_v25  ;;  %4767 = vmatprep.subr.bf16.mxu0 %v5087_v33  ;;  %v8569_v25 = vld [vmem:[#allocation48_spill] sm:$0xff] }
 0x256   : > { %4715 = vmatprep.subr.bf16.mxu1 %v5077_v49  ;;  %v8571_v1 = vpack.c.bf16 %v8569_v25, %v8570_v60 }
 0x258   : > { %4684 = vmatmul.mubr.bf16.gmra.mrb[20].mxu1 %v8532_v52  ;;  %4768 = vmatpush3.bf16.msra.mxu0 %v5087_v33  ;;  %v5089_v33 = vld [vmem:[%s8065_s11 + $0x30] sm:$0xff]  }
 0x259   : > { %4687 = vmatprep.mubr.bf16.mxu1 %v8533_v6  ;;  %4716 = vmatpush3.bf16.msra.mxu1 %v5077_v49  ;;  %v8573_v49 = vpack.c.bf16 %v7086_v5, %v8572_v15  ;;  %v5090_v5 = vld [vmem:[%s8065_s11 + $0x38] sm:$0xff]  }
 0x25a   : > { %4717 = vmatprep.subr.bf16.mxu1 %v5078_v8  ;;  %4769 = vmatprep.subr.bf16.mxu0 %v5088_v61 }
 0x25c   : > { %4770 = vmatpush3.bf16.msra.mxu0 %v5088_v61 }
 0x25d   : > { %4718 = vmatpush3.bf16.msra.mxu1 %v5078_v8  ;;  %4771 = vmatprep.subr.bf16.mxu0 %v5089_v33 }
 0x25e   : > { %4719 = vmatprep.subr.bf16.mxu1 %v5079_v31 }
 0x260   : > { %4688 = vmatmul.mubr.bf16.gmra.mrb[24].mxu1 %v8534_v63  ;;  %4772 = vmatpush3.bf16.msra.mxu0 %v5089_v33 }
 0x261   : > { %4691 = vmatprep.mubr.bf16.mxu1 %v8535_v17  ;;  %4720 = vmatpush3.bf16.msra.mxu1 %v5079_v31 }
 0x262   : > { %4721 = vmatprep.subr.bf16.mxu1 %v5080_v46  ;;  %4773 = vmatprep.subr.bf16.mxu0 %v5090_v5 }
 0x264   : > { %4774 = vmatpush3.bf16.msra.mxu0 %v5090_v5 }
 0x265   : > { %4722 = vmatpush3.bf16.msra.mxu1 %v5080_v46  ;;  %4807 = vmatprep.subr.bf16.mxu0 %v7307_v43 }
 0x266   : > { %4723 = vmatprep.subr.bf16.mxu1 %v5081_v7 }
 0x268   : > { %4692 = vmatmul.mubr.bf16.gmra.mrb[28].mxu1 %v8536_v18 }
 0x269   : > { %4695 = vmatprep.mubr.bf16.mxu1 %v8537_v59  ;;  %4724 = vmatpush3.bf16.msra.mxu1 %v5081_v7 }
 0x26a   : > { %4725 = vmatprep.subr.bf16.mxu1 %v5082_v47 }
 0x26d   : > { %4726 = vmatpush3.bf16.msra.mxu1 %v5082_v47 }
 0x270   : > { %4696 = vmatmul.mubr.bf16.gmra.mrb[32].mxu1 %v8538_v35 }
 0x271   : > { %4699 = vmatprep.mubr.bf16.mxu1 %v8539_v4 }
 0x278   : > { %4700 = vmatmul.mubr.bf16.gmra.mrb[36].mxu1 %v8540_v32 }
 0x279   : > { %4703 = vmatprep.mubr.bf16.mxu1 %v8541_v16 }
 0x280   : > { %4704 = vmatmul.mubr.bf16.gmra.mrb[40].mxu1 %v8542_v53 }
 0x281   : > { %4707 = vmatprep.mubr.bf16.mxu1 %v2547_v21  ;;  %v8560_v21 = vld [vmem:[#allocation41_spill] sm:$0xff] }
 0x288   : > { %4708 = vmatmul.mubr.bf16.gmra.mrb[44].mxu1 %v2548_v3  ;;  %v8561_v3 = vld [vmem:[#allocation42_spill] sm:$0xff] }
 0x289   : > { %4727 = vmatprep.mubr.bf16.mxu1 %v8543_v19  ;;  %v8562_v13 = vpack.c.bf16 %v8560_v21, %v8561_v3 }
 0x290   : > { %4728 = vmatmul.mubr.bf16.vlgmr.msra.gmra.mrb[16].mxu1 %v8546_v37 }
 0x291   : > { %4731 = vmatprep.mubr.bf16.mxu1 %v8549_v39 }
 0x298   : > { %4732 = vmatmul.mubr.bf16.gmra.mrb[20].mxu1 %v8550_v36 }
 0x299   : > { %4735 = vmatprep.mubr.bf16.mxu1 %v8551_v14 }
 0x2a0   : > { %4736 = vmatmul.mubr.bf16.gmra.mrb[24].mxu1 %v8553_v9 }
 0x2a1   : > { %4739 = vmatprep.mubr.bf16.mxu1 %v8556_v29 }
 0x2a8   : > { %4740 = vmatmul.mubr.bf16.gmra.mrb[28].mxu1 %v8559_v57 }
 0x2a9   : > { %4743 = vmatprep.mubr.bf16.mxu1 %v8562_v13 }
 0x2b0   : > { %4744 = vmatmul.mubr.bf16.gmra.mrb[32].mxu1 %v8565_v50 }
 0x2b1   : > { %4747 = vmatprep.mubr.bf16.mxu1 %v8568_v28 }
 0x2b8   : > { %4748 = vmatmul.mubr.bf16.gmra.mrb[36].mxu1 %v8571_v1  ;;  %v8588_v1 = vld [vmem:[#allocation7_spill] sm:$0xff] }
 0x2b9   : > { %4751 = vmatprep.mubr.bf16.mxu1 %v8573_v49  ;;  %vm8589_vm1 = vnez %v8588_v1 }
 0x2c0   : > { %4752 = vmatmul.mubr.bf16.gmra.mrb[40].mxu1 %v3028_v56 }
 0x2c1   : > { %4755 = vmatprep.mubr.bf16.mxu1 %v3029_v42 }
 0x2c8   : > { %4756 = vmatmul.mubr.bf16.gmra.mrb[44].mxu1 %v3030_v55 }
 0x363   : > { %v4729_v56 = vpop.f32.mrb[16].mxu1 }
 0x364   : > { %v3297_v22 = vadd.f32 %v4729_v56, %v7313_v11  ;;  %v3129_v41 = vpop.f32.mrb[17].mxu1  ;;  %v8590_v56 = vld [vmem:[#allocation9_spill] sm:$0xff] }
 0x365   : > { %v3295_v38 = vadd.f32 %v7313_v11, %v3129_v41  ;;  %v4730_v10 = vpop.f32.mrb[18].mxu1 }
 0x366   : > { %v3329_v42 = vmax.f32 %v3297_v22, 0.0  ;;  %v3298_v55 = vadd.f32 %v4730_v10, %v7313_v11  ;;  %v3132_v8 = vpop.f32.mrb[19].mxu1 }
 0x367   : > { %v3327_v52 = vmax.f32 %v3295_v38, 0.0  ;;  %v3296_v61 = vadd.f32 %v7313_v11, %v3132_v8 }
 0x368   : > { %v3361_v31 = vsel %vm5590_vm13, %v3329_v42, 0.0  ;;  %v3330_v46 = vmax.f32 %v3298_v55, 0.0  ;;  %vm8582_vm13 = vmmov %vm8522_vm2  ;;  %v8592_v42 = vld [vmem:[#allocation8_spill] sm:$0xff] }
 0x369   : > { %v7323_v17 = vsel %vm5548_vm8, %v3327_v52, 0.0  ;;  %v3328_v7 = vmax.f32 %v3296_v61, 0.0  ;;  %v3393_v47 = vrot.slane %v3361_v31, 7  ;;  %v3457_v35 = vrot.slane %v3361_v31, 1  ;;  %vm8578_vm8 = vmmov %vm8522_vm2 }
 0x36a   : > { %v7327_v59 = vsel %vm5571_vm12, %v3330_v46, 0.0  ;;  %v3391_v45 = vrot.slane %v7323_v17, 7  ;;  %v3455_v39 = vrot.slane %v7323_v17, 1  ;;  %vm8579_vm12 = vmmov %vm8529_vm0 }
 0x36b   : > { %v3394_v4 = vrot.slane %v7327_v59, 7  ;;  %v3458_v32 = vrot.slane %v7327_v59, 1  ;;  %v3360_v53 = vsel %vm5560_vm11, %v3328_v7, 0.0  ;;  %v4733_v19 = vpop.f32.mrb[20].mxu1  ;;  %vm8581_vm11 = vcmp.lt.s32.totalorder %v8580_v30, 64  ;;  %vm8586_vm2 = vmmov %vm8529_vm0 }
 0x36c   : > { %v3392_v12 = vrot.slane %v3360_v53, 7  ;;  %v3456_v37 = vrot.slane %v3360_v53, 1  ;;  %v3301_v58 = vadd.f32 %v4733_v19, %v7313_v11  ;;  %v3145_v62 = vpop.f32.mrb[21].mxu1  ;;  %vm8583_vm5 = vmmov %vm8581_vm11  ;;  %vm8593_vm0 = vnez %v8592_v42 }
 0x36d   : > { %v3451_v36 = vsel %vm8578_vm8, %v3393_v47, %v3394_v4  ;;  %v3515_v14 = vsel %vm8579_vm12, %v3457_v35, %v3458_v32  ;;  %v3299_v26 = vadd.f32 %v7313_v11, %v3145_v62  ;;  %v4734_v9 = vpop.f32.mrb[22].mxu1  ;;  %vm8587_vm7 = vmmov %vm8578_vm8 }
 0x36e   : > { %v7346_v48 = vsel %vm8581_vm11, %v3451_v36, %v7327_v59  ;;  %v3452_v29 = vsel %vm8582_vm13, %v3392_v12, %v3393_v47  ;;  %v3333_v20 = vmax.f32 %v3301_v58, 0.0  ;;  %v3302_v40 = vadd.f32 %v4734_v9, %v7313_v11  ;;  %v3148_v57 = vpop.f32.mrb[23].mxu1  ;;  %vm8594_vm8 = vmmov %vm8583_vm5 }
 0x36f   : > { %v7353_v21 = vsel %vm8583_vm5, %v3452_v29, %v3361_v31  ;;  %v3331_v3 = vmax.f32 %v3299_v26, 0.0  ;;  %v3300_v13 = vadd.f32 %v7313_v11, %v3148_v57  ;;  %v3516_v23 = vsel %vm8584_vm14, %v3456_v37, %v3457_v35  ;;  %vm8595_vm12 = vmmov %vm8586_vm2  ;;  %v5092_v35 = vld [vmem:[%s8064_s10 + $0x8] sm:$0xff]  }
 0x370   : > { %v7360_v50 = vsel %vm5742_vm4, %v3333_v20, 0.0  ;;  %v3334_v54 = vmax.f32 %v3302_v40, 0.0  ;;  %v3517_v0 = vsel %vm8586_vm2, %v3455_v39, %v3456_v37  ;;  %v3453_v28 = vsel %vm8587_vm7, %v3391_v45, %v3392_v12  ;;  %vm8596_vm11 = vmmov %vm8586_vm2 }
 0x371   : > { %v3397_v25 = vrot.slane %v7360_v50, 7  ;;  %v3461_v60 = vrot.slane %v7360_v50, 1  ;;  %v3363_v15 = vsel %vm8589_vm1, %v3331_v3, 0.0  ;;  %v3332_v49 = vmax.f32 %v3300_v13, 0.0  ;;  %vm8597_vm13 = vmmov %vm8586_vm2 }
 0x372   : > { %v3395_v33 = vrot.slane %v3363_v15, 7  ;;  %v3459_v5 = vrot.slane %v3363_v15, 1  ;;  %vm8591_vm4 = vnez %v8590_v56  ;;  %v3567_v41 = vpack.c.bf16 %v3516_v23, %v3517_v0  ;;  %vm8598_vm5 = vmmov %vm8586_vm2  ;;  %v8603_v23 = vld [vmem:[#allocation11_spill] sm:$0xff]  ;;  %v8605_v0 = vld [vmem:[#allocation14_spill] sm:$0xff] }
 0x373   : > { %v7376_v22 = vsel %vm8591_vm4, %v3334_v54, 0.0  ;;  %v7382_v55 = vsel %vm8593_vm0, %v3332_v49, 0.0  ;;  %v4737_v8 = vpop.f32.mrb[24].mxu1  ;;  %v7386_v52 = vsel %vm8594_vm8, %v3453_v28, %v3360_v53  ;;  %vm8599_vm14 = vmmov %vm8587_vm7  ;;  %vm8606_vm1 = vnez %v8605_v0 }
 0x374   : > { %v3398_v38 = vrot.slane %v7376_v22, 7  ;;  %v3462_v10 = vrot.slane %v7376_v22, 1  ;;  %v3514_v61 = vsel %vm8595_vm12, %v3458_v32, %v3459_v5  ;;  %v3396_v6 = vrot.slane %v7382_v55, 7  ;;  %4775 = vmatprep.mubr.bf16.mxu0 %v3567_v41  ;;  %v3161_v63 = vpop.f32.mrb[25].mxu1  ;;  %vm8601_vm2 = vmmov %vm8587_vm7 }
 0x375   : > { %v3460_v31 = vrot.slane %v7382_v55, 1  ;;  %v3305_v46 = vadd.f32 %v4737_v8, %v7313_v11  ;;  %v3568_v7 = vpack.c.bf16 %v3514_v61, %v3515_v14  ;;  %v3303_v47 = vadd.f32 %v7313_v11, %v3161_v63  ;;  %v4738_v18 = vpop.f32.mrb[26].mxu1  ;;  %vm8602_vm7 = vmmov %vm8594_vm8 }
 0x376   : > { %v3511_v16 = vsel %vm8596_vm11, %v3461_v60, %v3462_v10  ;;  %v3306_v19 = vadd.f32 %v4738_v18, %v7313_v11  ;;  %v3164_v12 = vpop.f32.mrb[27].mxu1  ;;  %v3449_v26 = vsel %vm8599_vm14, %v3395_v33, %v3396_v6  ;;  %v3450_v40 = vsel %vm8601_vm2, %v3394_v4, %v3395_v33  ;;  %vm8607_vm4 = vmmov %vm8602_vm7  ;;  %v8608_v33 = vld [vmem:[#allocation12_spill] sm:$0xff]  ;;  %v5094_v18 = vld [vmem:[%s8064_s10 + $0x18] sm:$0xff]  }
 0x377   : > { %v3337_v53 = vmax.f32 %v3305_v46, 0.0  ;;  %v3512_v37 = vsel %vm8597_vm13, %v3460_v31, %v3461_v60  ;;  %v3513_v58 = vsel %vm8598_vm5, %v3459_v5, %v3460_v31  ;;  %v3335_v62 = vmax.f32 %v3303_v47, 0.0  ;;  %4776 = vmatmul.mubr.bf16.vlgmr.msra.gmra.mrb[32].mxu0 %v3568_v7  ;;  %vm8610_vm8 = vmmov %vm8598_vm5 }
 0x378   : > { %v3304_v36 = vadd.f32 %v7313_v11, %v3164_v12  ;;  %v3569_v14 = vpack.c.bf16 %v3512_v37, %v3513_v58  ;;  %v3338_v20 = vmax.f32 %v3306_v19, 0.0  ;;  %4808 = vmatpush3.bf16.msra.mxu0 %v7307_v43  ;;  %v7423_v57 = vsel %vm8602_vm7, %v3449_v26, %v7382_v55  ;;  %v5093_v43 = vld [vmem:[%s8064_s10 + $0x10] sm:$0xff]   ;;  %vm8611_vm12 = vmmov %vm8598_vm5 }
 0x379   : > { %v7413_v29 = vsel %vm8411_vm10, %v3337_v53, 0.0  ;;  %vm8604_vm10 = vnez %v8603_v23  ;;  %4809 = vmatprep.subr.bf16.mxu0 %v5092_v35  ;;  %v7442_v60 = vsel %vm8607_vm4, %v3450_v40, %v3363_v15  ;;  %vm8609_vm0 = vnez %v8608_v33  ;;  %vm8612_vm11 = vmmov %vm8601_vm2 }
 0x37a   : > { %v3401_v3 = vrot.slane %v7413_v29, 7  ;;  %v3465_v13 = vrot.slane %v7413_v29, 1  ;;  %v7429_v27 = vsel %vm8604_vm10, %v3335_v62, 0.0  ;;  %v3336_v54 = vmax.f32 %v3304_v36, 0.0  ;;  %4779 = vmatprep.mubr.bf16.mxu0 %v3569_v14  ;;  %vm8613_vm13 = vmmov %vm8598_vm5  ;;  %v8615_v14 = vld [vmem:[#allocation17_spill] sm:$0xff] }
 0x37b   : > { %v3399_v59 = vrot.slane %v7429_v27, 7  ;;  %v3463_v4 = vrot.slane %v7429_v27, 1  ;;  %v7438_v28 = vsel %vm8606_vm1, %v3338_v20, 0.0  ;;  %v4741_v56 = vpop.f32.mrb[28].mxu1  ;;  %vm8614_vm14 = vmmov %vm8601_vm2  ;;  %vm8616_vm2 = vnez %v8615_v14 }
 0x37c   : > { %v3402_v1 = vrot.slane %v7438_v28, 7  ;;  %v3466_v49 = vrot.slane %v7438_v28, 1  ;;  %v7448_v5 = vsel %vm8609_vm0, %v3336_v54, 0.0  ;;  %v3309_v61 = vadd.f32 %v4741_v56, %v7313_v11  ;;  %v3177_v15 = vpop.f32.mrb[29].mxu1  ;;  %4810 = vmatpush3.bf16.msra.mxu0 %v5092_v35  ;;  %vm8617_vm7 = vmmov %vm8607_vm4 }
 0x37d   : > { %v3400_v42 = vrot.slane %v7448_v5, 7  ;;  %v3464_v8 = vrot.slane %v7448_v5, 1  ;;  %v3510_v31 = vsel %vm8610_vm8, %v3462_v10, %v3463_v4  ;;  %v3307_v46 = vadd.f32 %v7313_v11, %v3177_v15  ;;  %v4742_v63 = vpop.f32.mrb[30].mxu1  ;;  %4811 = vmatprep.subr.bf16.mxu0 %v5093_v43  ;;  %vm8618_vm10 = vmmov %vm8607_vm4 }
 0x37e   : > { %v3570_v7 = vpack.c.bf16 %v3510_v31, %v3511_v16  ;;  %v3507_v47 = vsel %vm8611_vm12, %v3465_v13, %v3466_v49  ;;  %v3447_v10 = vsel %vm8612_vm11, %v3397_v25, %v3398_v38  ;;  %v3341_v35 = vmax.f32 %v3309_v61, 0.0  ;;  %v3180_v19 = vpop.f32.mrb[31].mxu1  ;;  %v8623_v61 = vld [vmem:[#allocation16_spill] sm:$0xff]  ;;  %vm8625_vm8 = vmmov %vm8612_vm11 }
 0x37f   : > { %v3310_v53 = vadd.f32 %v4742_v63, %v7313_v11  ;;  %v3508_v16 = vsel %vm8613_vm13, %v3464_v8, %v3465_v13  ;;  %v3509_v12 = vsel %vm8598_vm5, %v3463_v4, %v3464_v8  ;;  %v3339_v37 = vmax.f32 %v3307_v46, 0.0  ;;  %v8621_v4 = vld [vmem:[#allocation18_spill] sm:$0xff]  ;;  %vm8626_vm12 = vmmov %vm8598_vm5 }
 0x380   : > { %v3308_v58 = vadd.f32 %v7313_v11, %v3180_v19  ;;  %4780 = vmatmul.mubr.bf16.gmra.mrb[36].mxu0 %v3570_v7  ;;  %v3571_v62 = vpack.c.bf16 %v3508_v16, %v3509_v12  ;;  %v3448_v36 = vsel %vm8614_vm14, %v3396_v6, %v3397_v25  ;;  %v7483_v26 = vsel %vm8616_vm2, %v3341_v35, 0.0  ;;  %v8619_v6 = vld [vmem:[#allocation15_spill] sm:$0xff]  ;;  %vm8627_vm11 = vmmov %vm8598_vm5 }
 0x381   : > { %v3342_v9 = vmax.f32 %v3310_v53, 0.0  ;;  %4812 = vmatpush3.bf16.msra.mxu0 %v5093_v43  ;;  %v7488_v20 = vsel %vm8617_vm7, %v3448_v36, %v7360_v50  ;;  %v7493_v40 = vsel %vm8618_vm10, %v3447_v10, %v7376_v22  ;;  %v3405_v55 = vrot.slane %v7483_v26, 7  ;;  %v5095_v50 = vld [vmem:[%s8064_s10 + $0x20] sm:$0xff]   ;;  %vm8628_vm13 = vmmov %vm8625_vm8 }
 0x382   : > { %v3469_v25 = vrot.slane %v7483_v26, 1  ;;  %vm8620_vm1 = vnez %v8619_v6  ;;  %v3340_v23 = vmax.f32 %v3308_v58, 0.0  ;;  %4783 = vmatprep.mubr.bf16.mxu0 %v3571_v62  ;;  %4813 = vmatprep.subr.bf16.mxu0 %v5094_v18  ;;  %vm8622_vm4 = vnez %v8621_v4  ;;  %v5096_v58 = vld [vmem:[%s8064_s10 + $0x28] sm:$0xff]   ;;  %vm8629_vm14 = vmmov %vm8598_vm5 }
 0x383   : > { %v7499_v13 = vsel %vm8620_vm1, %v3339_v37, 0.0  ;;  %v7508_v0 = vsel %vm8622_vm4, %v3342_v9, 0.0  ;;  %vm8624_vm0 = vnez %v8623_v61  ;;  %v4745_v31 = vpop.f32.mrb[32].mxu1  ;;  %v3445_v46 = vsel %vm8625_vm8, %v3399_v59, %v3400_v42  ;;  %vm8630_vm2 = vmmov %vm8617_vm7 }
 0x384   : > { %v3403_v54 = vrot.slane %v7499_v13, 7  ;;  %v3467_v43 = vrot.slane %v7499_v13, 1  ;;  %v3406_v56 = vrot.slane %v7508_v0, 7  ;;  %v3470_v8 = vrot.slane %v7508_v0, 1  ;;  %v3193_v35 = vpop.f32.mrb[33].mxu1  ;;  %vm8633_vm10 = vmmov %vm8630_vm2 }
 0x385   : > { %v7516_v15 = vsel %vm8624_vm0, %v3340_v23, 0.0  ;;  %v3313_v10 = vadd.f32 %v4745_v31, %v7313_v11  ;;  %4814 = vmatpush3.bf16.msra.mxu0 %v5094_v18  ;;  %v3311_v19 = vadd.f32 %v7313_v11, %v3193_v35  ;;  %v4746_v16 = vpop.f32.mrb[34].mxu1  ;;  %vm8634_vm1 = vmmov %vm8625_vm8  ;;  %v8635_v31 = vld [vmem:[#allocation19_spill] sm:$0xff]  ;;  %v8731_v2 = vpack.c.bf16 %v7493_v40, %v7488_v20 }
 0x386   : > { %v3404_v63 = vrot.slane %v7516_v15, 7  ;;  %v3468_v7 = vrot.slane %v7516_v15, 1  ;;  %v3506_v53 = vsel %vm8626_vm12, %v3466_v49, %v3467_v43  ;;  %v3503_v37 = vsel %vm8627_vm11, %v3469_v25, %v3470_v8  ;;  %4815 = vmatprep.subr.bf16.mxu0 %v5095_v50  ;;  %v3196_v36 = vpop.f32.mrb[35].mxu1  ;;  %vm8641_vm12 = vmmov %vm8634_vm1 }
 0x387   : > { %v3572_v12 = vpack.c.bf16 %v3506_v53, %v3507_v47  ;;  %v3446_v49 = vsel %vm8628_vm13, %v3398_v38, %v3399_v59  ;;  %v3345_v18 = vmax.f32 %v3313_v10, 0.0  ;;  %v3314_v62 = vadd.f32 %v4746_v16, %v7313_v11  ;;  %v8631_v38 = vld [vmem:[#allocation21_spill] sm:$0xff]  ;;  %v8637_v53 = vld [vmem:[#allocation24_spill] sm:$0xff]  ;;  %vm8642_vm11 = vmmov %vm8598_vm5 }
 0x388   : > { %v3504_v47 = vsel %vm8598_vm5, %v3468_v7, %v3469_v25  ;;  %v3505_v14 = vsel %vm8629_vm14, %v3467_v43, %v3468_v7  ;;  %v3343_v9 = vmax.f32 %v3311_v19, 0.0  ;;  %v3312_v6 = vadd.f32 %v7313_v11, %v3196_v36  ;;  %vm8643_vm13 = vmmov %vm8598_vm5 }
 0x389   : > { %4784 = vmatmul.mubr.bf16.gmra.mrb[40].mxu0 %v3572_v12  ;;  %v3573_v23 = vpack.c.bf16 %v3504_v47, %v3505_v14  ;;  %v7550_v22 = vsel %vm8630_vm2, %v3446_v49, %v7429_v27  ;;  %vm8632_vm7 = vnez %v8631_v38  ;;  %v3346_v4 = vmax.f32 %v3314_v62, 0.0  ;;  %vm8644_vm5 = vmmov %vm8630_vm2 }
 0x38a   : > { %v7554_v59 = vsel %vm8632_vm7, %v3345_v18, 0.0  ;;  %4816 = vmatpush3.bf16.msra.mxu0 %v5095_v50  ;;  %v7559_v25 = vsel %vm8633_vm10, %v3445_v46, %v7448_v5  ;;  %v3443_v43 = vsel %vm8634_vm1, %v3401_v3, %v3402_v1  ;;  %vm8636_vm4 = vnez %v8635_v31  ;;  %v5097_v46 = vld [vmem:[%s8064_s10 + $0x30] sm:$0xff]   ;;  %v8639_v18 = vld [vmem:[#allocation22_spill] sm:$0xff]  ;;  %vm8645_vm14 = vmmov %vm8642_vm11 }
 0x38b   : > { %v3409_v27 = vrot.slane %v7554_v59, 7  ;;  %v3473_v61 = vrot.slane %v7554_v59, 1  ;;  %v7571_v7 = vsel %vm8636_vm4, %v3343_v9, 0.0  ;;  %v3344_v50 = vmax.f32 %v3312_v6, 0.0  ;;  %4787 = vmatprep.mubr.bf16.mxu0 %v3573_v23  ;;  %4817 = vmatprep.subr.bf16.mxu0 %v5096_v58  ;;  %v4749_v36 = vpop.f32.mrb[36].mxu1  ;;  %vm8646_vm2 = vmmov %vm8642_vm11 }
 0x38c   : > { %v3407_v10 = vrot.slane %v7571_v7, 7  ;;  %v3471_v35 = vrot.slane %v7571_v7, 1  ;;  %vm8638_vm0 = vnez %v8637_v53  ;;  %vm8640_vm8 = vnez %v8639_v18  ;;  %v3209_v23 = vpop.f32.mrb[37].mxu1  ;;  %vm8647_vm7 = vmmov %vm8644_vm5 }
 0x38d   : > { %v7580_v19 = vsel %vm8638_vm0, %v3346_v4, 0.0  ;;  %v7588_v62 = vsel %vm8640_vm8, %v3344_v50, 0.0  ;;  %v3444_v47 = vsel %vm8641_vm12, %v3400_v42, %v3401_v3  ;;  %v3317_v6 = vadd.f32 %v4749_v36, %v7313_v11  ;;  %v4750_v31 = vpop.f32.mrb[38].mxu1  ;;  %v5098_v3 = vld [vmem:[%s8064_s10 + $0x38] sm:$0xff]   ;;  %vm8649_vm10 = vmmov %vm8634_vm1 }
 0x38e   : > { %v3410_v12 = vrot.slane %v7580_v19, 7  ;;  %v3474_v49 = vrot.slane %v7580_v19, 1  ;;  %v3408_v14 = vrot.slane %v7588_v62, 7  ;;  %v3472_v9 = vrot.slane %v7588_v62, 1  ;;  %4818 = vmatpush3.bf16.msra.mxu0 %v5096_v58  ;;  %v3212_v58 = vpop.f32.mrb[39].mxu1  ;;  %vm8657_vm0 = vmmov %vm8646_vm2 }
 0x38f   : > { %v3502_v38 = vsel %vm8642_vm11, %v3470_v8, %v3471_v35  ;;  %v3315_v4 = vadd.f32 %v7313_v11, %v3209_v23  ;;  %4819 = vmatprep.subr.bf16.mxu0 %v5097_v46  ;;  %v7610_v42 = vsel %vm8644_vm5, %v3444_v47, %v7413_v29  ;;  %v3349_v53 = vmax.f32 %v3317_v6, 0.0  ;;  %vm8658_vm8 = vmmov %vm8657_vm0 }
 0x390   : > { %v3574_v50 = vpack.c.bf16 %v3502_v38, %v3503_v37  ;;  %v3499_v5 = vsel %vm8643_vm13, %v3473_v61, %v3474_v49  ;;  %v3318_v8 = vadd.f32 %v4750_v31, %v7313_v11  ;;  %v3500_v37 = vsel %vm8645_vm14, %v3472_v9, %v3473_v61  ;;  %vm8659_vm12 = vmmov %vm8644_vm5 }
 0x391   : > { %v3501_v18 = vsel %vm8646_vm2, %v3471_v35, %v3472_v9  ;;  %v3347_v36 = vmax.f32 %v3315_v4, 0.0  ;;  %v3316_v23 = vadd.f32 %v7313_v11, %v3212_v58  ;;  %v7621_v29 = vsel %vm8647_vm7, %v3443_v43, %v7438_v28  ;;  %v8650_v4 = vld [vmem:[#allocation23_spill] sm:$0xff]  ;;  %vm8660_vm11 = vmmov %vm8657_vm0 }
 0x392   : > { %4788 = vmatmul.mubr.bf16.gmra.mrb[44].mxu0 %v3574_v50  ;;  %v3575_v38 = vpack.c.bf16 %v3500_v37, %v3501_v18  ;;  %v7625_v6 = vsel %vm8487_vm3, %v3349_v53, 0.0  ;;  %v3350_v31 = vmax.f32 %v3318_v8, 0.0  ;;  %v3441_v35 = vsel %vm8649_vm10, %v3403_v54, %v3404_v63  ;;  %vm8653_vm3 = vmmov %vm8649_vm10 }
 0x393   : > { %4820 = vmatpush3.bf16.msra.mxu0 %v5097_v46  ;;  %v3477_v43 = vrot.slane %v7625_v6, 1  ;;  %vm8651_vm1 = vnez %v8650_v4  ;;  %v3348_v53 = vmax.f32 %v3316_v23, 0.0  ;;  %v3442_v18 = vsel %vm8653_vm3, %v3402_v1, %v3403_v54  ;;  %v4753_v4 = vpop.f32.mrb[40].mxu1  ;;  %vm8661_vm13 = vmmov %vm8657_vm0 }
 0x394   : > { %v7639_v50 = vsel %vm8651_vm1, %v3347_v36, 0.0  ;;  %4791 = vmatprep.mubr.bf16.mxu0 %v3575_v38  ;;  %4821 = vmatprep.subr.bf16.mxu0 %v5098_v3  ;;  %v7645_v37 = vsel %vm8489_vm6, %v3350_v31, 0.0  ;;  %v8654_v38 = vld [vmem:[#allocation26_spill] sm:$0xff]  ;;  %vm8656_vm6 = vmmov %vm8644_vm5  ;;  %v3321_v1 = vadd.f32 %v4753_v4, %v7313_v11  ;;  %v3225_v54 = vpop.f32.mrb[41].mxu1  ;;  %v8733_v30 = vpack.c.bf16 %v7621_v29, %v7610_v42 }
 0x395   : > { %v3411_v46 = vrot.slane %v7639_v50, 7  ;;  %v3475_v8 = vrot.slane %v7639_v50, 1  ;;  %v3478_v23 = vrot.slane %v7645_v37, 1  ;;  %vm8655_vm4 = vnez %v8654_v38  ;;  %v4754_v38 = vpop.f32.mrb[42].mxu1  ;;  %vm8664_vm14 = vmmov %vm8653_vm3 }
 0x396   : > { %v7657_v47 = vsel %vm8655_vm4, %v3348_v53, 0.0  ;;  %v7662_v31 = vsel %vm8656_vm6, %v3442_v18, %v7499_v13  ;;  %v3319_v53 = vadd.f32 %v7313_v11, %v3225_v54  ;;  %v7675_v13 = vsel %vm8659_vm12, %v3441_v35, %v7516_v15  ;;  %v3228_v41 = vpop.f32.mrb[43].mxu1  ;;  %v8662_v35 = vld [vmem:[#allocation29_spill] sm:$0xff]  ;;  %vm8665_vm2 = vmmov %vm8653_vm3 }
 0x397   : > { %v3412_v58 = vrot.slane %v7657_v47, 7  ;;  %v3476_v28 = vrot.slane %v7657_v47, 1  ;;  %v3498_v61 = vsel %vm8657_vm0, %v3474_v49, %v3475_v8  ;;  %4822 = vmatpush3.bf16.msra.mxu0 %v5098_v3  ;;  %v3495_v33 = vsel %vm8658_vm8, %v3477_v43, %v3478_v23  ;;  %vm8670_vm1 = vmmov %vm8656_vm6 }
 0x398   : > { %v3576_v16 = vpack.c.bf16 %v3498_v61, %v3499_v5  ;;  %v3353_v18 = vmax.f32 %v3321_v1, 0.0  ;;  %v3322_v4 = vadd.f32 %v4754_v38, %v7313_v11  ;;  %v3351_v54 = vmax.f32 %v3319_v53, 0.0  ;;  %vm8673_vm4 = vmmov %vm8670_vm1 }
 0x399   : > { %v3496_v49 = vsel %vm8660_vm11, %v3476_v28, %v3477_v43  ;;  %v3497_v3 = vsel %vm8661_vm13, %v3475_v8, %v3476_v28  ;;  %v3320_v5 = vadd.f32 %v7313_v11, %v3228_v41  ;;  %vm8663_vm5 = vnez %v8662_v35  ;;  %v8666_v28 = vld [vmem:[#allocation27_spill] sm:$0xff]  ;;  %v8671_v35 = vld [vmem:[#allocation30_spill] sm:$0xff]  ;;  %vm8674_vm6 = vmmov %vm8657_vm0 }
 0x39a   : > { %4792 = vmatmul.mubr.bf16.gmra.mrb[48].mxu0 %v3576_v16  ;;  %v3577_v61 = vpack.c.bf16 %v3496_v49, %v3497_v3  ;;  %v7687_v1 = vsel %vm8663_vm5, %v3353_v18, 0.0  ;;  %v3354_v38 = vmax.f32 %v3322_v4, 0.0  ;;  %v3439_v43 = vsel %vm8664_vm14, %v3405_v55, %v3406_v56  ;;  %v8668_v3 = vld [vmem:[#allocation31_spill] sm:$0xff]  ;;  %vm8675_vm8 = vmmov %vm8657_vm0 }
 0x39b   : > { %v3440_v41 = vsel %vm8665_vm2, %v3404_v63, %v3405_v55  ;;  %v3481_v8 = vrot.slane %v7687_v1, 1  ;;  %vm8667_vm7 = vnez %v8666_v28  ;;  %v3352_v18 = vmax.f32 %v3320_v5, 0.0  ;;  %vm8676_vm12 = vmmov %vm8657_vm0 }
 0x39c   : > { %v7705_v53 = vsel %vm8667_vm7, %v3351_v54, 0.0  ;;  %4795 = vmatprep.mubr.bf16.mxu0 %v3577_v61  ;;  %vm8669_vm10 = vnez %v8668_v3  ;;  %v7716_v55 = vsel %vm8670_vm1, %v3440_v41, %v7483_v26  ;;  %vm8672_vm3 = vnez %v8671_v35  ;;  %v4757_v61 = vpop.f32.mrb[44].mxu1  ;;  %vm8677_vm11 = vmmov %vm8665_vm2 }
 0x39d   : > { %v3479_v49 = vrot.slane %v7705_v53, 1  ;;  %v7711_v15 = vsel %vm8669_vm10, %v3354_v38, 0.0  ;;  %v7722_v5 = vsel %vm8672_vm3, %v3352_v18, 0.0  ;;  %v7727_v28 = vsel %vm8673_vm4, %v3439_v43, %v7508_v0  ;;  %v3241_v41 = vpop.f32.mrb[45].mxu1  ;;  %vm8678_vm13 = vmmov %vm8665_vm2 }
 0x39e   : > { %v3482_v54 = vrot.slane %v7711_v15, 1  ;;  %v3480_v3 = vrot.slane %v7722_v5, 1  ;;  %v3325_v26 = vadd.f32 %v4757_v61, %v7313_v11  ;;  %v3323_v35 = vadd.f32 %v7313_v11, %v3241_v41  ;;  %v4758_v18 = vpop.f32.mrb[46].mxu1  ;;  %vm8679_vm5 = vmmov %vm8670_vm1 }
 0x39f   : > { %v3494_v32 = vsel %vm8674_vm6, %v3478_v23, %v3479_v49  ;;  %v3558_v43 = vpack.c.bf16 %v7727_v28, %v7716_v55  ;;  %v3326_v38 = vadd.f32 %v4758_v18, %v7313_v11  ;;  %v3244_v9 = vpop.f32.mrb[47].mxu1  ;;  %vm8681_vm14 = vmmov %vm8670_vm1  ;;  %vm8682_vm2 = vnez %v8382_v34 }
 0x3a0   : > { %v3578_v16 = vpack.c.bf16 %v3494_v32, %v3495_v33  ;;  %v3491_v63 = vsel %vm8657_vm0, %v3481_v8, %v3482_v54  ;;  %v3357_v4 = vmax.f32 %v3325_v26, 0.0  ;;  %v3492_v61 = vsel %vm8675_vm8, %v3480_v3, %v3481_v8  ;;  %vm8683_vm7 = vmmov %vm8657_vm0 }
 0x3a1   : > { %v3493_v23 = vsel %vm8676_vm12, %v3479_v49, %v3480_v3  ;;  %v3355_v36 = vmax.f32 %v3323_v35, 0.0  ;;  %v3324_v41 = vadd.f32 %v7313_v11, %v3244_v9  ;;  %v3437_v33 = vsel %vm8677_vm11, %v3407_v10, %v3408_v14  ;;  %vm8685_vm10 = vmmov %vm8657_vm0 }
 0x3a2   : > { %4796 = vmatmul.mubr.bf16.gmra.mrb[52].mxu0 %v3578_v16  ;;  %v3579_v32 = vpack.c.bf16 %v3492_v61, %v3493_v23  ;;  %v7753_v26 = vsel %vm6429_vm9, %v3357_v4, 0.0  ;;  %v3358_v8 = vmax.f32 %v3326_v38, 0.0  ;;  %v3438_v11 = vsel %vm8678_vm13, %v3406_v56, %v3407_v10  ;;  %vm8686_vm1 = vmmov %vm8657_vm0 }
 0x3a3   : > { %v7764_v9 = vsel %vm8679_vm5, %v3437_v33, %v7588_v62  ;;  %v3421_v16 = vrot.slane %v7753_v26, 7  ;;  %v3485_v49 = vrot.slane %v7753_v26, 1  ;;  %vm8680_vm9 = vnez %v8364_v44  ;;  %vm8687_vm3 = vmmov %vm8677_vm11 }
 0x3a4   : > { %v3387_v24 = vsel %vm8680_vm9, %v3355_v36, 0.0  ;;  %v3356_v4 = vmax.f32 %v3324_v41, 0.0  ;;  %4799 = vmatprep.mubr.bf16.mxu0 %v3579_v32  ;;  %v3390_v0 = vsel %vm8517_vm15, %v3358_v8, 0.0  ;;  %v7775_v56 = vsel %vm8681_vm14, %v3438_v11, %v7571_v7  ;;  %vm8684_vm15 = vmmov %vm8677_vm11 }
 0x3a5   : > { %v3419_v38 = vrot.slane %v3387_v24, 7  ;;  %v3483_v3 = vrot.slane %v3387_v24, 1  ;;  %v3422_v10 = vrot.slane %v3390_v0, 7  ;;  %v3486_v35 = vrot.slane %v3390_v0, 1  ;;  %vm8688_vm4 = vmmov %vm8657_vm0 }
 0x3a6   : > { %v3388_v18 = vsel %vm8682_vm2, %v3356_v4, 0.0  ;;  %v3559_v44 = vpack.c.bf16 %v7764_v9, %v7775_v56  ;;  %v3435_v51 = vsel %vm8684_vm15, %v3409_v27, %v3410_v12  ;;  %vm8689_vm6 = vmmov %vm8657_vm0  ;;  %v8697_v62 = vrot.slane %v7625_v6, 7 }
 0x3a7   : > { %v3420_v36 = vrot.slane %v3388_v18, 7  ;;  %v3484_v61 = vrot.slane %v3388_v18, 1  ;;  %v3490_v23 = vsel %vm8683_vm7, %v3482_v54, %v3483_v3  ;;  %v3487_v34 = vsel %vm8685_vm10, %v3485_v49, %v3486_v35  ;;  %vm8690_vm0 = vmmov %vm8679_vm5 }
 0x3a8   : > { %v3580_v7 = vpack.c.bf16 %v3490_v23, %v3491_v63  ;;  %v3518_v41 = vsel %vm8686_vm1, %v3486_v35, %v3455_v39  ;;  %v3454_v54 = vsel %vm8687_vm3, %v3422_v10, %v3391_v45  ;;  %vm8691_vm8 = vmmov %vm8687_vm3  ;;  %v8705_v35 = vrot.slane %v7722_v5, 7 }
 0x3a9   : > { %v3488_v32 = vsel %vm8688_vm4, %v3484_v61, %v3485_v49  ;;  %v3489_v33 = vsel %vm8689_vm6, %v3483_v3, %v3484_v61  ;;  %v3582_v63 = vpack.c.bf16 %v3518_v41, %v3487_v34  ;;  %v3519_v8 = vsel %vm8690_vm0, %v3454_v54, %v7323_v17  ;;  %vm8692_vm12 = vmmov %vm8690_vm0 }
 0x3aa   : > { %4800 = vmatmul.mubr.bf16.gmra.mrb[56].mxu0 %v3580_v7  ;;  %v3581_v11 = vpack.c.bf16 %v3488_v32, %v3489_v33  ;;  %v3551_v39 = vpack.c.bf16 %v7386_v52, %v3519_v8  ;;  %v3436_v45 = vsel %vm8691_vm8, %v3408_v14, %v3409_v27  ;;  %v3538_v9 = vsel %vm8692_vm12, %v3435_v51, %v7580_v19  ;;  %vm8693_vm11 = vmmov %vm8690_vm0 }
 0x3ab   : > { %v3537_v49 = vsel %vm8693_vm11, %v3436_v45, %v7554_v59  ;;  %vm8694_vm13 = vmmov %vm8687_vm3  ;;  %v8696_v27 = vrot.slane %v7645_v37, 7  ;;  %v8701_v3 = vmov %v8697_v62  ;;  %v8706_v61 = vrot.slane %v7705_v53, 7 }
 0x3ac   : > { %v3433_v17 = vsel %vm8694_vm13, %v3411_v46, %v3412_v58  ;;  %vm8695_vm5 = vmmov %vm8687_vm3  ;;  %4803 = vmatprep.mubr.bf16.mxu0 %v3581_v11  ;;  %v3560_v14 = vpack.c.bf16 %v3538_v9, %v3537_v49  ;;  %v8712_v34 = vrot.slane %v7711_v15, 7  ;;  %v8713_v41 = vrot.slane %v7687_v1, 7 }
 0x3ad   : > { %v3434_v52 = vsel %vm8695_vm5, %v3410_v12, %v3411_v46  ;;  %vm8698_vm9 = vmmov %vm8687_vm3  ;;  %v8708_v51 = vmov %v8706_v61  ;;  %v8716_v33 = vmov %v8705_v35 }
 0x3ae   : > { %v3431_v59 = vsel %vm8698_vm9, %v8697_v62, %v8696_v27  ;;  %vm8699_vm14 = vmmov %vm8690_vm0 }
 0x3af   : > { %v3539_v4 = vsel %vm8699_vm14, %v3434_v52, %v7639_v50  ;;  %vm8700_vm2 = vmmov %vm8690_vm0 }
 0x3b0   : > { %v3540_v19 = vsel %vm8700_vm2, %v3433_v17, %v7657_v47  ;;  %vm8702_vm7 = vmmov %vm8687_vm3 }
 0x3b1   : > { %v3432_v12 = vsel %vm8702_vm7, %v3412_v58, %v8701_v3  ;;  %v3561_v46 = vpack.c.bf16 %v3540_v19, %v3539_v4  ;;  %vm8703_vm15 = vmmov %vm8690_vm0  ;;  %v8709_v58 = vmov %v8696_v27 }
 0x3b2   : > { %v3541_v56 = vsel %vm8703_vm15, %v3432_v12, %v7625_v6  ;;  %vm8704_vm10 = vmmov %vm8690_vm0  ;;  %4804 = vmatmul.mubr.bf16.gmra.mrb[60].mxu0 %v3582_v63 }
 0x3b3   : > { %v3542_v50 = vsel %vm8704_vm10, %v3431_v59, %v7645_v37  ;;  %vm8707_vm1 = vmmov %vm8687_vm3  ;;  %v8715_v37 = vmov %v8713_v41  ;;  %4823 = vmatprep.mubr.bf16.mxu0 %v3551_v39 }
 0x3b4   : > { %v3429_v23 = vsel %vm8707_vm1, %v8706_v61, %v8705_v35  ;;  %v3562_v47 = vpack.c.bf16 %v3542_v50, %v3541_v56  ;;  %vm8710_vm3 = vmmov %vm8707_vm1 }
 0x3b5   : > { %v3430_v7 = vsel %vm8710_vm3, %v8709_v58, %v8708_v51  ;;  %vm8711_vm4 = vmmov %vm8690_vm0 }
 0x3b6   : > { %v3544_v6 = vsel %vm8711_vm4, %v3429_v23, %v7722_v5  ;;  %vm8714_vm6 = vmmov %vm8707_vm1  ;;  %v3543_v32 = vsel %vm8690_vm0, %v3430_v7, %v7705_v53  ;;  %v8721_v53 = vmov %v8712_v34 }
 0x3b7   : > { %v3427_v54 = vsel %vm8714_vm6, %v8713_v41, %v8712_v34  ;;  %vm8717_vm8 = vmmov %vm8707_vm1  ;;  %v3563_v9 = vpack.c.bf16 %v3544_v6, %v3543_v32 }
 0x3b8   : > { %v3428_v8 = vsel %vm8717_vm8, %v8716_v33, %v8715_v37  ;;  %vm8718_vm12 = vmmov %vm8690_vm0 }
 0x3b9   : > { %v3546_v11 = vsel %vm8718_vm12, %v3427_v54, %v7711_v15  ;;  %vm8719_vm11 = vmmov %vm8707_vm1 }
 0x3ba   : > { %v3425_v45 = vsel %vm8719_vm11, %v3419_v38, %v3420_v36  ;;  %vm8720_vm13 = vmmov %vm8690_vm0 }
 0x3bb   : > { %v3545_v49 = vsel %vm8720_vm13, %v3428_v8, %v7687_v1  ;;  %vm8722_vm5 = vmmov %vm8707_vm1 }
 0x3bc   : > { %v3426_v5 = vsel %vm8722_vm5, %v8721_v53, %v3419_v38  ;;  %vm8723_vm9 = vmmov %vm8690_vm0  ;;  %v3564_v52 = vpack.c.bf16 %v3546_v11, %v3545_v49 }
 0x3bd   : > { %v3548_v17 = vsel %vm8723_vm9, %v3425_v45, %v3388_v18  ;;  %vm8724_vm14 = vmmov %vm8690_vm0 }
 0x3be   : > { %v3547_v27 = vsel %vm8724_vm14, %v3426_v5, %v3387_v24  ;;  %vm8725_vm2 = vmmov %vm8707_vm1  ;;  %v8729_v24 = vpack.c.bf16 %v7346_v48, %v7353_v21  ;;  %v8734_v48 = vpack.c.bf16 %v7675_v13, %v7662_v31  ;;  %v7934_v21 = vld [vmem:[%s8066_s12] ss:$0 sm:$0xff] }
 0x3bf   : > { %v3423_v62 = vsel %vm8725_vm2, %v3421_v16, %v3422_v10  ;;  %vm8726_vm7 = vmmov %vm8707_vm1  ;;  %v3565_v1 = vpack.c.bf16 %v3548_v17, %v3547_v27  ;;  %v8730_v10 = vpack.c.bf16 %v7423_v57, %v7442_v60  ;;  %vm4072_vm1 = vcmask 64512  }
 0x3c0   : > { %v3424_v59 = vsel %vm8726_vm7, %v3420_v36, %v3421_v16  ;;  %vm8727_vm15 = vmmov %vm8690_vm0  ;;  %4824 = vmatmul.mubr.bf16.vlgmr.msra.gmra.mrb[32].mxu0 %v8729_v24 }
 0x3c1   : > { %v3549_v15 = vsel %vm8727_vm15, %v3424_v59, %v7753_v26  ;;  %vm8728_vm10 = vmmov %vm8690_vm0  ;;  %4827 = vmatprep.mubr.bf16.mxu0 %v8730_v10  ;;  %v8732_v26 = vpack.c.bf16 %v7559_v25, %v7550_v22 }
 0x3c2   : > { %v3550_v38 = vsel %vm8728_vm10, %v3423_v62, %v3390_v0 }
 0x3c3   : > { %v3566_v18 = vpack.c.bf16 %v3550_v38, %v3549_v15 }
 0x3c8   : > { %4828 = vmatmul.mubr.bf16.gmra.mrb[36].mxu0 %v8731_v2 }
 0x3c9   : > { %4831 = vmatprep.mubr.bf16.mxu0 %v8732_v26 }
 0x3d0   : > { %4832 = vmatmul.mubr.bf16.gmra.mrb[40].mxu0 %v8733_v30 }
 0x3d1   : > { %4835 = vmatprep.mubr.bf16.mxu0 %v8734_v48 }
 0x3d8   : > { %4836 = vmatmul.mubr.bf16.gmra.mrb[44].mxu0 %v3558_v43 }
 0x3d9   : > { %4839 = vmatprep.mubr.bf16.mxu0 %v3559_v44 }
 0x3e0   : > { %4840 = vmatmul.mubr.bf16.gmra.mrb[48].mxu0 %v3560_v14 }
 0x3e1   : > { %4843 = vmatprep.mubr.bf16.mxu0 %v3561_v46 }
 0x3e8   : > { %4844 = vmatmul.mubr.bf16.gmra.mrb[52].mxu0 %v3562_v47 }
 0x3e9   : > { %4847 = vmatprep.mubr.bf16.mxu0 %v3563_v9 }
 0x3f0   : > { %4848 = vmatmul.mubr.bf16.gmra.mrb[56].mxu0 %v3564_v52 }
 0x3f1   : > { %4851 = vmatprep.mubr.bf16.mxu0 %v3565_v1 }
 0x3f8   : > { %4852 = vmatmul.mubr.bf16.gmra.mrb[60].mxu0 %v3566_v18 }
 0x493   : > { %v4825_v57 = vpop.f32.mrb[32].mxu0 }
 0x494   : > { %v4042_v60 = vadd.f32 %v4825_v57, %v7934_v21  ;;  %v3906_v20 = vpop.f32.mrb[33].mxu0 }
 0x495   : > { %v4040_v40 = vadd.f32 %v7934_v21, %v3906_v20  ;;  %v4826_v22 = vpop.f32.mrb[34].mxu0 }
 0x496   : > { %4075 = vst.msk [vmem:[%s7941_s24 + $0x10] sm:$0xff] %vm4072_vm1, %v4042_v60  ;;  %v4043_v25 = vadd.f32 %v4826_v22, %v7934_v21  ;;  %v3909_v42 = vpop.f32.mrb[35].mxu0 }
 0x497   : > { %4073 = vst.msk [vmem:[%s7941_s24] sm:$0xff] %vm4072_vm1, %v4040_v40  ;;  %v4041_v29 = vadd.f32 %v7934_v21, %v3909_v42 }
 0x498   : > { %4076 = vst.msk [vmem:[%s7941_s24 + $0x18] sm:$0xff] %vm4072_vm1, %v4043_v25 }
 0x499   : > { %4074 = vst.msk [vmem:[%s7941_s24 + $0x8] sm:$0xff] %vm4072_vm1, %v4041_v29 }
 0x49b   : > { %v4829_v31 = vpop.f32.mrb[36].mxu0 }
 0x49c   : > { %v4046_v13 = vadd.f32 %v4829_v31, %v7934_v21  ;;  %v3922_v55 = vpop.f32.mrb[37].mxu0 }
 0x49d   : > { %v4044_v28 = vadd.f32 %v7934_v21, %v3922_v55  ;;  %v4830_v43 = vpop.f32.mrb[38].mxu0 }
 0x49e   : > { %4079 = vst.msk [vmem:[%s7941_s24 + $0x30] sm:$0xff] %vm4072_vm1, %v4046_v13  ;;  %v4047_v16 = vadd.f32 %v4830_v43, %v7934_v21  ;;  %v3925_v0 = vpop.f32.mrb[39].mxu0 }
 0x49f   : > { %4077 = vst.msk [vmem:[%s7941_s24 + $0x20] sm:$0xff] %vm4072_vm1, %v4044_v28  ;;  %v4045_v44 = vadd.f32 %v7934_v21, %v3925_v0 }
 0x4a0   : > { %4080 = vst.msk [vmem:[%s7941_s24 + $0x38] sm:$0xff] %vm4072_vm1, %v4047_v16 }
 0x4a1   : > { %4078 = vst.msk [vmem:[%s7941_s24 + $0x28] sm:$0xff] %vm4072_vm1, %v4045_v44 }
 0x4a3   : > { %v4833_v36 = vpop.f32.mrb[40].mxu0 }
 0x4a4   : > { %v4050_v63 = vadd.f32 %v4833_v36, %v7934_v21  ;;  %v3938_v39 = vpop.f32.mrb[41].mxu0 }
 0x4a5   : > { %v4048_v14 = vadd.f32 %v7934_v21, %v3938_v39  ;;  %v4834_v4 = vpop.f32.mrb[42].mxu0 }
 0x4a6   : > { %4083 = vst.msk [vmem:[%s7941_s24 + $0x50] sm:$0xff] %vm4072_vm1, %v4050_v63  ;;  %v4051_v19 = vadd.f32 %v4834_v4, %v7934_v21  ;;  %v3941_v3 = vpop.f32.mrb[43].mxu0 }
 0x4a7   : > { %4081 = vst.msk [vmem:[%s7941_s24 + $0x40] sm:$0xff] %vm4072_vm1, %v4048_v14  ;;  %v4049_v12 = vadd.f32 %v7934_v21, %v3941_v3 }
 0x4a8   : > { %4084 = vst.msk [vmem:[%s7941_s24 + $0x58] sm:$0xff] %vm4072_vm1, %v4051_v19 }
 0x4a9   : > { %4082 = vst.msk [vmem:[%s7941_s24 + $0x48] sm:$0xff] %vm4072_vm1, %v4049_v12 }
 0x4ab   : > { %v4837_v46 = vpop.f32.mrb[44].mxu0 }
 0x4ac   : > { %v4054_v56 = vadd.f32 %v4837_v46, %v7934_v21  ;;  %v3954_v50 = vpop.f32.mrb[45].mxu0 }
 0x4ad   : > { %v4052_v35 = vadd.f32 %v7934_v21, %v3954_v50  ;;  %v4838_v61 = vpop.f32.mrb[46].mxu0 }
 0x4ae   : > { %4087 = vst.msk [vmem:[%s7941_s24 + $0x70] sm:$0xff] %vm4072_vm1, %v4054_v56  ;;  %v4055_v23 = vadd.f32 %v4838_v61, %v7934_v21  ;;  %v3957_v47 = vpop.f32.mrb[47].mxu0 }
 0x4af   : > { %4085 = vst.msk [vmem:[%s7941_s24 + $0x60] sm:$0xff] %vm4072_vm1, %v4052_v35  ;;  %v4053_v51 = vadd.f32 %v7934_v21, %v3957_v47 }
 0x4b0   : > { %4088 = vst.msk [vmem:[%s7941_s24 + $0x78] sm:$0xff] %vm4072_vm1, %v4055_v23 }
 0x4b1   : > { %4086 = vst.msk [vmem:[%s7941_s24 + $0x68] sm:$0xff] %vm4072_vm1, %v4053_v51 }
 0x4b3   : > { %v4841_v58 = vpop.f32.mrb[48].mxu0 }
 0x4b4   : > { %v4058_v7 = vadd.f32 %v4841_v58, %v7934_v21  ;;  %v3970_v6 = vpop.f32.mrb[49].mxu0 }
 0x4b5   : > { %v4056_v34 = vadd.f32 %v7934_v21, %v3970_v6  ;;  %v4842_v41 = vpop.f32.mrb[50].mxu0 }
 0x4b6   : > { %4091 = vst.msk [vmem:[%s7941_s24 + $0x90] sm:$0xff] %vm4072_vm1, %v4058_v7  ;;  %v4059_v54 = vadd.f32 %v4842_v41, %v7934_v21  ;;  %v3973_v32 = vpop.f32.mrb[51].mxu0 }
 0x4b7   : > { %4089 = vst.msk [vmem:[%s7941_s24 + $0x80] sm:$0xff] %vm4072_vm1, %v4056_v34  ;;  %v4057_v37 = vadd.f32 %v7934_v21, %v3973_v32 }
 0x4b8   : > { %4092 = vst.msk [vmem:[%s7941_s24 + $0x98] sm:$0xff] %vm4072_vm1, %v4059_v54 }
 0x4b9   : > { %4090 = vst.msk [vmem:[%s7941_s24 + $0x88] sm:$0xff] %vm4072_vm1, %v4057_v37 }
 0x4bb   : > { %v4845_v33 = vpop.f32.mrb[52].mxu0 }
 0x4bc   : > { %v4062_v8 = vadd.f32 %v4845_v33, %v7934_v21  ;;  %v3986_v11 = vpop.f32.mrb[53].mxu0 }
 0x4bd   : > { %v4060_v45 = vadd.f32 %v7934_v21, %v3986_v11  ;;  %v4846_v9 = vpop.f32.mrb[54].mxu0 }
 0x4be   : > { %4095 = vst.msk [vmem:[%s7941_s24 + $0xb0] sm:$0xff] %vm4072_vm1, %v4062_v8  ;;  %v4063_v49 = vadd.f32 %v4846_v9, %v7934_v21  ;;  %v3989_v53 = vpop.f32.mrb[55].mxu0 }
 0x4bf   : > { %4093 = vst.msk [vmem:[%s7941_s24 + $0xa0] sm:$0xff] %vm4072_vm1, %v4060_v45  ;;  %v4061_v5 = vadd.f32 %v7934_v21, %v3989_v53 }
 0x4c0   : > { %4096 = vst.msk [vmem:[%s7941_s24 + $0xb8] sm:$0xff] %vm4072_vm1, %v4063_v49 }
 0x4c1   : > { %4094 = vst.msk [vmem:[%s7941_s24 + $0xa8] sm:$0xff] %vm4072_vm1, %v4061_v5 }
 0x4c3   : > { %v4849_v17 = vpop.f32.mrb[56].mxu0 }
 0x4c4   : > { %v4066_v52 = vadd.f32 %v4849_v17, %v7934_v21  ;;  %v4002_v27 = vpop.f32.mrb[57].mxu0 }
 0x4c5   : > { %v4064_v62 = vadd.f32 %v7934_v21, %v4002_v27  ;;  %v4850_v59 = vpop.f32.mrb[58].mxu0 }
 0x4c6   : > { %4099 = vst.msk [vmem:[%s7941_s24 + $0xd0] sm:$0xff] %vm4072_vm1, %v4066_v52  ;;  %v4067_v1 = vadd.f32 %v4850_v59, %v7934_v21  ;;  %v4005_v15 = vpop.f32.mrb[59].mxu0 }
 0x4c7   : > { %4097 = vst.msk [vmem:[%s7941_s24 + $0xc0] sm:$0xff] %vm4072_vm1, %v4064_v62  ;;  %v4065_v38 = vadd.f32 %v7934_v21, %v4005_v15 }
 0x4c8   : > { %4100 = vst.msk [vmem:[%s7941_s24 + $0xd8] sm:$0xff] %vm4072_vm1, %v4067_v1 }
 0x4c9   : > { %4098 = vst.msk [vmem:[%s7941_s24 + $0xc8] sm:$0xff] %vm4072_vm1, %v4065_v38 }
 0x4cb   : > { %v4853_v18 = vpop.f32.mrb[60].mxu0 }
 0x4cc   : > { %v4070_v24 = vadd.f32 %v4853_v18, %v7934_v21  ;;  %v4018_v10 = vpop.f32.mrb[61].mxu0 }
 0x4cd   : > { %v4068_v2 = vadd.f32 %v7934_v21, %v4018_v10  ;;  %v4854_v26 = vpop.f32.mrb[62].mxu0 }
 0x4ce   : > { %4103 = vst.msk [vmem:[%s7941_s24 + $0xf0] sm:$0xff] %vm4072_vm1, %v4070_v24  ;;  %v4071_v30 = vadd.f32 %v4854_v26, %v7934_v21  ;;  %v4021_v48 = vpop.f32.mrb[63].mxu0 }
 0x4cf   : > { %4101 = vst.msk [vmem:[%s7941_s24 + $0xe0] sm:$0xff] %vm4072_vm1, %v4068_v2  ;;  %v4069_v57 = vadd.f32 %v7934_v21, %v4021_v48 }
 0x4d0   : > { %4104 = vst.msk [vmem:[%s7941_s24 + $0xf8] sm:$0xff] %vm4072_vm1, %v4071_v30 }
 0x4d1   : > { %4102 = vst.msk [vmem:[%s7941_s24 + $0xe8] sm:$0xff] %vm4072_vm1, %v4069_v57 }
 0x4d2 PF: > { %s23_s29 = sadd.s32 1, %s5138_s29   ;;  %s8735_s25 = smov %s5130_s27 }
 0x4d3   : > { %p20_p7 = scmp.ge.s32.totalorder %s23_s29, 8   ;;  %s8736_s26 = smov %s5134_s28 }
 0x4d4   : > { %s8737_s27 = smov %s8740_s30  ;;  %s8738_s28 = smov %s8744_s14 }
 0x4d5   :  { %22 = sbr.rel (!%p20_p7) target bundleno = 3 (0x3), region = 102 }

</bundles_post_ra>
